<compile_context>
chip_gen: v7x
topology: tpu7x:2x2x1
jax: 0.10.0
libtpu: 0.0.40
codegen_flags: <defaults>
</compile_context>

<pallas_src>
import functools
import math

import jax
import jax.numpy as jnp
from jax import lax
from jax.experimental import pallas as pl
from jax.experimental.pallas import tpu as pltpu


# Left padding (columns) inside the VMEM pad scratch.  8 keeps the interior
# store sublane-aligned; only one column of it is logically used as padding.
_LPAD = 8


def _conv3x3_taps(pad_ref, w_ref, H, W, cout):
    """3x3 'same' conv as 9 shifted-window reads of the zero-padded scratch,
    each feeding a (H*W, Cin) @ (Cin, Cout) MXU matmul."""
    acc = jnp.zeros((H * W, cout), jnp.float32)
    for dy in range(3):
        for dx in range(3):
            c0 = _LPAD - 1 + dx
            patch = pad_ref[dy:dy + H, c0:c0 + W, :]
            acc = acc + jnp.dot(patch.reshape(H * W, -1),
                                w_ref[0, dy * 3 + dx],
                                preferred_element_type=jnp.float32)
    return acc


def _fused_forward_kernel(x_ref, sw_ref, sb_ref, w1_ref, b1_ref, w2_ref, b2_ref,
                          wsp_ref, bsp_ref, rw_ref, rb_ref, ow_ref, ob_ref,
                          o_ref, x_cur, x_in, xpad, hpad, *, H, W, norm):
    k = pl.program_id(1)
    C = x_cur.shape[-1]
    F = hpad.shape[-1]

    # First block step for this image: zero pad-scratch borders (interior is
    # overwritten every step), run start_conv, init carried state.
    @pl.when(k == 0)
    def _init():
        xpad[...] = jnp.zeros_like(xpad)
        hpad[...] = jnp.zeros_like(hpad)
        xs = jnp.dot(x_ref[0].astype(jnp.float32), sw_ref[...],
                     preferred_element_type=jnp.float32) + sb_ref[...]
        x_cur[...] = xs
        x_in[...] = xs

    # HSI prior block (3x3 -> relu -> 3x3, + x, spectral 1x1) fused with the
    # shared residual 1x1 conv and the x_in skip.
    xpad[1:H + 1, _LPAD:_LPAD + W, :] = x_cur[...].reshape(H, W, C)
    h = _conv3x3_taps(xpad, w1_ref, H, W, F) + b1_ref[0]
    h = jnp.maximum(h, 0.0)

    hpad[1:H + 1, _LPAD:_LPAD + W, :] = h.reshape(H, W, F)
    t = _conv3x3_taps(hpad, w2_ref, H, W, C) + b2_ref[0] + x_cur[...]
    x_hsi = jnp.dot(t, wsp_ref[0], preferred_element_type=jnp.float32) + bsp_ref[0]
    x_res = jnp.dot(x_cur[...], rw_ref[...],
                    preferred_element_type=jnp.float32) + rb_ref[...]
    x_cur[...] = x_res + x_hsi + x_in[...]

    # Last block step: output 1x1 conv (+ optional norm) straight to the
    # output block (written back to HBM once per image).
    @pl.when(k == pl.num_programs(1) - 1)
    def _finish():
        y = jnp.dot(x_cur[...], ow_ref[...],
                    preferred_element_type=jnp.float32) + ob_ref[...]
        if norm == "sigmoid":
            y = jax.nn.sigmoid(y)
        elif norm == "tanh":
            y = jnp.tanh(y)
        o_ref[...] = y.reshape(1, H * W, C).astype(o_ref.dtype)


def _head_tail_kernel(x_ref, sw_ref, sb_ref, ow_ref, ob_ref, o_ref, *, norm):
    # Fallback for block_num == 0: output_conv(start_conv(x)) (+ norm).
    xs = jnp.dot(x_ref[0].astype(jnp.float32), sw_ref[...],
                 preferred_element_type=jnp.float32) + sb_ref[...]
    y = jnp.dot(xs, ow_ref[...], preferred_element_type=jnp.float32) + ob_ref[...]
    if norm == "sigmoid":
        y = jax.nn.sigmoid(y)
    elif norm == "tanh":
        y = jnp.tanh(y)
    o_ref[...] = y.reshape(1, *o_ref.shape[1:]).astype(o_ref.dtype)


def _head_tail(x_flat, params, norm, H, W):
    B, _, Cin = x_flat.shape
    C = params["start_w"].shape[-1]
    kernel = functools.partial(_head_tail_kernel, norm=norm)
    return pl.pallas_call(
        kernel,
        out_shape=jax.ShapeDtypeStruct((B, H * W, C), x_flat.dtype),
        grid=(B,),
        in_specs=[
            pl.BlockSpec((1, H * W, Cin), lambda b: (b, 0, 0)),
            pl.BlockSpec((Cin, C), lambda b: (0, 0)),
            pl.BlockSpec((1, C), lambda b: (0, 0)),
            pl.BlockSpec((C, C), lambda b: (0, 0)),
            pl.BlockSpec((1, C), lambda b: (0, 0)),
        ],
        out_specs=pl.BlockSpec((1, H * W, C), lambda b: (b, 0, 0)),
        compiler_params=pltpu.CompilerParams(dimension_semantics=("parallel",)),
    )(x_flat, params["start_w"], params["start_b"],
      params["out_w"], params["out_b"])


def deep_ss_prior_forward(x_nchw, params, output_norm=None):
    """Matches DeepSSPrior.forward.  Input/output are NCHW like PyTorch."""
    B, Cin, H, W = x_nchw.shape
    C = params["start_w"].shape[-1]
    blocks = params["blocks"]
    bn = len(blocks)

    x_flat = jnp.transpose(x_nchw, (0, 2, 3, 1)).reshape(B, H * W, Cin)

    if bn == 0:
        y = _head_tail(x_flat, params, output_norm, H, W)
    else:
        F = blocks[0]["w1"].shape[-1]
        # Stack per-block weights so the grid's block axis streams them.
        w1_all = jnp.stack([blk["w1"].reshape(9, C, F) for blk in blocks])
        b1_all = jnp.stack([blk["b1"] for blk in blocks])        # (bn, 1, F)
        w2_all = jnp.stack([blk["w2"].reshape(9, F, C) for blk in blocks])
        b2_all = jnp.stack([blk["b2"] for blk in blocks])        # (bn, 1, C)
        wsp_all = jnp.stack([blk["wspec"] for blk in blocks])    # (bn, C, C)
        bsp_all = jnp.stack([blk["bspec"] for blk in blocks])    # (bn, 1, C)

        kernel = functools.partial(_fused_forward_kernel, H=H, W=W,
                                   norm=output_norm)
        pad_w = W + _LPAD + 1
        y = pl.pallas_call(
            kernel,
            out_shape=jax.ShapeDtypeStruct((B, H * W, C), x_nchw.dtype),
            grid=(B, bn),
            in_specs=[
                pl.BlockSpec((1, H * W, Cin), lambda b, k: (b, 0, 0)),
                pl.BlockSpec((Cin, C), lambda b, k: (0, 0)),
                pl.BlockSpec((1, C), lambda b, k: (0, 0)),
                pl.BlockSpec((1, 9, C, F), lambda b, k: (k, 0, 0, 0)),
                pl.BlockSpec((1, 1, F), lambda b, k: (k, 0, 0)),
                pl.BlockSpec((1, 9, F, C), lambda b, k: (k, 0, 0, 0)),
                pl.BlockSpec((1, 1, C), lambda b, k: (k, 0, 0)),
                pl.BlockSpec((1, C, C), lambda b, k: (k, 0, 0)),
                pl.BlockSpec((1, 1, C), lambda b, k: (k, 0, 0)),
                pl.BlockSpec((C, C), lambda b, k: (0, 0)),
                pl.BlockSpec((1, C), lambda b, k: (0, 0)),
                pl.BlockSpec((C, C), lambda b, k: (0, 0)),
                pl.BlockSpec((1, C), lambda b, k: (0, 0)),
            ],
            out_specs=pl.BlockSpec((1, H * W, C), lambda b, k: (b, 0, 0)),
            scratch_shapes=[
                pltpu.VMEM((H * W, C), jnp.float32),      # carried x
                pltpu.VMEM((H * W, C), jnp.float32),      # carried x_in
                pltpu.VMEM((H + 2, pad_w, C), jnp.float32),  # padded x
                pltpu.VMEM((H + 2, pad_w, F), jnp.float32),  # padded h
            ],
            compiler_params=pltpu.CompilerParams(
                dimension_semantics=("parallel", "arbitrary")),
        )(x_flat, params["start_w"], params["start_b"],
          w1_all, b1_all, w2_all, b2_all, wsp_all, bsp_all,
          params["res_w"], params["res_b"], params["out_w"], params["out_b"])

    y = y.reshape(B, H, W, C)
    return jnp.transpose(y, (0, 3, 1, 2))


# ---------------------------------------------------------------------------
# Pure-JAX reference (lax.conv) for correctness checking
# ---------------------------------------------------------------------------

def ref_forward(x_nchw, params, output_norm=None):
    x = jnp.transpose(x_nchw, (0, 2, 3, 1))
    dn = ("NHWC", "HWIO", "NHWC")

    def c1(a, w, b):
        return lax.conv_general_dilated(a, w.reshape(1, 1, *w.shape), (1, 1),
                                        "VALID", dimension_numbers=dn) + b

    def c3(a, w, b):
        return lax.conv_general_dilated(a, w, (1, 1), "SAME",
                                        dimension_numbers=dn) + b

    x = c1(x, params["start_w"], params["start_b"])
    x_in = x
    for blk in params["blocks"]:
        h = jax.nn.relu(c3(x, blk["w1"], blk["b1"]))
        h = c3(h, blk["w2"], blk["b2"])
        x_hsi = c1(h + x, blk["wspec"], blk["bspec"])
        x_res = c1(x, params["res_w"], params["res_b"])
        x = x_res + x_hsi + x_in
    y = c1(x, params["out_w"], params["out_b"])
    if output_norm == "sigmoid":
        y = jax.nn.sigmoid(y)
    elif output_norm == "tanh":
        y = jnp.tanh(y)
    return jnp.transpose(y, (0, 3, 1, 2))


# ---------------------------------------------------------------------------
# Deterministic parameter init (PyTorch Conv2d-style uniform bound)
# ---------------------------------------------------------------------------

def init_params(key, input_ch, output_ch, feature, block_num):
    def conv_params(k, kh, kw, cin, cout):
        kw_, kb_ = jax.random.split(k)
        bound = 1.0 / math.sqrt(kh * kw * cin)
        w = jax.random.uniform(kw_, (kh, kw, cin, cout), jnp.float32, -bound, bound)
        b = jax.random.uniform(kb_, (1, cout), jnp.float32, -bound, bound)
        if kh == 1 and kw == 1:
            w = w.reshape(cin, cout)
        return w, b

    ks = jax.random.split(key, 3 + block_num)
    start_w, start_b = conv_params(ks[0], 1, 1, input_ch, output_ch)
    res_w, res_b = conv_params(ks[1], 1, 1, output_ch, output_ch)
    out_w, out_b = conv_params(ks[2], 1, 1, output_ch, output_ch)
    blocks = []
    for i in range(block_num):
        kk = jax.random.split(ks[3 + i], 3)
        w1, b1 = conv_params(kk[0], 3, 3, output_ch, feature)
        w2, b2 = conv_params(kk[1], 3, 3, feature, output_ch)
        wspec, bspec = conv_params(kk[2], 1, 1, output_ch, output_ch)
        blocks.append(dict(w1=w1, b1=b1, w2=w2, b2=b2, wspec=wspec, bspec=bspec))
    return dict(start_w=start_w, start_b=start_b, res_w=res_w, res_b=res_b,
                out_w=out_w, out_b=out_b, blocks=blocks)


# ---------------------------------------------------------------------------
# Demo
# ---------------------------------------------------------------------------

if __name__ == "__main__":
    key = jax.random.PRNGKey(0)
    kx, kp = jax.random.split(key)

    B, input_ch, H, W = 2, 4, 16, 16
    output_ch, feature, block_num = 8, 16, 3

    x = jax.random.normal(kx, (B, input_ch, H, W), jnp.float32)
    params = init_params(kp, input_ch, output_ch, feature, block_num)

    fwd = jax.jit(functools.partial(deep_ss_prior_forward, output_norm=None))
    out = jax.block_until_ready(fwd(x, params))
    assert out.shape == (B, output_ch, H, W)

    ref = jax.block_until_ready(ref_forward(x, params, output_norm=None))
    max_err = float(jnp.max(jnp.abs(out - ref)))
    assert max_err < 1e-3, f"mismatch vs reference: {max_err}"

    print("KERNEL_OK")
</pallas_src>

<mosaic_0001>
module attributes {stable_mosaic.version = 11 : i64} {
  func.func @_fused_forward_kernel(%arg0: i32, %arg1: i32, %arg2: memref<1x256x4xf32, #tpu.memory_space<vmem>>, %arg3: memref<4x8xf32, #tpu.memory_space<vmem>>, %arg4: memref<1x8xf32, #tpu.memory_space<vmem>>, %arg5: memref<1x9x8x16xf32, #tpu.memory_space<vmem>>, %arg6: memref<1x1x16xf32, #tpu.memory_space<vmem>>, %arg7: memref<1x9x16x8xf32, #tpu.memory_space<vmem>>, %arg8: memref<1x1x8xf32, #tpu.memory_space<vmem>>, %arg9: memref<1x8x8xf32, #tpu.memory_space<vmem>>, %arg10: memref<1x1x8xf32, #tpu.memory_space<vmem>>, %arg11: memref<8x8xf32, #tpu.memory_space<vmem>>, %arg12: memref<1x8xf32, #tpu.memory_space<vmem>>, %arg13: memref<8x8xf32, #tpu.memory_space<vmem>>, %arg14: memref<1x8xf32, #tpu.memory_space<vmem>>, %arg15: memref<1x256x8xf32, #tpu.memory_space<vmem>>, %arg16: memref<256x8xf32, #tpu.memory_space<vmem>>, %arg17: memref<256x8xf32, #tpu.memory_space<vmem>>, %arg18: memref<18x25x8xf32, #tpu.memory_space<vmem>>, %arg19: memref<18x25x16xf32, #tpu.memory_space<vmem>>) attributes {dimension_semantics = [#tpu.dimension_semantics<parallel>, #tpu.dimension_semantics<arbitrary>], iteration_bounds = array<i64: 2, 3>, scalar_prefetch = 0 : i64, scratch_operands = 4 : i64, tpu.core_type = #tpu.core_type<tc>, window_params = [{transform_indices = @transform_0, window_bounds = array<i64: 1, 256, 4>}, {pipeline_mode = #tpu.pipeline_mode<synchronous>, transform_indices = @transform_1, window_bounds = array<i64: 4, 8>}, {pipeline_mode = #tpu.pipeline_mode<synchronous>, transform_indices = @transform_2, window_bounds = array<i64: 1, 8>}, {transform_indices = @transform_3, window_bounds = array<i64: 1, 9, 8, 16>}, {transform_indices = @transform_4, window_bounds = array<i64: 1, 1, 16>}, {transform_indices = @transform_5, window_bounds = array<i64: 1, 9, 16, 8>}, {transform_indices = @transform_6, window_bounds = array<i64: 1, 1, 8>}, {transform_indices = @transform_7, window_bounds = array<i64: 1, 8, 8>}, {transform_indices = @transform_8, window_bounds = array<i64: 1, 1, 8>}, {pipeline_mode = #tpu.pipeline_mode<synchronous>, transform_indices = @transform_9, window_bounds = array<i64: 8, 8>}, {pipeline_mode = #tpu.pipeline_mode<synchronous>, transform_indices = @transform_10, window_bounds = array<i64: 1, 8>}, {pipeline_mode = #tpu.pipeline_mode<synchronous>, transform_indices = @transform_11, window_bounds = array<i64: 8, 8>}, {pipeline_mode = #tpu.pipeline_mode<synchronous>, transform_indices = @transform_12, window_bounds = array<i64: 1, 8>}, {transform_indices = @transform_13, window_bounds = array<i64: 1, 256, 8>}]} {
    %c0_i32 = arith.constant 0 : i32
    %0 = arith.cmpi eq, %arg1, %c0_i32 : i32
    %1 = arith.extui %0 : i1 to i32
    %c0_i32_0 = arith.constant 0 : i32
    %2 = arith.cmpi ne, %1, %c0_i32_0 : i32
    scf.if %2 {
      %cst_172 = arith.constant 0.000000e+00 : f32
      %150 = vector.broadcast %cst_172 : f32 to vector<18x25x8xf32>
      %c0_173 = arith.constant 0 : index
      %c0_174 = arith.constant 0 : index
      %c0_175 = arith.constant 0 : index
      %151 = vector.load %arg18[%c0_173, %c0_174, %c0_175] : memref<18x25x8xf32, #tpu.memory_space<vmem>>, vector<18x25x8xf32>
      tpu.vector_store %arg18[%c0_173, %c0_174, %c0_175], %150 {strides = array<i32>} : memref<18x25x8xf32, #tpu.memory_space<vmem>>, vector<18x25x8xf32>,
      %cst_176 = arith.constant 0.000000e+00 : f32
      %152 = vector.broadcast %cst_176 : f32 to vector<18x25x16xf32>
      %c0_177 = arith.constant 0 : index
      %c0_178 = arith.constant 0 : index
      %c0_179 = arith.constant 0 : index
      %153 = vector.load %arg19[%c0_177, %c0_178, %c0_179] : memref<18x25x16xf32, #tpu.memory_space<vmem>>, vector<18x25x16xf32>
      tpu.vector_store %arg19[%c0_177, %c0_178, %c0_179], %152 {strides = array<i32>} : memref<18x25x16xf32, #tpu.memory_space<vmem>>, vector<18x25x16xf32>,
      %c0_180 = arith.constant 0 : index
      %c0_181 = arith.constant 0 : index
      %c0_182 = arith.constant 0 : index
      %154 = vector.load %arg2[%c0_180, %c0_181, %c0_182] : memref<1x256x4xf32, #tpu.memory_space<vmem>>, vector<1x256x4xf32>
      %155 = vector.shape_cast %154 : vector<1x256x4xf32> to vector<256x4xf32>
      %c0_183 = arith.constant 0 : index
      %c0_184 = arith.constant 0 : index
      %156 = vector.load %arg3[%c0_183, %c0_184] : memref<4x8xf32, #tpu.memory_space<vmem>>, vector<4x8xf32>
      %cst_185 = arith.constant dense<0.000000e+00> : vector<256x8xf32>
      %157 = tpu.matmul %155, %156, %cst_185 {dimension_numbers = #tpu.dot_dimension_numbers<[1], [0], [0], [1], [0, 0, 1, 1], [], []>} : vector<256x4xf32>, vector<4x8xf32>, vector<256x8xf32> -> vector<256x8xf32>
      %c0_186 = arith.constant 0 : index
      %c0_187 = arith.constant 0 : index
      %158 = vector.load %arg4[%c0_186, %c0_187] : memref<1x8xf32, #tpu.memory_space<vmem>>, vector<1x8xf32>
      %159 = vector.broadcast %158 : vector<1x8xf32> to vector<256x8xf32>
      %160 = arith.addf %157, %159 : vector<256x8xf32>
      %c0_188 = arith.constant 0 : index
      %c0_189 = arith.constant 0 : index
      %161 = vector.load %arg16[%c0_188, %c0_189] : memref<256x8xf32, #tpu.memory_space<vmem>>, vector<256x8xf32>
      tpu.vector_store %arg16[%c0_188, %c0_189], %160 {strides = array<i32>} : memref<256x8xf32, #tpu.memory_space<vmem>>, vector<256x8xf32>,
      %c0_190 = arith.constant 0 : index
      %c0_191 = arith.constant 0 : index
      %162 = vector.load %arg17[%c0_190, %c0_191] : memref<256x8xf32, #tpu.memory_space<vmem>>, vector<256x8xf32>
      tpu.vector_store %arg17[%c0_190, %c0_191], %160 {strides = array<i32>} : memref<256x8xf32, #tpu.memory_space<vmem>>, vector<256x8xf32>,
    } else {
    }
    %c0 = arith.constant 0 : index
    %c0_1 = arith.constant 0 : index
    %3 = vector.load %arg16[%c0, %c0_1] : memref<256x8xf32, #tpu.memory_space<vmem>>, vector<256x8xf32>
    %4 = vector.shape_cast %3 : vector<256x8xf32> to vector<16x16x8xf32>
    %c1 = arith.constant 1 : index
    %c8 = arith.constant 8 : index
    %c0_2 = arith.constant 0 : index
    %5 = vector.load %arg18[%c1, %c8, %c0_2] : memref<18x25x8xf32, #tpu.memory_space<vmem>>, vector<16x16x8xf32>
    tpu.vector_store %arg18[%c1, %c8, %c0_2], %4 {strides = array<i32>} : memref<18x25x8xf32, #tpu.memory_space<vmem>>, vector<16x16x8xf32>,
    %cst = arith.constant 0.000000e+00 : f32
    %6 = vector.broadcast %cst : f32 to vector<256x16xf32>
    %c0_3 = arith.constant 0 : index
    %c7 = arith.constant 7 : index
    %c0_4 = arith.constant 0 : index
    %7 = vector.load %arg18[%c0_3, %c7, %c0_4] : memref<18x25x8xf32, #tpu.memory_space<vmem>>, vector<16x16x8xf32>
    %8 = vector.shape_cast %7 : vector<16x16x8xf32> to vector<256x8xf32>
    %c0_5 = arith.constant 0 : index
    %c0_6 = arith.constant 0 : index
    %c0_7 = arith.constant 0 : index
    %c0_8 = arith.constant 0 : index
    %9 = vector.load %arg5[%c0_5, %c0_6, %c0_7, %c0_8] : memref<1x9x8x16xf32, #tpu.memory_space<vmem>>, vector<1x1x8x16xf32>
    %10 = vector.shape_cast %9 : vector<1x1x8x16xf32> to vector<8x16xf32>
    %cst_9 = arith.constant dense<0.000000e+00> : vector<256x16xf32>
    %11 = tpu.matmul %8, %10, %cst_9 {dimension_numbers = #tpu.dot_dimension_numbers<[1], [0], [0], [1], [0, 0, 1, 1], [], []>} : vector<256x8xf32>, vector<8x16xf32>, vector<256x16xf32> -> vector<256x16xf32>
    %12 = arith.addf %6, %11 : vector<256x16xf32>
    %c0_10 = arith.constant 0 : index
    %c8_11 = arith.constant 8 : index
    %c0_12 = arith.constant 0 : index
    %13 = vector.load %arg18[%c0_10, %c8_11, %c0_12] : memref<18x25x8xf32, #tpu.memory_space<vmem>>, vector<16x16x8xf32>
    %14 = vector.shape_cast %13 : vector<16x16x8xf32> to vector<256x8xf32>
    %c0_13 = arith.constant 0 : index
    %c1_14 = arith.constant 1 : index
    %c0_15 = arith.constant 0 : index
    %c0_16 = arith.constant 0 : index
    %15 = vector.load %arg5[%c0_13, %c1_14, %c0_15, %c0_16] : memref<1x9x8x16xf32, #tpu.memory_space<vmem>>, vector<1x1x8x16xf32>
    %16 = vector.shape_cast %15 : vector<1x1x8x16xf32> to vector<8x16xf32>
    %cst_17 = arith.constant dense<0.000000e+00> : vector<256x16xf32>
    %17 = tpu.matmul %14, %16, %cst_17 {dimension_numbers = #tpu.dot_dimension_numbers<[1], [0], [0], [1], [0, 0, 1, 1], [], []>} : vector<256x8xf32>, vector<8x16xf32>, vector<256x16xf32> -> vector<256x16xf32>
    %18 = arith.addf %12, %17 : vector<256x16xf32>
    %c0_18 = arith.constant 0 : index
    %c9 = arith.constant 9 : index
    %c0_19 = arith.constant 0 : index
    %19 = vector.load %arg18[%c0_18, %c9, %c0_19] : memref<18x25x8xf32, #tpu.memory_space<vmem>>, vector<16x16x8xf32>
    %20 = vector.shape_cast %19 : vector<16x16x8xf32> to vector<256x8xf32>
    %c0_20 = arith.constant 0 : index
    %c2 = arith.constant 2 : index
    %c0_21 = arith.constant 0 : index
    %c0_22 = arith.constant 0 : index
    %21 = vector.load %arg5[%c0_20, %c2, %c0_21, %c0_22] : memref<1x9x8x16xf32, #tpu.memory_space<vmem>>, vector<1x1x8x16xf32>
    %22 = vector.shape_cast %21 : vector<1x1x8x16xf32> to vector<8x16xf32>
    %cst_23 = arith.constant dense<0.000000e+00> : vector<256x16xf32>
    %23 = tpu.matmul %20, %22, %cst_23 {dimension_numbers = #tpu.dot_dimension_numbers<[1], [0], [0], [1], [0, 0, 1, 1], [], []>} : vector<256x8xf32>, vector<8x16xf32>, vector<256x16xf32> -> vector<256x16xf32>
    %24 = arith.addf %18, %23 : vector<256x16xf32>
    %c1_24 = arith.constant 1 : index
    %c7_25 = arith.constant 7 : index
    %c0_26 = arith.constant 0 : index
    %25 = vector.load %arg18[%c1_24, %c7_25, %c0_26] : memref<18x25x8xf32, #tpu.memory_space<vmem>>, vector<16x16x8xf32>
    %26 = vector.shape_cast %25 : vector<16x16x8xf32> to vector<256x8xf32>
    %c0_27 = arith.constant 0 : index
    %c3 = arith.constant 3 : index
    %c0_28 = arith.constant 0 : index
    %c0_29 = arith.constant 0 : index
    %27 = vector.load %arg5[%c0_27, %c3, %c0_28, %c0_29] : memref<1x9x8x16xf32, #tpu.memory_space<vmem>>, vector<1x1x8x16xf32>
    %28 = vector.shape_cast %27 : vector<1x1x8x16xf32> to vector<8x16xf32>
    %cst_30 = arith.constant dense<0.000000e+00> : vector<256x16xf32>
    %29 = tpu.matmul %26, %28, %cst_30 {dimension_numbers = #tpu.dot_dimension_numbers<[1], [0], [0], [1], [0, 0, 1, 1], [], []>} : vector<256x8xf32>, vector<8x16xf32>, vector<256x16xf32> -> vector<256x16xf32>
    %30 = arith.addf %24, %29 : vector<256x16xf32>
    %c1_31 = arith.constant 1 : index
    %c8_32 = arith.constant 8 : index
    %c0_33 = arith.constant 0 : index
    %31 = vector.load %arg18[%c1_31, %c8_32, %c0_33] : memref<18x25x8xf32, #tpu.memory_space<vmem>>, vector<16x16x8xf32>
    %32 = vector.shape_cast %31 : vector<16x16x8xf32> to vector<256x8xf32>
    %c0_34 = arith.constant 0 : index
    %c4 = arith.constant 4 : index
    %c0_35 = arith.constant 0 : index
    %c0_36 = arith.constant 0 : index
    %33 = vector.load %arg5[%c0_34, %c4, %c0_35, %c0_36] : memref<1x9x8x16xf32, #tpu.memory_space<vmem>>, vector<1x1x8x16xf32>
    %34 = vector.shape_cast %33 : vector<1x1x8x16xf32> to vector<8x16xf32>
    %cst_37 = arith.constant dense<0.000000e+00> : vector<256x16xf32>
    %35 = tpu.matmul %32, %34, %cst_37 {dimension_numbers = #tpu.dot_dimension_numbers<[1], [0], [0], [1], [0, 0, 1, 1], [], []>} : vector<256x8xf32>, vector<8x16xf32>, vector<256x16xf32> -> vector<256x16xf32>
    %36 = arith.addf %30, %35 : vector<256x16xf32>
    %c1_38 = arith.constant 1 : index
    %c9_39 = arith.constant 9 : index
    %c0_40 = arith.constant 0 : index
    %37 = vector.load %arg18[%c1_38, %c9_39, %c0_40] : memref<18x25x8xf32, #tpu.memory_space<vmem>>, vector<16x16x8xf32>
    %38 = vector.shape_cast %37 : vector<16x16x8xf32> to vector<256x8xf32>
    %c0_41 = arith.constant 0 : index
    %c5 = arith.constant 5 : index
    %c0_42 = arith.constant 0 : index
    %c0_43 = arith.constant 0 : index
    %39 = vector.load %arg5[%c0_41, %c5, %c0_42, %c0_43] : memref<1x9x8x16xf32, #tpu.memory_space<vmem>>, vector<1x1x8x16xf32>
    %40 = vector.shape_cast %39 : vector<1x1x8x16xf32> to vector<8x16xf32>
    %cst_44 = arith.constant dense<0.000000e+00> : vector<256x16xf32>
    %41 = tpu.matmul %38, %40, %cst_44 {dimension_numbers = #tpu.dot_dimension_numbers<[1], [0], [0], [1], [0, 0, 1, 1], [], []>} : vector<256x8xf32>, vector<8x16xf32>, vector<256x16xf32> -> vector<256x16xf32>
    %42 = arith.addf %36, %41 : vector<256x16xf32>
    %c2_45 = arith.constant 2 : index
    %c7_46 = arith.constant 7 : index
    %c0_47 = arith.constant 0 : index
    %43 = vector.load %arg18[%c2_45, %c7_46, %c0_47] : memref<18x25x8xf32, #tpu.memory_space<vmem>>, vector<16x16x8xf32>
    %44 = vector.shape_cast %43 : vector<16x16x8xf32> to vector<256x8xf32>
    %c0_48 = arith.constant 0 : index
    %c6 = arith.constant 6 : index
    %c0_49 = arith.constant 0 : index
    %c0_50 = arith.constant 0 : index
    %45 = vector.load %arg5[%c0_48, %c6, %c0_49, %c0_50] : memref<1x9x8x16xf32, #tpu.memory_space<vmem>>, vector<1x1x8x16xf32>
    %46 = vector.shape_cast %45 : vector<1x1x8x16xf32> to vector<8x16xf32>
    %cst_51 = arith.constant dense<0.000000e+00> : vector<256x16xf32>
    %47 = tpu.matmul %44, %46, %cst_51 {dimension_numbers = #tpu.dot_dimension_numbers<[1], [0], [0], [1], [0, 0, 1, 1], [], []>} : vector<256x8xf32>, vector<8x16xf32>, vector<256x16xf32> -> vector<256x16xf32>
    %48 = arith.addf %42, %47 : vector<256x16xf32>
    %c2_52 = arith.constant 2 : index
    %c8_53 = arith.constant 8 : index
    %c0_54 = arith.constant 0 : index
    %49 = vector.load %arg18[%c2_52, %c8_53, %c0_54] : memref<18x25x8xf32, #tpu.memory_space<vmem>>, vector<16x16x8xf32>
    %50 = vector.shape_cast %49 : vector<16x16x8xf32> to vector<256x8xf32>
    %c0_55 = arith.constant 0 : index
    %c7_56 = arith.constant 7 : index
    %c0_57 = arith.constant 0 : index
    %c0_58 = arith.constant 0 : index
    %51 = vector.load %arg5[%c0_55, %c7_56, %c0_57, %c0_58] : memref<1x9x8x16xf32, #tpu.memory_space<vmem>>, vector<1x1x8x16xf32>
    %52 = vector.shape_cast %51 : vector<1x1x8x16xf32> to vector<8x16xf32>
    %cst_59 = arith.constant dense<0.000000e+00> : vector<256x16xf32>
    %53 = tpu.matmul %50, %52, %cst_59 {dimension_numbers = #tpu.dot_dimension_numbers<[1], [0], [0], [1], [0, 0, 1, 1], [], []>} : vector<256x8xf32>, vector<8x16xf32>, vector<256x16xf32> -> vector<256x16xf32>
    %54 = arith.addf %48, %53 : vector<256x16xf32>
    %c2_60 = arith.constant 2 : index
    %c9_61 = arith.constant 9 : index
    %c0_62 = arith.constant 0 : index
    %55 = vector.load %arg18[%c2_60, %c9_61, %c0_62] : memref<18x25x8xf32, #tpu.memory_space<vmem>>, vector<16x16x8xf32>
    %56 = vector.shape_cast %55 : vector<16x16x8xf32> to vector<256x8xf32>
    %c0_63 = arith.constant 0 : index
    %c8_64 = arith.constant 8 : index
    %c0_65 = arith.constant 0 : index
    %c0_66 = arith.constant 0 : index
    %57 = vector.load %arg5[%c0_63, %c8_64, %c0_65, %c0_66] : memref<1x9x8x16xf32, #tpu.memory_space<vmem>>, vector<1x1x8x16xf32>
    %58 = vector.shape_cast %57 : vector<1x1x8x16xf32> to vector<8x16xf32>
    %cst_67 = arith.constant dense<0.000000e+00> : vector<256x16xf32>
    %59 = tpu.matmul %56, %58, %cst_67 {dimension_numbers = #tpu.dot_dimension_numbers<[1], [0], [0], [1], [0, 0, 1, 1], [], []>} : vector<256x8xf32>, vector<8x16xf32>, vector<256x16xf32> -> vector<256x16xf32>
    %60 = arith.addf %54, %59 : vector<256x16xf32>
    %c0_68 = arith.constant 0 : index
    %c0_69 = arith.constant 0 : index
    %c0_70 = arith.constant 0 : index
    %61 = vector.load %arg6[%c0_68, %c0_69, %c0_70] : memref<1x1x16xf32, #tpu.memory_space<vmem>>, vector<1x1x16xf32>
    %62 = vector.shape_cast %61 : vector<1x1x16xf32> to vector<1x16xf32>
    %63 = vector.broadcast %62 : vector<1x16xf32> to vector<256x16xf32>
    %64 = arith.addf %60, %63 : vector<256x16xf32>
    %cst_71 = arith.constant 0.000000e+00 : f32
    %65 = vector.broadcast %cst_71 : f32 to vector<256x16xf32>
    %66 = arith.maximumf %64, %65 : vector<256x16xf32>
    %67 = vector.shape_cast %66 : vector<256x16xf32> to vector<16x16x16xf32>
    %c1_72 = arith.constant 1 : index
    %c8_73 = arith.constant 8 : index
    %c0_74 = arith.constant 0 : index
    %68 = vector.load %arg19[%c1_72, %c8_73, %c0_74] : memref<18x25x16xf32, #tpu.memory_space<vmem>>, vector<16x16x16xf32>
    tpu.vector_store %arg19[%c1_72, %c8_73, %c0_74], %67 {strides = array<i32>} : memref<18x25x16xf32, #tpu.memory_space<vmem>>, vector<16x16x16xf32>,
    %cst_75 = arith.constant 0.000000e+00 : f32
    %69 = vector.broadcast %cst_75 : f32 to vector<256x8xf32>
    %c0_76 = arith.constant 0 : index
    %c7_77 = arith.constant 7 : index
    %c0_78 = arith.constant 0 : index
    %70 = vector.load %arg19[%c0_76, %c7_77, %c0_78] : memref<18x25x16xf32, #tpu.memory_space<vmem>>, vector<16x16x16xf32>
    %71 = vector.shape_cast %70 : vector<16x16x16xf32> to vector<256x16xf32>
    %c0_79 = arith.constant 0 : index
    %c0_80 = arith.constant 0 : index
    %c0_81 = arith.constant 0 : index
    %c0_82 = arith.constant 0 : index
    %72 = vector.load %arg7[%c0_79, %c0_80, %c0_81, %c0_82] : memref<1x9x16x8xf32, #tpu.memory_space<vmem>>, vector<1x1x16x8xf32>
    %73 = vector.shape_cast %72 : vector<1x1x16x8xf32> to vector<16x8xf32>
    %cst_83 = arith.constant dense<0.000000e+00> : vector<256x8xf32>
    %74 = tpu.matmul %71, %73, %cst_83 {dimension_numbers = #tpu.dot_dimension_numbers<[1], [0], [0], [1], [0, 0, 1, 1], [], []>} : vector<256x16xf32>, vector<16x8xf32>, vector<256x8xf32> -> vector<256x8xf32>
    %75 = arith.addf %69, %74 : vector<256x8xf32>
    %c0_84 = arith.constant 0 : index
    %c8_85 = arith.constant 8 : index
    %c0_86 = arith.constant 0 : index
    %76 = vector.load %arg19[%c0_84, %c8_85, %c0_86] : memref<18x25x16xf32, #tpu.memory_space<vmem>>, vector<16x16x16xf32>
    %77 = vector.shape_cast %76 : vector<16x16x16xf32> to vector<256x16xf32>
    %c0_87 = arith.constant 0 : index
    %c1_88 = arith.constant 1 : index
    %c0_89 = arith.constant 0 : index
    %c0_90 = arith.constant 0 : index
    %78 = vector.load %arg7[%c0_87, %c1_88, %c0_89, %c0_90] : memref<1x9x16x8xf32, #tpu.memory_space<vmem>>, vector<1x1x16x8xf32>
    %79 = vector.shape_cast %78 : vector<1x1x16x8xf32> to vector<16x8xf32>
    %cst_91 = arith.constant dense<0.000000e+00> : vector<256x8xf32>
    %80 = tpu.matmul %77, %79, %cst_91 {dimension_numbers = #tpu.dot_dimension_numbers<[1], [0], [0], [1], [0, 0, 1, 1], [], []>} : vector<256x16xf32>, vector<16x8xf32>, vector<256x8xf32> -> vector<256x8xf32>
    %81 = arith.addf %75, %80 : vector<256x8xf32>
    %c0_92 = arith.constant 0 : index
    %c9_93 = arith.constant 9 : index
    %c0_94 = arith.constant 0 : index
    %82 = vector.load %arg19[%c0_92, %c9_93, %c0_94] : memref<18x25x16xf32, #tpu.memory_space<vmem>>, vector<16x16x16xf32>
    %83 = vector.shape_cast %82 : vector<16x16x16xf32> to vector<256x16xf32>
    %c0_95 = arith.constant 0 : index
    %c2_96 = arith.constant 2 : index
    %c0_97 = arith.constant 0 : index
    %c0_98 = arith.constant 0 : index
    %84 = vector.load %arg7[%c0_95, %c2_96, %c0_97, %c0_98] : memref<1x9x16x8xf32, #tpu.memory_space<vmem>>, vector<1x1x16x8xf32>
    %85 = vector.shape_cast %84 : vector<1x1x16x8xf32> to vector<16x8xf32>
    %cst_99 = arith.constant dense<0.000000e+00> : vector<256x8xf32>
    %86 = tpu.matmul %83, %85, %cst_99 {dimension_numbers = #tpu.dot_dimension_numbers<[1], [0], [0], [1], [0, 0, 1, 1], [], []>} : vector<256x16xf32>, vector<16x8xf32>, vector<256x8xf32> -> vector<256x8xf32>
    %87 = arith.addf %81, %86 : vector<256x8xf32>
    %c1_100 = arith.constant 1 : index
    %c7_101 = arith.constant 7 : index
    %c0_102 = arith.constant 0 : index
    %88 = vector.load %arg19[%c1_100, %c7_101, %c0_102] : memref<18x25x16xf32, #tpu.memory_space<vmem>>, vector<16x16x16xf32>
    %89 = vector.shape_cast %88 : vector<16x16x16xf32> to vector<256x16xf32>
    %c0_103 = arith.constant 0 : index
    %c3_104 = arith.constant 3 : index
    %c0_105 = arith.constant 0 : index
    %c0_106 = arith.constant 0 : index
    %90 = vector.load %arg7[%c0_103, %c3_104, %c0_105, %c0_106] : memref<1x9x16x8xf32, #tpu.memory_space<vmem>>, vector<1x1x16x8xf32>
    %91 = vector.shape_cast %90 : vector<1x1x16x8xf32> to vector<16x8xf32>
    %cst_107 = arith.constant dense<0.000000e+00> : vector<256x8xf32>
    %92 = tpu.matmul %89, %91, %cst_107 {dimension_numbers = #tpu.dot_dimension_numbers<[1], [0], [0], [1], [0, 0, 1, 1], [], []>} : vector<256x16xf32>, vector<16x8xf32>, vector<256x8xf32> -> vector<256x8xf32>
    %93 = arith.addf %87, %92 : vector<256x8xf32>
    %c1_108 = arith.constant 1 : index
    %c8_109 = arith.constant 8 : index
    %c0_110 = arith.constant 0 : index
    %94 = vector.load %arg19[%c1_108, %c8_109, %c0_110] : memref<18x25x16xf32, #tpu.memory_space<vmem>>, vector<16x16x16xf32>
    %95 = vector.shape_cast %94 : vector<16x16x16xf32> to vector<256x16xf32>
    %c0_111 = arith.constant 0 : index
    %c4_112 = arith.constant 4 : index
    %c0_113 = arith.constant 0 : index
    %c0_114 = arith.constant 0 : index
    %96 = vector.load %arg7[%c0_111, %c4_112, %c0_113, %c0_114] : memref<1x9x16x8xf32, #tpu.memory_space<vmem>>, vector<1x1x16x8xf32>
    %97 = vector.shape_cast %96 : vector<1x1x16x8xf32> to vector<16x8xf32>
    %cst_115 = arith.constant dense<0.000000e+00> : vector<256x8xf32>
    %98 = tpu.matmul %95, %97, %cst_115 {dimension_numbers = #tpu.dot_dimension_numbers<[1], [0], [0], [1], [0, 0, 1, 1], [], []>} : vector<256x16xf32>, vector<16x8xf32>, vector<256x8xf32> -> vector<256x8xf32>
    %99 = arith.addf %93, %98 : vector<256x8xf32>
    %c1_116 = arith.constant 1 : index
    %c9_117 = arith.constant 9 : index
    %c0_118 = arith.constant 0 : index
    %100 = vector.load %arg19[%c1_116, %c9_117, %c0_118] : memref<18x25x16xf32, #tpu.memory_space<vmem>>, vector<16x16x16xf32>
    %101 = vector.shape_cast %100 : vector<16x16x16xf32> to vector<256x16xf32>
    %c0_119 = arith.constant 0 : index
    %c5_120 = arith.constant 5 : index
    %c0_121 = arith.constant 0 : index
    %c0_122 = arith.constant 0 : index
    %102 = vector.load %arg7[%c0_119, %c5_120, %c0_121, %c0_122] : memref<1x9x16x8xf32, #tpu.memory_space<vmem>>, vector<1x1x16x8xf32>
    %103 = vector.shape_cast %102 : vector<1x1x16x8xf32> to vector<16x8xf32>
    %cst_123 = arith.constant dense<0.000000e+00> : vector<256x8xf32>
    %104 = tpu.matmul %101, %103, %cst_123 {dimension_numbers = #tpu.dot_dimension_numbers<[1], [0], [0], [1], [0, 0, 1, 1], [], []>} : vector<256x16xf32>, vector<16x8xf32>, vector<256x8xf32> -> vector<256x8xf32>
    %105 = arith.addf %99, %104 : vector<256x8xf32>
    %c2_124 = arith.constant 2 : index
    %c7_125 = arith.constant 7 : index
    %c0_126 = arith.constant 0 : index
    %106 = vector.load %arg19[%c2_124, %c7_125, %c0_126] : memref<18x25x16xf32, #tpu.memory_space<vmem>>, vector<16x16x16xf32>
    %107 = vector.shape_cast %106 : vector<16x16x16xf32> to vector<256x16xf32>
    %c0_127 = arith.constant 0 : index
    %c6_128 = arith.constant 6 : index
    %c0_129 = arith.constant 0 : index
    %c0_130 = arith.constant 0 : index
    %108 = vector.load %arg7[%c0_127, %c6_128, %c0_129, %c0_130] : memref<1x9x16x8xf32, #tpu.memory_space<vmem>>, vector<1x1x16x8xf32>
    %109 = vector.shape_cast %108 : vector<1x1x16x8xf32> to vector<16x8xf32>
    %cst_131 = arith.constant dense<0.000000e+00> : vector<256x8xf32>
    %110 = tpu.matmul %107, %109, %cst_131 {dimension_numbers = #tpu.dot_dimension_numbers<[1], [0], [0], [1], [0, 0, 1, 1], [], []>} : vector<256x16xf32>, vector<16x8xf32>, vector<256x8xf32> -> vector<256x8xf32>
    %111 = arith.addf %105, %110 : vector<256x8xf32>
    %c2_132 = arith.constant 2 : index
    %c8_133 = arith.constant 8 : index
    %c0_134 = arith.constant 0 : index
    %112 = vector.load %arg19[%c2_132, %c8_133, %c0_134] : memref<18x25x16xf32, #tpu.memory_space<vmem>>, vector<16x16x16xf32>
    %113 = vector.shape_cast %112 : vector<16x16x16xf32> to vector<256x16xf32>
    %c0_135 = arith.constant 0 : index
    %c7_136 = arith.constant 7 : index
    %c0_137 = arith.constant 0 : index
    %c0_138 = arith.constant 0 : index
    %114 = vector.load %arg7[%c0_135, %c7_136, %c0_137, %c0_138] : memref<1x9x16x8xf32, #tpu.memory_space<vmem>>, vector<1x1x16x8xf32>
    %115 = vector.shape_cast %114 : vector<1x1x16x8xf32> to vector<16x8xf32>
    %cst_139 = arith.constant dense<0.000000e+00> : vector<256x8xf32>
    %116 = tpu.matmul %113, %115, %cst_139 {dimension_numbers = #tpu.dot_dimension_numbers<[1], [0], [0], [1], [0, 0, 1, 1], [], []>} : vector<256x16xf32>, vector<16x8xf32>, vector<256x8xf32> -> vector<256x8xf32>
    %117 = arith.addf %111, %116 : vector<256x8xf32>
    %c2_140 = arith.constant 2 : index
    %c9_141 = arith.constant 9 : index
    %c0_142 = arith.constant 0 : index
    %118 = vector.load %arg19[%c2_140, %c9_141, %c0_142] : memref<18x25x16xf32, #tpu.memory_space<vmem>>, vector<16x16x16xf32>
    %119 = vector.shape_cast %118 : vector<16x16x16xf32> to vector<256x16xf32>
    %c0_143 = arith.constant 0 : index
    %c8_144 = arith.constant 8 : index
    %c0_145 = arith.constant 0 : index
    %c0_146 = arith.constant 0 : index
    %120 = vector.load %arg7[%c0_143, %c8_144, %c0_145, %c0_146] : memref<1x9x16x8xf32, #tpu.memory_space<vmem>>, vector<1x1x16x8xf32>
    %121 = vector.shape_cast %120 : vector<1x1x16x8xf32> to vector<16x8xf32>
    %cst_147 = arith.constant dense<0.000000e+00> : vector<256x8xf32>
    %122 = tpu.matmul %119, %121, %cst_147 {dimension_numbers = #tpu.dot_dimension_numbers<[1], [0], [0], [1], [0, 0, 1, 1], [], []>} : vector<256x16xf32>, vector<16x8xf32>, vector<256x8xf32> -> vector<256x8xf32>
    %123 = arith.addf %117, %122 : vector<256x8xf32>
    %c0_148 = arith.constant 0 : index
    %c0_149 = arith.constant 0 : index
    %c0_150 = arith.constant 0 : index
    %124 = vector.load %arg8[%c0_148, %c0_149, %c0_150] : memref<1x1x8xf32, #tpu.memory_space<vmem>>, vector<1x1x8xf32>
    %125 = vector.shape_cast %124 : vector<1x1x8xf32> to vector<1x8xf32>
    %126 = vector.broadcast %125 : vector<1x8xf32> to vector<256x8xf32>
    %127 = arith.addf %123, %126 : vector<256x8xf32>
    %c0_151 = arith.constant 0 : index
    %c0_152 = arith.constant 0 : index
    %128 = vector.load %arg16[%c0_151, %c0_152] : memref<256x8xf32, #tpu.memory_space<vmem>>, vector<256x8xf32>
    %129 = arith.addf %127, %128 : vector<256x8xf32>
    %c0_153 = arith.constant 0 : index
    %c0_154 = arith.constant 0 : index
    %c0_155 = arith.constant 0 : index
    %130 = vector.load %arg9[%c0_153, %c0_154, %c0_155] : memref<1x8x8xf32, #tpu.memory_space<vmem>>, vector<1x8x8xf32>
    %131 = vector.shape_cast %130 : vector<1x8x8xf32> to vector<8x8xf32>
    %cst_156 = arith.constant dense<0.000000e+00> : vector<256x8xf32>
    %132 = tpu.matmul %129, %131, %cst_156 {dimension_numbers = #tpu.dot_dimension_numbers<[1], [0], [0], [1], [0, 0, 1, 1], [], []>} : vector<256x8xf32>, vector<8x8xf32>, vector<256x8xf32> -> vector<256x8xf32>
    %c0_157 = arith.constant 0 : index
    %c0_158 = arith.constant 0 : index
    %c0_159 = arith.constant 0 : index
    %133 = vector.load %arg10[%c0_157, %c0_158, %c0_159] : memref<1x1x8xf32, #tpu.memory_space<vmem>>, vector<1x1x8xf32>
    %134 = vector.shape_cast %133 : vector<1x1x8xf32> to vector<1x8xf32>
    %135 = vector.broadcast %134 : vector<1x8xf32> to vector<256x8xf32>
    %136 = arith.addf %132, %135 : vector<256x8xf32>
    %c0_160 = arith.constant 0 : index
    %c0_161 = arith.constant 0 : index
    %137 = vector.load %arg16[%c0_160, %c0_161] : memref<256x8xf32, #tpu.memory_space<vmem>>, vector<256x8xf32>
    %c0_162 = arith.constant 0 : index
    %c0_163 = arith.constant 0 : index
    %138 = vector.load %arg11[%c0_162, %c0_163] : memref<8x8xf32, #tpu.memory_space<vmem>>, vector<8x8xf32>
    %cst_164 = arith.constant dense<0.000000e+00> : vector<256x8xf32>
    %139 = tpu.matmul %137, %138, %cst_164 {dimension_numbers = #tpu.dot_dimension_numbers<[1], [0], [0], [1], [0, 0, 1, 1], [], []>} : vector<256x8xf32>, vector<8x8xf32>, vector<256x8xf32> -> vector<256x8xf32>
    %c0_165 = arith.constant 0 : index
    %c0_166 = arith.constant 0 : index
    %140 = vector.load %arg12[%c0_165, %c0_166] : memref<1x8xf32, #tpu.memory_space<vmem>>, vector<1x8xf32>
    %141 = vector.broadcast %140 : vector<1x8xf32> to vector<256x8xf32>
    %142 = arith.addf %139, %141 : vector<256x8xf32>
    %143 = arith.addf %142, %136 : vector<256x8xf32>
    %c0_167 = arith.constant 0 : index
    %c0_168 = arith.constant 0 : index
    %144 = vector.load %arg17[%c0_167, %c0_168] : memref<256x8xf32, #tpu.memory_space<vmem>>, vector<256x8xf32>
    %145 = arith.addf %143, %144 : vector<256x8xf32>
    %c0_169 = arith.constant 0 : index
    %c0_170 = arith.constant 0 : index
    %146 = vector.load %arg16[%c0_169, %c0_170] : memref<256x8xf32, #tpu.memory_space<vmem>>, vector<256x8xf32>
    tpu.vector_store %arg16[%c0_169, %c0_170], %145 {strides = array<i32>} : memref<256x8xf32, #tpu.memory_space<vmem>>, vector<256x8xf32>,
    %c2_i32 = arith.constant 2 : i32
    %147 = arith.cmpi eq, %arg1, %c2_i32 : i32
    %148 = arith.extui %147 : i1 to i32
    %c0_i32_171 = arith.constant 0 : i32
    %149 = arith.cmpi ne, %148, %c0_i32_171 : i32
    scf.if %149 {
      %c0_172 = arith.constant 0 : index
      %c0_173 = arith.constant 0 : index
      %150 = vector.load %arg16[%c0_172, %c0_173] : memref<256x8xf32, #tpu.memory_space<vmem>>, vector<256x8xf32>
      %c0_174 = arith.constant 0 : index
      %c0_175 = arith.constant 0 : index
      %151 = vector.load %arg13[%c0_174, %c0_175] : memref<8x8xf32, #tpu.memory_space<vmem>>, vector<8x8xf32>
      %cst_176 = arith.constant dense<0.000000e+00> : vector<256x8xf32>
      %152 = tpu.matmul %150, %151, %cst_176 {dimension_numbers = #tpu.dot_dimension_numbers<[1], [0], [0], [1], [0, 0, 1, 1], [], []>} : vector<256x8xf32>, vector<8x8xf32>, vector<256x8xf32> -> vector<256x8xf32>
      %c0_177 = arith.constant 0 : index
      %c0_178 = arith.constant 0 : index
      %153 = vector.load %arg14[%c0_177, %c0_178] : memref<1x8xf32, #tpu.memory_space<vmem>>, vector<1x8xf32>
      %154 = vector.broadcast %153 : vector<1x8xf32> to vector<256x8xf32>
      %155 = arith.addf %152, %154 : vector<256x8xf32>
      %156 = vector.shape_cast %155 : vector<256x8xf32> to vector<1x256x8xf32>
      %c0_179 = arith.constant 0 : index
      %c0_180 = arith.constant 0 : index
      %c0_181 = arith.constant 0 : index
      %157 = vector.load %arg15[%c0_179, %c0_180, %c0_181] : memref<1x256x8xf32, #tpu.memory_space<vmem>>, vector<1x256x8xf32>
      tpu.vector_store %arg15[%c0_179, %c0_180, %c0_181], %156 {strides = array<i32>} : memref<1x256x8xf32, #tpu.memory_space<vmem>>, vector<1x256x8xf32>,
    } else {
    }
    return
  }
  func.func @transform_0(%arg0: i32, %arg1: i32) -> (i32, i32, i32) {
    %c0_i32 = arith.constant 0 : i32
    %c0_i32_0 = arith.constant 0 : i32
    %c0_i32_1 = arith.constant 0 : i32
    return %arg0, %c0_i32, %c0_i32_0 : i32, i32, i32
  }
  func.func @transform_1(%arg0: i32, %arg1: i32) -> (i32, i32) {
    %c0_i32 = arith.constant 0 : i32
    %c0_i32_0 = arith.constant 0 : i32
    %c0_i32_1 = arith.constant 0 : i32
    return %c0_i32, %c0_i32_0 : i32, i32
  }
  func.func @transform_2(%arg0: i32, %arg1: i32) -> (i32, i32) {
    %c0_i32 = arith.constant 0 : i32
    %c0_i32_0 = arith.constant 0 : i32
    %c0_i32_1 = arith.constant 0 : i32
    return %c0_i32, %c0_i32_0 : i32, i32
  }
  func.func @transform_3(%arg0: i32, %arg1: i32) -> (i32, i32, i32, i32) {
    %c0_i32 = arith.constant 0 : i32
    %c0_i32_0 = arith.constant 0 : i32
    %c0_i32_1 = arith.constant 0 : i32
    %c0_i32_2 = arith.constant 0 : i32
    return %arg1, %c0_i32, %c0_i32_0, %c0_i32_1 : i32, i32, i32, i32
  }
  func.func @transform_4(%arg0: i32, %arg1: i32) -> (i32, i32, i32) {
    %c0_i32 = arith.constant 0 : i32
    %c0_i32_0 = arith.constant 0 : i32
    %c0_i32_1 = arith.constant 0 : i32
    return %arg1, %c0_i32, %c0_i32_0 : i32, i32, i32
  }
  func.func @transform_5(%arg0: i32, %arg1: i32) -> (i32, i32, i32, i32) {
    %c0_i32 = arith.constant 0 : i32
    %c0_i32_0 = arith.constant 0 : i32
    %c0_i32_1 = arith.constant 0 : i32
    %c0_i32_2 = arith.constant 0 : i32
    return %arg1, %c0_i32, %c0_i32_0, %c0_i32_1 : i32, i32, i32, i32
  }
  func.func @transform_6(%arg0: i32, %arg1: i32) -> (i32, i32, i32) {
    %c0_i32 = arith.constant 0 : i32
    %c0_i32_0 = arith.constant 0 : i32
    %c0_i32_1 = arith.constant 0 : i32
    return %arg1, %c0_i32, %c0_i32_0 : i32, i32, i32
  }
  func.func @transform_7(%arg0: i32, %arg1: i32) -> (i32, i32, i32) {
    %c0_i32 = arith.constant 0 : i32
    %c0_i32_0 = arith.constant 0 : i32
    %c0_i32_1 = arith.constant 0 : i32
    return %arg1, %c0_i32, %c0_i32_0 : i32, i32, i32
  }
  func.func @transform_8(%arg0: i32, %arg1: i32) -> (i32, i32, i32) {
    %c0_i32 = arith.constant 0 : i32
    %c0_i32_0 = arith.constant 0 : i32
    %c0_i32_1 = arith.constant 0 : i32
    return %arg1, %c0_i32, %c0_i32_0 : i32, i32, i32
  }
  func.func @transform_9(%arg0: i32, %arg1: i32) -> (i32, i32) {
    %c0_i32 = arith.constant 0 : i32
    %c0_i32_0 = arith.constant 0 : i32
    %c0_i32_1 = arith.constant 0 : i32
    return %c0_i32, %c0_i32_0 : i32, i32
  }
  func.func @transform_10(%arg0: i32, %arg1: i32) -> (i32, i32) {
    %c0_i32 = arith.constant 0 : i32
    %c0_i32_0 = arith.constant 0 : i32
    %c0_i32_1 = arith.constant 0 : i32
    return %c0_i32, %c0_i32_0 : i32, i32
  }
  func.func @transform_11(%arg0: i32, %arg1: i32) -> (i32, i32) {
    %c0_i32 = arith.constant 0 : i32
    %c0_i32_0 = arith.constant 0 : i32
    %c0_i32_1 = arith.constant 0 : i32
    return %c0_i32, %c0_i32_0 : i32, i32
  }
  func.func @transform_12(%arg0: i32, %arg1: i32) -> (i32, i32) {
    %c0_i32 = arith.constant 0 : i32
    %c0_i32_0 = arith.constant 0 : i32
    %c0_i32_1 = arith.constant 0 : i32
    return %c0_i32, %c0_i32_0 : i32, i32
  }
  func.func @transform_13(%arg0: i32, %arg1: i32) -> (i32, i32, i32) {
    %c0_i32 = arith.constant 0 : i32
    %c0_i32_0 = arith.constant 0 : i32
    %c0_i32_1 = arith.constant 0 : i32
    return %arg0, %c0_i32, %c0_i32_0 : i32, i32, i32
  }
}

</mosaic_0001>

<bundles_post_ra>
// kernel: deep_ss_prior_forward.1
= control target key start
LH: loop header
LB: loop body
LE: loop exit
PB: predicated region body
PF: predicated region fallthrough
CT: control target
= control target key end

     0   :  { %s12975_s25 = smov 0   ;;  %s12977_s26 = smov 0   ;;  %s15691_s0 = inlined_call_operand.vmem [shape: f32[2,256,4], index: 0, kind: input, shape index: {}]   ;;  %s15692_s1 = inlined_call_operand.vmem [shape: f32[4,8], index: 1, kind: input, shape index: {}]   ;;  %s15693_s2 = inlined_call_operand.vmem [shape: f32[1,8], index: 2, kind: input, shape index: {}]   ;;  %s15694_s3 = inlined_call_operand.vmem [shape: f32[3,9,8,16], index: 3, kind: input, shape index: {}]   ;;  %s15695_s4 = inlined_call_operand.vmem [shape: f32[3,1,16], index: 4, kind: input, shape index: {}]   ;;  %s15696_s5 = inlined_call_operand.vmem [shape: f32[3,9,16,8], index: 5, kind: input, shape index: {}]   ;;  %s15697_s6 = inlined_call_operand.vmem [shape: f32[3,1,8], index: 6, kind: input, shape index: {}]   ;;  %s15698_s7 = inlined_call_operand.vmem [shape: f32[3,8,8], index: 7, kind: input, shape index: {}]   ;;  %s15699_s8 = inlined_call_operand.vmem [shape: f32[3,1,8], index: 8, kind: input, shape index: {}]   ;;  %s15700_s9 = inlined_call_operand.vmem [shape: f32[8,8], index: 9, kind: input, shape index: {}]   ;;  %s15701_s10 = inlined_call_operand.vmem [shape: f32[1,8], index: 10, kind: input, shape index: {}]   ;;  %s15702_s11 = inlined_call_operand.vmem [shape: f32[8,8], index: 11, kind: input, shape index: {}]   ;;  %s15703_s12 = inlined_call_operand.vmem [shape: f32[1,8], index: 12, kind: input, shape index: {}]   ;;  %s15704_s13 = inlined_call_operand.vmem [shape: f32[2,256,8], index: 13, kind: output, shape index: {}]  }
   0x1   :  { %15815 = sst [smem:[#allocation44_spill]] %s15691_s0  ;;  %s12979_s27 = smov 0  }
   0x2   :  { %15816 = sst [smem:[#allocation45_spill]] %s15701_s10  ;;  %s12981_s28 = smov 0  }
   0x3   :  { %15817 = sst [smem:[#allocation46_spill]] %s15702_s11  ;;  %s12983_s29 = smov 0  }
   0x4   :  { %15818 = sst [smem:[#allocation47_spill]] %s15703_s12 }
   0x5 LB: > { %15819 = sst [smem:[#allocation6_spill]] %s12894_s27  ;;  %s32_s30 = sadd.s32 1, %s12894_s27  ;;  %s12902_s29 = sphi %s12983_s29, %s23_s29   ;;  %s12898_s28 = sphi %s12981_s28, %s15976_s28   ;;  %s12894_s27 = sphi %s12979_s27, %s15975_s27   ;;  %s12890_s26 = sphi %s12977_s26, %s15974_s26   ;;  %s12886_s25 = sphi %s12975_s25, %s15973_s25  }
   0x6   : > { %15820 = sst [smem:[#allocation7_spill]] %s12898_s28  ;;  %s35_s14 = sadd.s32 1, %s12898_s28 }
   0x7   : > { %15821 = sst [smem:[#allocation8_spill]] %s12902_s29  ;;  %p33_p0 = scmp.ge.s32.totalorder %s32_s30, 3 }
   0x8   : > { %p9571_p1 = scmp.ge.s32.totalorder %s12902_s29, 1  ;;  %p452_p2 = scmp.lt.s32.totalorder %s12902_s29, 7 }
   0x9   : > { %s15978_s30 = smov (%p33_p0, %s32_s30), 0  ;;  %s15980_s14 = smov (!%p33_p0, %s35_s14), %s12898_s28 }
   0xa   : > { %15822 = sst [smem:[#allocation9_spill]] %s15978_s30  ;;  %p453_p3 = pnand %p9571_p1, %p452_p2 }
   0xb   : > { %p37_p4 = scmp.ge.s32.totalorder %s15980_s14, 2 }
   0xc   : > { %456 = sbr.rel (%p453_p3) target bundleno = 2266 (0x8da), region = 72 }
   0xd   : > { %s15982_s14 = smov (%p37_p4, %s15980_s14), 0 }
   0xe   : > { %15823 = sst [smem:[#allocation10_spill]] %s15982_s14 }
  0x13   : > { %p519_p5 = scmp.lt.s32.totalorder %s12890_s26, 1  ;;  %p524_p6 = scmp.lt.s32.totalorder %s12886_s25, 2 }
  0x14   : > { %s15824_s0 = sld [smem:[#allocation44_spill]]  ;;  %p9579_p7 = scmp.ne.s32.totalorder %s12886_s25, 0 }
  0x15   : > { %s15984_s26 = smov (!%p519_p5, %s12890_s26), 1  ;;  %vm560_vm0 = vcmask (!%p9579_p7), 57344   ;;  %vm630_vm1 = vcmask (!%p9579_p7), 130048   ;;  %vm634_vm2 = vcmask (!%p9579_p7), 122880   ;;  %v13055_v0 = vld [vmem:[%s15692_s1] sm:$0xf] (!%p9579_p7) }
  0x16   : > { %s13009_s15 = scalar_select %p524_p6, %s12886_s25, 2 }
  0x17   : > { %s10318_s16 = sshll.u32 %s15984_s26, 8  ;;  %555 = sbr.rel (%p9579_p7) target bundleno = 275 (0x113), region = 76  ;;  %v12904_v1 = vmov (!%p9579_p7), 0.0   ;;  %vm841_vm3 = vcmask (!%p9579_p7), 1043456   ;;  %vm744_vm4 = vcmask (!%p9579_p7), 31744   ;;  %vm556_vm5 = vcmask (!%p9579_p7), 64512  }
  0x18   : > { %s12821_s20 = smul.u32 72, %s13009_s15  ;;  %s539_s26 = scalar_lea.vmem %s15697_s6, %s13009_s15  ;;  %561 = vst.msk [vmem:[#allocation4 + $0x18] sm:$0x1] (!%p9579_p7), %vm560_vm0, %v12904_v1  ;;  %565 = vst.msk [vmem:[#allocation4 + $0x38] sm:$0x1] (!%p9579_p7), %vm560_vm0, %v12904_v1  ;;  %11055 = vmatprep.subr.msk.mxu0 (!%p9579_p7), %vm841_vm3, %v13055_v0  ;;  %12209 = vmatprep.subr.msk.mxu1 (!%p9579_p7), %vm841_vm3, %v13055_v0 }
  0x19   : > { %s12822_s24 = smul.u32 144, %s13009_s15  ;;  %s9576_s18 = sshll.u32 %s13009_s15, 3  ;;  %569 = vst.msk [vmem:[#allocation4 + $0x58] sm:$0x1] (!%p9579_p7), %vm560_vm0, %v12904_v1  ;;  %573 = vst.msk [vmem:[#allocation4 + $0x78] sm:$0x1] (!%p9579_p7), %vm560_vm0, %v12904_v1  ;;  %11056 = vmatpush3.msk.msra.mxu0 (!%p9579_p7), %vm841_vm3, %v13055_v0  ;;  %12210 = vmatpush3.msk.msra.mxu1 (!%p9579_p7), %vm841_vm3, %v13055_v0 }
  0x1a   : > { %s13014_s19 = scalar_lea.vmem %s15824_s0, %s10318_s16  ;;  %s13025_s28 = scalar_lea.vmem %s15694_s3, %s12821_s20  ;;  %577 = vst.msk [vmem:[#allocation4 + $0x98] sm:$0x1] (!%p9579_p7), %vm560_vm0, %v12904_v1  ;;  %581 = vst.msk [vmem:[#allocation4 + $0xb8] sm:$0x1] (!%p9579_p7), %vm560_vm0, %v12904_v1  ;;  %v13426_v34 = vld [vmem:[%s15693_s2] ss:$0 sm:$0xff] (!%p9579_p7) }
  0x1b   : > { %s13034_s17 = scalar_lea.vmem %s15696_s5, %s12822_s24  ;;  %s13040_s21 = scalar_lea.vmem %s15698_s7, %s9576_s18  ;;  %585 = vst.msk [vmem:[#allocation4 + $0xd8] sm:$0x1] (!%p9579_p7), %vm560_vm0, %v12904_v1  ;;  %589 = vst.msk [vmem:[#allocation4 + $0xf8] sm:$0x1] (!%p9579_p7), %vm560_vm0, %v12904_v1  ;;  %v13238_v2 = vld [vmem:[%s13014_s19] sm:$0xff] (!%p9579_p7)  ;;  %v705_v4 = vld [vmem:[%s13014_s19 + $0x8] sm:$0xff] (!%p9579_p7) }
  0x1c   : > { %s546_s30 = scalar_lea.vmem %s15699_s8, %s13009_s15  ;;  %s13049_s27 = scalar_lea.vmem %s15704_s13, %s10318_s16  ;;  %593 = vst.msk [vmem:[#allocation4 + $0x118] sm:$0x1] (!%p9579_p7), %vm560_vm0, %v12904_v1  ;;  %597 = vst.msk [vmem:[#allocation4 + $0x138] sm:$0x1] (!%p9579_p7), %vm560_vm0, %v12904_v1  ;;  %v13241_v3 = vld [vmem:[%s13014_s19 + $0x80] sm:$0xff] (!%p9579_p7)  ;;  %v721_v5 = vld [vmem:[%s13014_s19 + $0x88] sm:$0xff] (!%p9579_p7)  ;;  %11057 = vmatprep.mubr.msk.f32.mxu0 (!%p9579_p7), %vm744_vm4, %v13238_v2 }
  0x1d   : > { %601 = vst.msk [vmem:[#allocation4 + $0x158] sm:$0x1] (!%p9579_p7), %vm560_vm0, %v12904_v1  ;;  %605 = vst.msk [vmem:[#allocation4 + $0x178] sm:$0x1] (!%p9579_p7), %vm560_vm0, %v12904_v1  ;;  %v706_v6 = vld [vmem:[%s13014_s19 + $0x10] sm:$0xff] (!%p9579_p7)  ;;  %11081 = vmatprep.mubr.msk.f32.mxu1 (!%p9579_p7), %vm744_vm4, %v13241_v3  ;;  %11058 = vmatmul.mubr.msk.f32.vlgmr.msra.gmra.mrb[0].mxu0 (!%p9579_p7), %vm744_vm4, %v705_v4  ;;  %v707_v8 = vld [vmem:[%s13014_s19 + $0x18] sm:$0xff] (!%p9579_p7) }
  0x1e   : > { %609 = vst.msk [vmem:[#allocation4 + $0x198] sm:$0x1] %vm560_vm0, %v12904_v1  ;;  %613 = vst.msk [vmem:[#allocation4 + $0x1b8] sm:$0x1] %vm560_vm0, %v12904_v1  ;;  %v722_v7 = vld [vmem:[%s13014_s19 + $0x90] sm:$0xff]  ;;  %11082 = vmatmul.mubr.msk.f32.vlgmr.msra.gmra.mrb[0].mxu1 %vm744_vm4, %v721_v5  ;;  %11060 = vmatprep.mubr.msk.f32.mxu0 %vm744_vm4, %v706_v6  ;;  %v723_v9 = vld [vmem:[%s13014_s19 + $0x98] sm:$0xff] }
  0x1f   : > { %617 = vst.msk [vmem:[#allocation4 + $0x1d8] sm:$0x1] %vm560_vm0, %v12904_v1  ;;  %621 = vst.msk [vmem:[#allocation4 + $0x1f8] sm:$0x1] %vm560_vm0, %v12904_v1  ;;  %11084 = vmatprep.mubr.msk.f32.mxu1 %vm744_vm4, %v722_v7  ;;  %v708_v10 = vld [vmem:[%s13014_s19 + $0x20] sm:$0xff]  ;;  %v709_v12 = vld [vmem:[%s13014_s19 + $0x28] sm:$0xff] }
  0x20   : > { %625 = vst.msk [vmem:[#allocation4 + $0x218] sm:$0x1] %vm560_vm0, %v12904_v1  ;;  %629 = vst.msk [vmem:[#allocation4 + $0x238] sm:$0x1] %vm560_vm0, %v12904_v1  ;;  %v724_v11 = vld [vmem:[%s13014_s19 + $0xa0] sm:$0xff]  ;;  %v725_v13 = vld [vmem:[%s13014_s19 + $0xa8] sm:$0xff] }
  0x21   : > { %631 = vst.msk [vmem:[#allocation5] sm:$0xff] %vm630_vm1, %v12904_v1  ;;  %632 = vst.msk [vmem:[#allocation5 + $0x8] sm:$0xff] %vm630_vm1, %v12904_v1  ;;  %11061 = vmatmul.mubr.msk.f32.gmra.mrb[2].mxu0 %vm744_vm4, %v707_v8  ;;  %v710_v14 = vld [vmem:[%s13014_s19 + $0x30] sm:$0xff]  ;;  %v711_v16 = vld [vmem:[%s13014_s19 + $0x38] sm:$0xff] }
  0x22   : > { %633 = vst.msk [vmem:[#allocation5 + $0x10] sm:$0xff] %vm630_vm1, %v12904_v1  ;;  %636 = vst.msk [vmem:[#allocation5 + $0x20] sm:$0xff] %vm630_vm1, %v12904_v1  ;;  %11085 = vmatmul.mubr.msk.f32.gmra.mrb[2].mxu1 %vm744_vm4, %v723_v9  ;;  %11063 = vmatprep.mubr.msk.f32.mxu0 %vm744_vm4, %v708_v10  ;;  %v726_v15 = vld [vmem:[%s13014_s19 + $0xb0] sm:$0xff]  ;;  %v727_v17 = vld [vmem:[%s13014_s19 + $0xb8] sm:$0xff] }
  0x23   : > { %635 = vst.msk [vmem:[#allocation5 + $0x18] sm:$0x1] %vm634_vm2, %v12904_v1  ;;  %639 = vst.msk [vmem:[#allocation5 + $0x38] sm:$0x1] %vm634_vm2, %v12904_v1  ;;  %11087 = vmatprep.mubr.msk.f32.mxu1 %vm744_vm4, %v724_v11  ;;  %v712_v18 = vld [vmem:[%s13014_s19 + $0x40] sm:$0xff]  ;;  %v713_v20 = vld [vmem:[%s13014_s19 + $0x48] sm:$0xff] }
  0x24   : > { %637 = vst.msk [vmem:[#allocation5 + $0x28] sm:$0xff] %vm630_vm1, %v12904_v1  ;;  %638 = vst.msk [vmem:[#allocation5 + $0x30] sm:$0xff] %vm630_vm1, %v12904_v1  ;;  %v728_v19 = vld [vmem:[%s13014_s19 + $0xc0] sm:$0xff]  ;;  %v729_v21 = vld [vmem:[%s13014_s19 + $0xc8] sm:$0xff] }
  0x25   : > { %640 = vst.msk [vmem:[#allocation5 + $0x40] sm:$0xff] %vm630_vm1, %v12904_v1  ;;  %641 = vst.msk [vmem:[#allocation5 + $0x48] sm:$0xff] %vm630_vm1, %v12904_v1  ;;  %11064 = vmatmul.mubr.msk.f32.gmra.mrb[4].mxu0 %vm744_vm4, %v709_v12  ;;  %v714_v22 = vld [vmem:[%s13014_s19 + $0x50] sm:$0xff]  ;;  %v715_v24 = vld [vmem:[%s13014_s19 + $0x58] sm:$0xff] }
  0x26   : > { %642 = vst.msk [vmem:[#allocation5 + $0x50] sm:$0xff] %vm630_vm1, %v12904_v1  ;;  %644 = vst.msk [vmem:[#allocation5 + $0x60] sm:$0xff] %vm630_vm1, %v12904_v1  ;;  %11088 = vmatmul.mubr.msk.f32.gmra.mrb[4].mxu1 %vm744_vm4, %v725_v13  ;;  %11066 = vmatprep.mubr.msk.f32.mxu0 %vm744_vm4, %v710_v14  ;;  %v730_v23 = vld [vmem:[%s13014_s19 + $0xd0] sm:$0xff]  ;;  %v731_v25 = vld [vmem:[%s13014_s19 + $0xd8] sm:$0xff] }
  0x27   : > { %643 = vst.msk [vmem:[#allocation5 + $0x58] sm:$0x1] %vm634_vm2, %v12904_v1  ;;  %647 = vst.msk [vmem:[#allocation5 + $0x78] sm:$0x1] %vm634_vm2, %v12904_v1  ;;  %11090 = vmatprep.mubr.msk.f32.mxu1 %vm744_vm4, %v726_v15  ;;  %v716_v26 = vld [vmem:[%s13014_s19 + $0x60] sm:$0xff]  ;;  %v717_v28 = vld [vmem:[%s13014_s19 + $0x68] sm:$0xff] }
  0x28   : > { %645 = vst.msk [vmem:[#allocation5 + $0x68] sm:$0xff] %vm630_vm1, %v12904_v1  ;;  %646 = vst.msk [vmem:[#allocation5 + $0x70] sm:$0xff] %vm630_vm1, %v12904_v1  ;;  %v732_v27 = vld [vmem:[%s13014_s19 + $0xe0] sm:$0xff]  ;;  %v733_v29 = vld [vmem:[%s13014_s19 + $0xe8] sm:$0xff] }
  0x29   : > { %648 = vst.msk [vmem:[#allocation5 + $0x80] sm:$0xff] %vm630_vm1, %v12904_v1  ;;  %649 = vst.msk [vmem:[#allocation5 + $0x88] sm:$0xff] %vm630_vm1, %v12904_v1  ;;  %11067 = vmatmul.mubr.msk.f32.gmra.mrb[6].mxu0 %vm744_vm4, %v711_v16  ;;  %v718_v30 = vld [vmem:[%s13014_s19 + $0x70] sm:$0xff]  ;;  %v719_v32 = vld [vmem:[%s13014_s19 + $0x78] sm:$0xff] }
  0x2a   : > { %650 = vst.msk [vmem:[#allocation5 + $0x90] sm:$0xff] %vm630_vm1, %v12904_v1  ;;  %652 = vst.msk [vmem:[#allocation5 + $0xa0] sm:$0xff] %vm630_vm1, %v12904_v1  ;;  %11091 = vmatmul.mubr.msk.f32.gmra.mrb[6].mxu1 %vm744_vm4, %v727_v17  ;;  %11069 = vmatprep.mubr.msk.f32.mxu0 %vm744_vm4, %v712_v18  ;;  %v734_v31 = vld [vmem:[%s13014_s19 + $0xf0] sm:$0xff]  ;;  %v735_v33 = vld [vmem:[%s13014_s19 + $0xf8] sm:$0xff] }
  0x2b   : > { %651 = vst.msk [vmem:[#allocation5 + $0x98] sm:$0x1] %vm634_vm2, %v12904_v1  ;;  %655 = vst.msk [vmem:[#allocation5 + $0xb8] sm:$0x1] %vm634_vm2, %v12904_v1  ;;  %11093 = vmatprep.mubr.msk.f32.mxu1 %vm744_vm4, %v728_v19 }
  0x2c   : > { %653 = vst.msk [vmem:[#allocation5 + $0xa8] sm:$0xff] %vm630_vm1, %v12904_v1  ;;  %654 = vst.msk [vmem:[#allocation5 + $0xb0] sm:$0xff] %vm630_vm1, %v12904_v1 }
  0x2d   : > { %656 = vst.msk [vmem:[#allocation5 + $0xc0] sm:$0xff] %vm630_vm1, %v12904_v1  ;;  %657 = vst.msk [vmem:[#allocation5 + $0xc8] sm:$0xff] %vm630_vm1, %v12904_v1  ;;  %11070 = vmatmul.mubr.msk.f32.gmra.mrb[8].mxu0 %vm744_vm4, %v713_v20 }
  0x2e   : > { %658 = vst.msk [vmem:[#allocation5 + $0xd0] sm:$0xff] %vm630_vm1, %v12904_v1  ;;  %660 = vst.msk [vmem:[#allocation5 + $0xe0] sm:$0xff] %vm630_vm1, %v12904_v1  ;;  %11094 = vmatmul.mubr.msk.f32.gmra.mrb[8].mxu1 %vm744_vm4, %v729_v21  ;;  %11072 = vmatprep.mubr.msk.f32.mxu0 %vm744_vm4, %v714_v22 }
  0x2f   : > { %659 = vst.msk [vmem:[#allocation5 + $0xd8] sm:$0x1] %vm634_vm2, %v12904_v1  ;;  %663 = vst.msk [vmem:[#allocation5 + $0xf8] sm:$0x1] %vm634_vm2, %v12904_v1  ;;  %11096 = vmatprep.mubr.msk.f32.mxu1 %vm744_vm4, %v730_v23 }
  0x30   : > { %661 = vst.msk [vmem:[#allocation5 + $0xe8] sm:$0xff] %vm630_vm1, %v12904_v1  ;;  %662 = vst.msk [vmem:[#allocation5 + $0xf0] sm:$0xff] %vm630_vm1, %v12904_v1 }
  0x31   : > { %664 = vst.msk [vmem:[#allocation5 + $0x100] sm:$0xff] %vm630_vm1, %v12904_v1  ;;  %665 = vst.msk [vmem:[#allocation5 + $0x108] sm:$0xff] %vm630_vm1, %v12904_v1  ;;  %11073 = vmatmul.mubr.msk.f32.gmra.mrb[10].mxu0 %vm744_vm4, %v715_v24 }
  0x32   : > { %666 = vst.msk [vmem:[#allocation5 + $0x110] sm:$0xff] %vm630_vm1, %v12904_v1  ;;  %668 = vst.msk [vmem:[#allocation5 + $0x120] sm:$0xff] %vm630_vm1, %v12904_v1  ;;  %11097 = vmatmul.mubr.msk.f32.gmra.mrb[10].mxu1 %vm744_vm4, %v731_v25  ;;  %11075 = vmatprep.mubr.msk.f32.mxu0 %vm744_vm4, %v716_v26 }
  0x33   : > { %667 = vst.msk [vmem:[#allocation5 + $0x118] sm:$0x1] %vm634_vm2, %v12904_v1  ;;  %671 = vst.msk [vmem:[#allocation5 + $0x138] sm:$0x1] %vm634_vm2, %v12904_v1  ;;  %11099 = vmatprep.mubr.msk.f32.mxu1 %vm744_vm4, %v732_v27 }
  0x34   : > { %669 = vst.msk [vmem:[#allocation5 + $0x128] sm:$0xff] %vm630_vm1, %v12904_v1  ;;  %670 = vst.msk [vmem:[#allocation5 + $0x130] sm:$0xff] %vm630_vm1, %v12904_v1 }
  0x35   : > { %672 = vst.msk [vmem:[#allocation5 + $0x140] sm:$0xff] %vm630_vm1, %v12904_v1  ;;  %673 = vst.msk [vmem:[#allocation5 + $0x148] sm:$0xff] %vm630_vm1, %v12904_v1  ;;  %11076 = vmatmul.mubr.msk.f32.gmra.mrb[12].mxu0 %vm744_vm4, %v717_v28 }
  0x36   : > { %674 = vst.msk [vmem:[#allocation5 + $0x150] sm:$0xff] %vm630_vm1, %v12904_v1  ;;  %676 = vst.msk [vmem:[#allocation5 + $0x160] sm:$0xff] %vm630_vm1, %v12904_v1  ;;  %11100 = vmatmul.mubr.msk.f32.gmra.mrb[12].mxu1 %vm744_vm4, %v733_v29  ;;  %11078 = vmatprep.mubr.msk.f32.mxu0 %vm744_vm4, %v718_v30 }
  0x37   : > { %675 = vst.msk [vmem:[#allocation5 + $0x158] sm:$0x1] %vm634_vm2, %v12904_v1  ;;  %679 = vst.msk [vmem:[#allocation5 + $0x178] sm:$0x1] %vm634_vm2, %v12904_v1  ;;  %11102 = vmatprep.mubr.msk.f32.mxu1 %vm744_vm4, %v734_v31 }
  0x38   : > { %677 = vst.msk [vmem:[#allocation5 + $0x168] sm:$0xff] %vm630_vm1, %v12904_v1  ;;  %678 = vst.msk [vmem:[#allocation5 + $0x170] sm:$0xff] %vm630_vm1, %v12904_v1 }
  0x39   : > { %680 = vst.msk [vmem:[#allocation5 + $0x180] sm:$0xff] %vm630_vm1, %v12904_v1  ;;  %681 = vst.msk [vmem:[#allocation5 + $0x188] sm:$0xff] %vm630_vm1, %v12904_v1  ;;  %11079 = vmatmul.mubr.msk.f32.gmra.mrb[14].mxu0 %vm744_vm4, %v719_v32 }
  0x3a   : > { %682 = vst.msk [vmem:[#allocation5 + $0x190] sm:$0xff] %vm630_vm1, %v12904_v1  ;;  %684 = vst.msk [vmem:[#allocation5 + $0x1a0] sm:$0xff] %vm630_vm1, %v12904_v1  ;;  %11103 = vmatmul.mubr.msk.f32.gmra.mrb[14].mxu1 %vm744_vm4, %v735_v33 }
  0x3b   : > { %683 = vst.msk [vmem:[#allocation5 + $0x198] sm:$0x1] %vm634_vm2, %v12904_v1  ;;  %687 = vst.msk [vmem:[#allocation5 + $0x1b8] sm:$0x1] %vm634_vm2, %v12904_v1 }
  0x3c   : > { %685 = vst.msk [vmem:[#allocation5 + $0x1a8] sm:$0xff] %vm630_vm1, %v12904_v1  ;;  %686 = vst.msk [vmem:[#allocation5 + $0x1b0] sm:$0xff] %vm630_vm1, %v12904_v1 }
  0x3d   : > { %688 = vst.msk [vmem:[#allocation5 + $0x1c0] sm:$0xff] %vm630_vm1, %v12904_v1  ;;  %689 = vst.msk [vmem:[#allocation5 + $0x1c8] sm:$0xff] %vm630_vm1, %v12904_v1 }
  0x3e   : > { %690 = vst.msk [vmem:[#allocation5 + $0x1d0] sm:$0xff] %vm630_vm1, %v12904_v1  ;;  %692 = vst.msk [vmem:[#allocation5 + $0x1e0] sm:$0xff] %vm630_vm1, %v12904_v1 }
  0x3f   : > { %691 = vst.msk [vmem:[#allocation5 + $0x1d8] sm:$0x1] %vm634_vm2, %v12904_v1  ;;  %695 = vst.msk [vmem:[#allocation5 + $0x1f8] sm:$0x1] %vm634_vm2, %v12904_v1 }
  0x40   : > { %693 = vst.msk [vmem:[#allocation5 + $0x1e8] sm:$0xff] %vm630_vm1, %v12904_v1  ;;  %694 = vst.msk [vmem:[#allocation5 + $0x1f0] sm:$0xff] %vm630_vm1, %v12904_v1 }
  0x41   : > { %696 = vst.msk [vmem:[#allocation5 + $0x200] sm:$0xff] %vm630_vm1, %v12904_v1  ;;  %697 = vst.msk [vmem:[#allocation5 + $0x208] sm:$0xff] %vm630_vm1, %v12904_v1 }
  0x42   : > { %698 = vst.msk [vmem:[#allocation5 + $0x210] sm:$0xff] %vm630_vm1, %v12904_v1  ;;  %700 = vst.msk [vmem:[#allocation5 + $0x220] sm:$0xff] %vm630_vm1, %v12904_v1 }
  0x43   : > { %699 = vst.msk [vmem:[#allocation5 + $0x218] sm:$0x1] %vm634_vm2, %v12904_v1  ;;  %703 = vst.msk [vmem:[#allocation5 + $0x238] sm:$0x1] %vm634_vm2, %v12904_v1 }
  0x44   : > { %701 = vst.msk [vmem:[#allocation5 + $0x228] sm:$0xff] %vm630_vm1, %v12904_v1  ;;  %702 = vst.msk [vmem:[#allocation5 + $0x230] sm:$0xff] %vm630_vm1, %v12904_v1 }
  0x45   : > { %557 = vst.msk [vmem:[#allocation4] sm:$0xff] %vm556_vm5, %v12904_v1  ;;  %558 = vst.msk [vmem:[#allocation4 + $0x8] sm:$0xff] %vm556_vm5, %v12904_v1 }
  0x46   : > { %559 = vst.msk [vmem:[#allocation4 + $0x10] sm:$0xff] %vm556_vm5, %v12904_v1  ;;  %562 = vst.msk [vmem:[#allocation4 + $0x20] sm:$0xff] %vm556_vm5, %v12904_v1 }
  0x47   : > { %563 = vst.msk [vmem:[#allocation4 + $0x28] sm:$0xff] %vm556_vm5, %v12904_v1  ;;  %564 = vst.msk [vmem:[#allocation4 + $0x30] sm:$0xff] %vm556_vm5, %v12904_v1 }
  0x48   : > { %566 = vst.msk [vmem:[#allocation4 + $0x40] sm:$0xff] %vm556_vm5, %v12904_v1  ;;  %567 = vst.msk [vmem:[#allocation4 + $0x48] sm:$0xff] %vm556_vm5, %v12904_v1 }
  0x49   : > { %568 = vst.msk [vmem:[#allocation4 + $0x50] sm:$0xff] %vm556_vm5, %v12904_v1  ;;  %570 = vst.msk [vmem:[#allocation4 + $0x60] sm:$0xff] %vm556_vm5, %v12904_v1 }
  0x4a   : > { %571 = vst.msk [vmem:[#allocation4 + $0x68] sm:$0xff] %vm556_vm5, %v12904_v1  ;;  %572 = vst.msk [vmem:[#allocation4 + $0x70] sm:$0xff] %vm556_vm5, %v12904_v1 }
  0x4b   : > { %574 = vst.msk [vmem:[#allocation4 + $0x80] sm:$0xff] %vm556_vm5, %v12904_v1  ;;  %575 = vst.msk [vmem:[#allocation4 + $0x88] sm:$0xff] %vm556_vm5, %v12904_v1 }
  0x4c   : > { %576 = vst.msk [vmem:[#allocation4 + $0x90] sm:$0xff] %vm556_vm5, %v12904_v1  ;;  %578 = vst.msk [vmem:[#allocation4 + $0xa0] sm:$0xff] %vm556_vm5, %v12904_v1 }
  0x4d   : > { %579 = vst.msk [vmem:[#allocation4 + $0xa8] sm:$0xff] %vm556_vm5, %v12904_v1  ;;  %580 = vst.msk [vmem:[#allocation4 + $0xb0] sm:$0xff] %vm556_vm5, %v12904_v1 }
  0x4e   : > { %582 = vst.msk [vmem:[#allocation4 + $0xc0] sm:$0xff] %vm556_vm5, %v12904_v1  ;;  %583 = vst.msk [vmem:[#allocation4 + $0xc8] sm:$0xff] %vm556_vm5, %v12904_v1 }
  0x4f   : > { %584 = vst.msk [vmem:[#allocation4 + $0xd0] sm:$0xff] %vm556_vm5, %v12904_v1  ;;  %586 = vst.msk [vmem:[#allocation4 + $0xe0] sm:$0xff] %vm556_vm5, %v12904_v1 }
  0x50   : > { %587 = vst.msk [vmem:[#allocation4 + $0xe8] sm:$0xff] %vm556_vm5, %v12904_v1  ;;  %588 = vst.msk [vmem:[#allocation4 + $0xf0] sm:$0xff] %vm556_vm5, %v12904_v1 }
  0x51   : > { %590 = vst.msk [vmem:[#allocation4 + $0x100] sm:$0xff] %vm556_vm5, %v12904_v1  ;;  %591 = vst.msk [vmem:[#allocation4 + $0x108] sm:$0xff] %vm556_vm5, %v12904_v1 }
  0x52   : > { %592 = vst.msk [vmem:[#allocation4 + $0x110] sm:$0xff] %vm556_vm5, %v12904_v1  ;;  %594 = vst.msk [vmem:[#allocation4 + $0x120] sm:$0xff] %vm556_vm5, %v12904_v1 }
  0x53   : > { %595 = vst.msk [vmem:[#allocation4 + $0x128] sm:$0xff] %vm556_vm5, %v12904_v1  ;;  %596 = vst.msk [vmem:[#allocation4 + $0x130] sm:$0xff] %vm556_vm5, %v12904_v1 }
  0x54   : > { %598 = vst.msk [vmem:[#allocation4 + $0x140] sm:$0xff] %vm556_vm5, %v12904_v1  ;;  %599 = vst.msk [vmem:[#allocation4 + $0x148] sm:$0xff] %vm556_vm5, %v12904_v1 }
  0x55   : > { %600 = vst.msk [vmem:[#allocation4 + $0x150] sm:$0xff] %vm556_vm5, %v12904_v1  ;;  %602 = vst.msk [vmem:[#allocation4 + $0x160] sm:$0xff] %vm556_vm5, %v12904_v1 }
  0x56   : > { %603 = vst.msk [vmem:[#allocation4 + $0x168] sm:$0xff] %vm556_vm5, %v12904_v1  ;;  %604 = vst.msk [vmem:[#allocation4 + $0x170] sm:$0xff] %vm556_vm5, %v12904_v1 }
  0x57   : > { %606 = vst.msk [vmem:[#allocation4 + $0x180] sm:$0xff] %vm556_vm5, %v12904_v1  ;;  %607 = vst.msk [vmem:[#allocation4 + $0x188] sm:$0xff] %vm556_vm5, %v12904_v1 }
  0x58   : > { %608 = vst.msk [vmem:[#allocation4 + $0x190] sm:$0xff] %vm556_vm5, %v12904_v1  ;;  %610 = vst.msk [vmem:[#allocation4 + $0x1a0] sm:$0xff] %vm556_vm5, %v12904_v1 }
  0x59   : > { %611 = vst.msk [vmem:[#allocation4 + $0x1a8] sm:$0xff] %vm556_vm5, %v12904_v1  ;;  %612 = vst.msk [vmem:[#allocation4 + $0x1b0] sm:$0xff] %vm556_vm5, %v12904_v1 }
  0x5a   : > { %614 = vst.msk [vmem:[#allocation4 + $0x1c0] sm:$0xff] %vm556_vm5, %v12904_v1  ;;  %615 = vst.msk [vmem:[#allocation4 + $0x1c8] sm:$0xff] %vm556_vm5, %v12904_v1 }
  0x5b   : > { %616 = vst.msk [vmem:[#allocation4 + $0x1d0] sm:$0xff] %vm556_vm5, %v12904_v1  ;;  %618 = vst.msk [vmem:[#allocation4 + $0x1e0] sm:$0xff] %vm556_vm5, %v12904_v1 }
  0x5c   : > { %619 = vst.msk [vmem:[#allocation4 + $0x1e8] sm:$0xff] %vm556_vm5, %v12904_v1  ;;  %620 = vst.msk [vmem:[#allocation4 + $0x1f0] sm:$0xff] %vm556_vm5, %v12904_v1 }
  0x5d   : > { %622 = vst.msk [vmem:[#allocation4 + $0x200] sm:$0xff] %vm556_vm5, %v12904_v1  ;;  %623 = vst.msk [vmem:[#allocation4 + $0x208] sm:$0xff] %vm556_vm5, %v12904_v1 }
  0x5e   : > { %624 = vst.msk [vmem:[#allocation4 + $0x210] sm:$0xff] %vm556_vm5, %v12904_v1  ;;  %626 = vst.msk [vmem:[#allocation4 + $0x220] sm:$0xff] %vm556_vm5, %v12904_v1 }
  0x5f   : > { %627 = vst.msk [vmem:[#allocation4 + $0x228] sm:$0xff] %vm556_vm5, %v12904_v1  ;;  %628 = vst.msk [vmem:[#allocation4 + $0x230] sm:$0xff] %vm556_vm5, %v12904_v1 }
  0xf0   : > { %v11059_v35 = vpop.f32.mrb[0].mxu0 }
  0xf1   : > { %v11083_v36 = vpop.f32.mrb[0].mxu1  ;;  %v917_v37 = vadd.f32 %v11059_v35, %v13426_v34  ;;  %v911_v39 = vpop.f32.mrb[1].mxu0 }
  0xf2   : > { %v997_v38 = vadd.f32 %v11083_v36, %v13426_v34  ;;  %v991_v40 = vpop.f32.mrb[1].mxu1  ;;  %v912_v41 = vadd.f32 %v13426_v34, %v911_v39 }
  0xf3   : > { %v992_v42 = vadd.f32 %v13426_v34, %v991_v40  ;;  %1071 = vst.msk [vmem:[#allocation2 + $0x8] sm:$0xff] %vm556_vm5, %v917_v37  ;;  %1103 = vst.msk [vmem:[#allocation3 + $0x8] sm:$0xff] %vm556_vm5, %v917_v37 }
  0xf4   : > { %1087 = vst.msk [vmem:[#allocation2 + $0x88] sm:$0xff] %vm556_vm5, %v997_v38  ;;  %1119 = vst.msk [vmem:[#allocation3 + $0x88] sm:$0xff] %vm556_vm5, %v997_v38  ;;  %v11062_v43 = vpop.f32.mrb[2].mxu0 }
  0xf5   : > { %1070 = vst.msk [vmem:[#allocation2] sm:$0xff] %vm556_vm5, %v912_v41  ;;  %1102 = vst.msk [vmem:[#allocation3] sm:$0xff] %vm556_vm5, %v912_v41  ;;  %v11086_v44 = vpop.f32.mrb[2].mxu1  ;;  %v927_v45 = vadd.f32 %v11062_v43, %v13426_v34  ;;  %v921_v47 = vpop.f32.mrb[3].mxu0 }
  0xf6   : > { %1086 = vst.msk [vmem:[#allocation2 + $0x80] sm:$0xff] %vm556_vm5, %v992_v42  ;;  %1118 = vst.msk [vmem:[#allocation3 + $0x80] sm:$0xff] %vm556_vm5, %v992_v42  ;;  %v1007_v46 = vadd.f32 %v11086_v44, %v13426_v34  ;;  %v1001_v48 = vpop.f32.mrb[3].mxu1  ;;  %v922_v49 = vadd.f32 %v13426_v34, %v921_v47 }
  0xf7   : > { %v1002_v50 = vadd.f32 %v13426_v34, %v1001_v48  ;;  %1073 = vst.msk [vmem:[#allocation2 + $0x18] sm:$0xff] %vm556_vm5, %v927_v45  ;;  %1105 = vst.msk [vmem:[#allocation3 + $0x18] sm:$0xff] %vm556_vm5, %v927_v45 }
  0xf8   : > { %1089 = vst.msk [vmem:[#allocation2 + $0x98] sm:$0xff] %vm556_vm5, %v1007_v46  ;;  %1121 = vst.msk [vmem:[#allocation3 + $0x98] sm:$0xff] %vm556_vm5, %v1007_v46  ;;  %v11065_v51 = vpop.f32.mrb[4].mxu0 }
  0xf9   : > { %1072 = vst.msk [vmem:[#allocation2 + $0x10] sm:$0xff] %vm556_vm5, %v922_v49  ;;  %1104 = vst.msk [vmem:[#allocation3 + $0x10] sm:$0xff] %vm556_vm5, %v922_v49  ;;  %v11089_v52 = vpop.f32.mrb[4].mxu1  ;;  %v937_v53 = vadd.f32 %v11065_v51, %v13426_v34  ;;  %v931_v55 = vpop.f32.mrb[5].mxu0 }
  0xfa   : > { %1088 = vst.msk [vmem:[#allocation2 + $0x90] sm:$0xff] %vm556_vm5, %v1002_v50  ;;  %1120 = vst.msk [vmem:[#allocation3 + $0x90] sm:$0xff] %vm556_vm5, %v1002_v50  ;;  %v1017_v54 = vadd.f32 %v11089_v52, %v13426_v34  ;;  %v1011_v56 = vpop.f32.mrb[5].mxu1  ;;  %v932_v57 = vadd.f32 %v13426_v34, %v931_v55 }
  0xfb   : > { %v1012_v58 = vadd.f32 %v13426_v34, %v1011_v56  ;;  %1075 = vst.msk [vmem:[#allocation2 + $0x28] sm:$0xff] %vm556_vm5, %v937_v53  ;;  %1107 = vst.msk [vmem:[#allocation3 + $0x28] sm:$0xff] %vm556_vm5, %v937_v53 }
  0xfc   : > { %1091 = vst.msk [vmem:[#allocation2 + $0xa8] sm:$0xff] %vm556_vm5, %v1017_v54  ;;  %1123 = vst.msk [vmem:[#allocation3 + $0xa8] sm:$0xff] %vm556_vm5, %v1017_v54  ;;  %v11068_v59 = vpop.f32.mrb[6].mxu0 }
  0xfd   : > { %1074 = vst.msk [vmem:[#allocation2 + $0x20] sm:$0xff] %vm556_vm5, %v932_v57  ;;  %1106 = vst.msk [vmem:[#allocation3 + $0x20] sm:$0xff] %vm556_vm5, %v932_v57  ;;  %v11092_v60 = vpop.f32.mrb[6].mxu1  ;;  %v947_v61 = vadd.f32 %v11068_v59, %v13426_v34  ;;  %v941_v63 = vpop.f32.mrb[7].mxu0 }
  0xfe   : > { %1090 = vst.msk [vmem:[#allocation2 + $0xa0] sm:$0xff] %vm556_vm5, %v1012_v58  ;;  %1122 = vst.msk [vmem:[#allocation3 + $0xa0] sm:$0xff] %vm556_vm5, %v1012_v58  ;;  %v1027_v62 = vadd.f32 %v11092_v60, %v13426_v34  ;;  %v1021_v0 = vpop.f32.mrb[7].mxu1  ;;  %v942_v1 = vadd.f32 %v13426_v34, %v941_v63 }
  0xff   : > { %v1022_v2 = vadd.f32 %v13426_v34, %v1021_v0  ;;  %1077 = vst.msk [vmem:[#allocation2 + $0x38] sm:$0xff] %vm556_vm5, %v947_v61  ;;  %1109 = vst.msk [vmem:[#allocation3 + $0x38] sm:$0xff] %vm556_vm5, %v947_v61 }
 0x100   : > { %1093 = vst.msk [vmem:[#allocation2 + $0xb8] sm:$0xff] %vm556_vm5, %v1027_v62  ;;  %1125 = vst.msk [vmem:[#allocation3 + $0xb8] sm:$0xff] %vm556_vm5, %v1027_v62  ;;  %v11071_v3 = vpop.f32.mrb[8].mxu0 }
 0x101   : > { %1076 = vst.msk [vmem:[#allocation2 + $0x30] sm:$0xff] %vm556_vm5, %v942_v1  ;;  %1108 = vst.msk [vmem:[#allocation3 + $0x30] sm:$0xff] %vm556_vm5, %v942_v1  ;;  %v11095_v4 = vpop.f32.mrb[8].mxu1  ;;  %v957_v5 = vadd.f32 %v11071_v3, %v13426_v34  ;;  %v951_v7 = vpop.f32.mrb[9].mxu0 }
 0x102   : > { %1092 = vst.msk [vmem:[#allocation2 + $0xb0] sm:$0xff] %vm556_vm5, %v1022_v2  ;;  %1124 = vst.msk [vmem:[#allocation3 + $0xb0] sm:$0xff] %vm556_vm5, %v1022_v2  ;;  %v1037_v6 = vadd.f32 %v11095_v4, %v13426_v34  ;;  %v1031_v8 = vpop.f32.mrb[9].mxu1  ;;  %v952_v9 = vadd.f32 %v13426_v34, %v951_v7 }
 0x103   : > { %v1032_v10 = vadd.f32 %v13426_v34, %v1031_v8  ;;  %1079 = vst.msk [vmem:[#allocation2 + $0x48] sm:$0xff] %vm556_vm5, %v957_v5  ;;  %1111 = vst.msk [vmem:[#allocation3 + $0x48] sm:$0xff] %vm556_vm5, %v957_v5 }
 0x104   : > { %1095 = vst.msk [vmem:[#allocation2 + $0xc8] sm:$0xff] %vm556_vm5, %v1037_v6  ;;  %1127 = vst.msk [vmem:[#allocation3 + $0xc8] sm:$0xff] %vm556_vm5, %v1037_v6  ;;  %v11074_v11 = vpop.f32.mrb[10].mxu0 }
 0x105   : > { %1078 = vst.msk [vmem:[#allocation2 + $0x40] sm:$0xff] %vm556_vm5, %v952_v9  ;;  %1110 = vst.msk [vmem:[#allocation3 + $0x40] sm:$0xff] %vm556_vm5, %v952_v9  ;;  %v11098_v12 = vpop.f32.mrb[10].mxu1  ;;  %v967_v13 = vadd.f32 %v11074_v11, %v13426_v34  ;;  %v961_v15 = vpop.f32.mrb[11].mxu0 }
 0x106   : > { %1094 = vst.msk [vmem:[#allocation2 + $0xc0] sm:$0xff] %vm556_vm5, %v1032_v10  ;;  %1126 = vst.msk [vmem:[#allocation3 + $0xc0] sm:$0xff] %vm556_vm5, %v1032_v10  ;;  %v1047_v14 = vadd.f32 %v11098_v12, %v13426_v34  ;;  %v1041_v16 = vpop.f32.mrb[11].mxu1  ;;  %v962_v17 = vadd.f32 %v13426_v34, %v961_v15 }
 0x107   : > { %v1042_v18 = vadd.f32 %v13426_v34, %v1041_v16  ;;  %1081 = vst.msk [vmem:[#allocation2 + $0x58] sm:$0xff] %vm556_vm5, %v967_v13  ;;  %1113 = vst.msk [vmem:[#allocation3 + $0x58] sm:$0xff] %vm556_vm5, %v967_v13 }
 0x108   : > { %1097 = vst.msk [vmem:[#allocation2 + $0xd8] sm:$0xff] %vm556_vm5, %v1047_v14  ;;  %1129 = vst.msk [vmem:[#allocation3 + $0xd8] sm:$0xff] %vm556_vm5, %v1047_v14  ;;  %v11077_v19 = vpop.f32.mrb[12].mxu0 }
 0x109   : > { %1080 = vst.msk [vmem:[#allocation2 + $0x50] sm:$0xff] %vm556_vm5, %v962_v17  ;;  %1112 = vst.msk [vmem:[#allocation3 + $0x50] sm:$0xff] %vm556_vm5, %v962_v17  ;;  %v11101_v20 = vpop.f32.mrb[12].mxu1  ;;  %v977_v21 = vadd.f32 %v11077_v19, %v13426_v34  ;;  %v971_v23 = vpop.f32.mrb[13].mxu0 }
 0x10a   : > { %1096 = vst.msk [vmem:[#allocation2 + $0xd0] sm:$0xff] %vm556_vm5, %v1042_v18  ;;  %1128 = vst.msk [vmem:[#allocation3 + $0xd0] sm:$0xff] %vm556_vm5, %v1042_v18  ;;  %v1057_v22 = vadd.f32 %v11101_v20, %v13426_v34  ;;  %v1051_v24 = vpop.f32.mrb[13].mxu1  ;;  %v972_v25 = vadd.f32 %v13426_v34, %v971_v23 }
 0x10b   : > { %v1052_v26 = vadd.f32 %v13426_v34, %v1051_v24  ;;  %1083 = vst.msk [vmem:[#allocation2 + $0x68] sm:$0xff] %vm556_vm5, %v977_v21  ;;  %1115 = vst.msk [vmem:[#allocation3 + $0x68] sm:$0xff] %vm556_vm5, %v977_v21 }
 0x10c   : > { %1099 = vst.msk [vmem:[#allocation2 + $0xe8] sm:$0xff] %vm556_vm5, %v1057_v22  ;;  %1131 = vst.msk [vmem:[#allocation3 + $0xe8] sm:$0xff] %vm556_vm5, %v1057_v22  ;;  %v11080_v27 = vpop.f32.mrb[14].mxu0 }
 0x10d   : > { %1082 = vst.msk [vmem:[#allocation2 + $0x60] sm:$0xff] %vm556_vm5, %v972_v25  ;;  %1114 = vst.msk [vmem:[#allocation3 + $0x60] sm:$0xff] %vm556_vm5, %v972_v25  ;;  %v11104_v28 = vpop.f32.mrb[14].mxu1  ;;  %v987_v29 = vadd.f32 %v11080_v27, %v13426_v34  ;;  %v981_v31 = vpop.f32.mrb[15].mxu0 }
 0x10e   : > { %1098 = vst.msk [vmem:[#allocation2 + $0xe0] sm:$0xff] %vm556_vm5, %v1052_v26  ;;  %1130 = vst.msk [vmem:[#allocation3 + $0xe0] sm:$0xff] %vm556_vm5, %v1052_v26  ;;  %v1067_v30 = vadd.f32 %v11104_v28, %v13426_v34  ;;  %v1061_v32 = vpop.f32.mrb[15].mxu1  ;;  %v982_v33 = vadd.f32 %v13426_v34, %v981_v31 }
 0x10f   : > { %v1062_v35 = vadd.f32 %v13426_v34, %v1061_v32  ;;  %1085 = vst.msk [vmem:[#allocation2 + $0x78] sm:$0xff] %vm556_vm5, %v987_v29  ;;  %1117 = vst.msk [vmem:[#allocation3 + $0x78] sm:$0xff] %vm556_vm5, %v987_v29 }
 0x110   : > { %1101 = vst.msk [vmem:[#allocation2 + $0xf8] sm:$0xff] %vm556_vm5, %v1067_v30  ;;  %1133 = vst.msk [vmem:[#allocation3 + $0xf8] sm:$0xff] %vm556_vm5, %v1067_v30 }
 0x111   : > { %1084 = vst.msk [vmem:[#allocation2 + $0x70] sm:$0xff] %vm556_vm5, %v982_v33  ;;  %1116 = vst.msk [vmem:[#allocation3 + $0x70] sm:$0xff] %vm556_vm5, %v982_v33 }
 0x112   : > { %1100 = vst.msk [vmem:[#allocation2 + $0xf0] sm:$0xff] %vm556_vm5, %v1062_v35  ;;  %1132 = vst.msk [vmem:[#allocation3 + $0xf0] sm:$0xff] %vm556_vm5, %v1062_v35 }
 0x113 PF: > { %v1232_v34 = vld [vmem:[%s13025_s28] sm:$0xff]  ;;  %vm1167_vm6 = vcmask 64512   ;;  %v9679_v37 = vld [vmem:[%s13025_s28 + $0x10] sm:$0xff]  ;;  %v1135_v40 = vld [vmem:[#allocation2 + $0x8] sm:$0xff]  ;;  %vm4691_vm7 = vcmask 130048   ;;  %s15891_s16 = scalar_lea.vmem %s15695_s4, %s13009_s15  ;;  %s15969_s14 = sld [smem:[#allocation45_spill]] }
 0x114   : > { %v1200_v36 = vld [vmem:[#allocation4 + $0x7] sm:$0xff]  ;;  %11155 = vmatprep.subr.mxu0 %v1232_v34  ;;  %v1201_v38 = vld [vmem:[#allocation4 + $0xf] sm:$0xff]  ;;  %1169 = vst.msk [vmem:[#allocation4 + $0x30] sm:$0xff] %vm1167_vm6, %v1135_v40  ;;  %v1137_v42 = vld [vmem:[#allocation2 + $0x18] sm:$0xff]  ;;  %p10282_p8 = scmp.ne.s32.totalorder %s12886_s25, 2 }
 0x115   : > { %11157 = vmatprep.mubr.msk.f32.mxu0 %vm1167_vm6, %v1200_v36  ;;  %v1134_v39 = vld [vmem:[#allocation2] sm:$0xff]  ;;  %11156 = vmatpush3.msra.mxu0 %v1232_v34  ;;  %v1136_v41 = vld [vmem:[#allocation2 + $0x10] sm:$0xff]  ;;  %1171 = vst.msk [vmem:[#allocation4 + $0x50] sm:$0xff] %vm1167_vm6, %v1137_v42  ;;  %v1139_v44 = vld [vmem:[#allocation2 + $0x28] sm:$0xff]  ;;  %s15970_s20 = sld [smem:[#allocation46_spill]] (!%p10282_p8)  ;;  %s15971_s12 = sld [smem:[#allocation47_spill]] (!%p10282_p8) }
 0x116   : > { %1168 = vst.msk [vmem:[#allocation4 + $0x28] sm:$0xff] %vm1167_vm6, %v1134_v39  ;;  %v1138_v43 = vld [vmem:[#allocation2 + $0x20] sm:$0xff]  ;;  %11205 = vmatprep.subr.mxu0 %v9679_v37  ;;  %11158 = vmatmul.mubr.msk.f32.vlgmr.msra.gmra.mrb[0].mxu0 %vm1167_vm6, %v1201_v38  ;;  %1170 = vst.msk [vmem:[#allocation4 + $0x48] sm:$0xff] %vm1167_vm6, %v1136_v41  ;;  %v1140_v45 = vld [vmem:[#allocation2 + $0x30] sm:$0xff] }
 0x117   : > { %1172 = vst.msk [vmem:[#allocation4 + $0x68] sm:$0xff] %vm1167_vm6, %v1138_v43  ;;  %v1141_v46 = vld [vmem:[#allocation2 + $0x38] sm:$0xff]  ;;  %11206 = vmatpush3.msra.mxu0 %v9679_v37  ;;  %1173 = vst.msk [vmem:[#allocation4 + $0x70] sm:$0xff] %vm1167_vm6, %v1139_v44  ;;  %v1142_v47 = vld [vmem:[#allocation2 + $0x40] sm:$0xff] }
 0x118   : > { %1174 = vst.msk [vmem:[#allocation4 + $0x88] sm:$0xff] %vm1167_vm6, %v1140_v45  ;;  %1175 = vst.msk [vmem:[#allocation4 + $0x90] sm:$0xff] %vm1167_vm6, %v1141_v46  ;;  %v1143_v48 = vld [vmem:[#allocation2 + $0x48] sm:$0xff]  ;;  %v1144_v49 = vld [vmem:[#allocation2 + $0x50] sm:$0xff] }
 0x119   : > { %1176 = vst.msk [vmem:[#allocation4 + $0xa8] sm:$0xff] %vm1167_vm6, %v1142_v47  ;;  %1177 = vst.msk [vmem:[#allocation4 + $0xb0] sm:$0xff] %vm1167_vm6, %v1143_v48  ;;  %v1145_v50 = vld [vmem:[#allocation2 + $0x58] sm:$0xff]  ;;  %v1146_v51 = vld [vmem:[#allocation2 + $0x60] sm:$0xff] }
 0x11a   : > { %1178 = vst.msk [vmem:[#allocation4 + $0xc8] sm:$0xff] %vm1167_vm6, %v1144_v49  ;;  %v1147_v52 = vld [vmem:[#allocation2 + $0x68] sm:$0xff]  ;;  %1179 = vst.msk [vmem:[#allocation4 + $0xd0] sm:$0xff] %vm1167_vm6, %v1145_v50  ;;  %v1148_v53 = vld [vmem:[#allocation2 + $0x70] sm:$0xff] }
 0x11b   : > { %1180 = vst.msk [vmem:[#allocation4 + $0xe8] sm:$0xff] %vm1167_vm6, %v1146_v51  ;;  %1181 = vst.msk [vmem:[#allocation4 + $0xf0] sm:$0xff] %vm1167_vm6, %v1147_v52  ;;  %v1149_v54 = vld [vmem:[#allocation2 + $0x78] sm:$0xff]  ;;  %v1150_v55 = vld [vmem:[#allocation2 + $0x80] sm:$0xff] }
 0x11c   : > { %1182 = vst.msk [vmem:[#allocation4 + $0x108] sm:$0xff] %vm1167_vm6, %v1148_v53  ;;  %1183 = vst.msk [vmem:[#allocation4 + $0x110] sm:$0xff] %vm1167_vm6, %v1149_v54  ;;  %v1151_v56 = vld [vmem:[#allocation2 + $0x88] sm:$0xff]  ;;  %v1152_v57 = vld [vmem:[#allocation2 + $0x90] sm:$0xff] }
 0x11d   : > { %1184 = vst.msk [vmem:[#allocation4 + $0x128] sm:$0xff] %vm1167_vm6, %v1150_v55  ;;  %v1153_v58 = vld [vmem:[#allocation2 + $0x98] sm:$0xff]  ;;  %1185 = vst.msk [vmem:[#allocation4 + $0x130] sm:$0xff] %vm1167_vm6, %v1151_v56  ;;  %v1154_v59 = vld [vmem:[#allocation2 + $0xa0] sm:$0xff] }
 0x11e   : > { %1186 = vst.msk [vmem:[#allocation4 + $0x148] sm:$0xff] %vm1167_vm6, %v1152_v57  ;;  %1187 = vst.msk [vmem:[#allocation4 + $0x150] sm:$0xff] %vm1167_vm6, %v1153_v58  ;;  %v1155_v60 = vld [vmem:[#allocation2 + $0xa8] sm:$0xff]  ;;  %v1156_v61 = vld [vmem:[#allocation2 + $0xb0] sm:$0xff] }
 0x11f   : > { %v13548_v62 = vld [vmem:[#allocation4 + $0x27] sm:$0xff]  ;;  %v13550_v63 = vld [vmem:[#allocation4 + $0x2f] sm:$0xff]  ;;  %1188 = vst.msk [vmem:[#allocation4 + $0x168] sm:$0xff] %vm1167_vm6, %v1154_v59  ;;  %1189 = vst.msk [vmem:[#allocation4 + $0x170] sm:$0xff] %vm1167_vm6, %v1155_v60 }
 0x120   : > { %1190 = vst.msk [vmem:[#allocation4 + $0x188] sm:$0xff] %vm1167_vm6, %v1156_v61  ;;  %v1157_v0 = vld [vmem:[#allocation2 + $0xb8] sm:$0xff]  ;;  %11160 = vmatprep.mubr.msk.f32.mxu0 %vm1167_vm6, %v13548_v62  ;;  %v13557_v1 = vld [vmem:[#allocation4 + $0x47] sm:$0xff]  ;;  %v13564_v2 = vld [vmem:[#allocation4 + $0x4f] sm:$0xff] }
 0x121   : > { %1191 = vst.msk [vmem:[#allocation4 + $0x190] sm:$0xff] %vm1167_vm6, %v1157_v0  ;;  %11161 = vmatmul.mubr.msk.f32.gmra.mrb[2].mxu0 %vm1167_vm6, %v13550_v63  ;;  %v13566_v3 = vld [vmem:[#allocation4 + $0x67] sm:$0xff]  ;;  %v13572_v4 = vld [vmem:[#allocation4 + $0x6f] sm:$0xff]  ;;  %v1161_v9 = vld [vmem:[#allocation2 + $0xd8] sm:$0xff] }
 0x122   : > { %11163 = vmatprep.mubr.msk.f32.mxu0 %vm1167_vm6, %v13557_v1  ;;  %v13574_v5 = vld [vmem:[#allocation4 + $0x87] sm:$0xff]  ;;  %v1160_v8 = vld [vmem:[#allocation2 + $0xd0] sm:$0xff]  ;;  %1195 = vst.msk [vmem:[#allocation4 + $0x1d0] sm:$0xff] %vm1167_vm6, %v1161_v9  ;;  %v9712_v12 = vld [vmem:[%s13025_s28 + $0x18] sm:$0xff] }
 0x123   : > { %v1158_v6 = vld [vmem:[#allocation2 + $0xc0] sm:$0xff]  ;;  %v1159_v7 = vld [vmem:[#allocation2 + $0xc8] sm:$0xff]  ;;  %1194 = vst.msk [vmem:[#allocation4 + $0x1c8] sm:$0xff] %vm1167_vm6, %v1160_v8  ;;  %11255 = vmatprep.subr.mxu0 %v9712_v12  ;;  %v1164_v33 = vld [vmem:[#allocation2 + $0xf0] sm:$0xff] }
 0x124   : > { %1192 = vst.msk [vmem:[#allocation4 + $0x1a8] sm:$0xff] %vm1167_vm6, %v1158_v6  ;;  %1193 = vst.msk [vmem:[#allocation4 + $0x1b0] sm:$0xff] %vm1167_vm6, %v1159_v7  ;;  %v1162_v10 = vld [vmem:[#allocation2 + $0xe0] sm:$0xff]  ;;  %v1163_v11 = vld [vmem:[#allocation2 + $0xe8] sm:$0xff] }
 0x125   : > { %11164 = vmatmul.mubr.msk.f32.gmra.mrb[4].mxu0 %vm1167_vm6, %v13564_v2  ;;  %1196 = vst.msk [vmem:[#allocation4 + $0x1e8] sm:$0xff] %vm1167_vm6, %v1162_v10  ;;  %v13586_v13 = vld [vmem:[#allocation4 + $0x8f] sm:$0xff]  ;;  %1197 = vst.msk [vmem:[#allocation4 + $0x1f0] sm:$0xff] %vm1167_vm6, %v1163_v11  ;;  %v13589_v14 = vld [vmem:[#allocation4 + $0xa7] sm:$0xff] }
 0x126   : > { %11166 = vmatprep.mubr.msk.f32.mxu0 %vm1167_vm6, %v13566_v3  ;;  %v13595_v15 = vld [vmem:[#allocation4 + $0xaf] sm:$0xff]  ;;  %v13597_v16 = vld [vmem:[#allocation4 + $0xc7] sm:$0xff]  ;;  %1198 = vst.msk [vmem:[#allocation4 + $0x208] sm:$0xff] %vm1167_vm6, %v1164_v33  ;;  %v1165_v35 = vld [vmem:[#allocation2 + $0xf8] sm:$0xff] }
 0x127   : > { %v13603_v17 = vld [vmem:[#allocation4 + $0xcf] sm:$0xff]  ;;  %v13605_v18 = vld [vmem:[#allocation4 + $0xe7] sm:$0xff]  ;;  %1199 = vst.msk [vmem:[#allocation4 + $0x210] sm:$0xff] %vm1167_vm6, %v1165_v35 }
 0x128   : > { %v13611_v19 = vld [vmem:[#allocation4 + $0xef] sm:$0xff]  ;;  %v13613_v20 = vld [vmem:[#allocation4 + $0x107] sm:$0xff] }
 0x129   : > { %11167 = vmatmul.mubr.msk.f32.gmra.mrb[6].mxu0 %vm1167_vm6, %v13572_v4  ;;  %v13619_v21 = vld [vmem:[#allocation4 + $0x10f] sm:$0xff]  ;;  %v13621_v22 = vld [vmem:[#allocation4 + $0x127] sm:$0xff] }
 0x12a   : > { %11169 = vmatprep.mubr.msk.f32.mxu0 %vm1167_vm6, %v13574_v5  ;;  %15825 = vst [vmem:[#allocation11_spill] sm:$0xff] %v13621_v22  ;;  %v13627_v23 = vld [vmem:[#allocation4 + $0x12f] sm:$0xff]  ;;  %v13629_v24 = vld [vmem:[#allocation4 + $0x147] sm:$0xff] }
 0x12b   : > { %15826 = vst [vmem:[#allocation12_spill] sm:$0xff] %v13627_v23  ;;  %15827 = vst [vmem:[#allocation13_spill] sm:$0xff] %v13629_v24  ;;  %v13635_v25 = vld [vmem:[#allocation4 + $0x14f] sm:$0xff]  ;;  %v13637_v26 = vld [vmem:[#allocation4 + $0x167] sm:$0xff] }
 0x12c   : > { %15828 = vst [vmem:[#allocation14_spill] sm:$0xff] %v13635_v25  ;;  %15829 = vst [vmem:[#allocation15_spill] sm:$0xff] %v13637_v26  ;;  %v13643_v27 = vld [vmem:[#allocation4 + $0x16f] sm:$0xff]  ;;  %v13645_v28 = vld [vmem:[#allocation4 + $0x187] sm:$0xff] }
 0x12d   : > { %11170 = vmatmul.mubr.msk.f32.gmra.mrb[8].mxu0 %vm1167_vm6, %v13586_v13  ;;  %15830 = vst [vmem:[#allocation16_spill] sm:$0xff] %v13643_v27  ;;  %15831 = vst [vmem:[#allocation17_spill] sm:$0xff] %v13645_v28  ;;  %v13651_v29 = vld [vmem:[#allocation4 + $0x18f] sm:$0xff]  ;;  %v13653_v30 = vld [vmem:[#allocation4 + $0x1a7] sm:$0xff] }
 0x12e   : > { %11172 = vmatprep.mubr.msk.f32.mxu0 %vm1167_vm6, %v13589_v14  ;;  %15832 = vst [vmem:[#allocation18_spill] sm:$0xff] %v13651_v29  ;;  %15833 = vst [vmem:[#allocation19_spill] sm:$0xff] %v13653_v30  ;;  %v13659_v31 = vld [vmem:[#allocation4 + $0x1af] sm:$0xff]  ;;  %v13661_v32 = vld [vmem:[#allocation4 + $0x1c7] sm:$0xff] }
 0x12f   : > { %15834 = vst [vmem:[#allocation20_spill] sm:$0xff] %v13659_v31  ;;  %15835 = vst [vmem:[#allocation21_spill] sm:$0xff] %v13661_v32  ;;  %v13669_v34 = vld [vmem:[#allocation4 + $0x1cf] sm:$0xff]  ;;  %v13671_v36 = vld [vmem:[#allocation4 + $0x1e7] sm:$0xff] }
 0x130   : > { %15836 = vst [vmem:[#allocation22_spill] sm:$0xff] %v13669_v34  ;;  %15837 = vst [vmem:[#allocation23_spill] sm:$0xff] %v13671_v36  ;;  %v13677_v37 = vld [vmem:[#allocation4 + $0x1ef] sm:$0xff]  ;;  %v13685_v41 = vld [vmem:[%s13025_s28 + $0x20] sm:$0xff] }
 0x131   : > { %11173 = vmatmul.mubr.msk.f32.gmra.mrb[10].mxu0 %vm1167_vm6, %v13595_v15  ;;  %15838 = vst [vmem:[#allocation24_spill] sm:$0xff] %v13677_v37  ;;  %v1909_v38 = vld [vmem:[#allocation4 + $0x9] sm:$0xff]  ;;  %v1910_v39 = vld [vmem:[#allocation4 + $0x11] sm:$0xff] }
 0x132   : > { %11175 = vmatprep.mubr.msk.f32.mxu0 %vm1167_vm6, %v13597_v16  ;;  %v13682_v40 = vld [vmem:[#allocation4 + $0x29] sm:$0xff]  ;;  %v13690_v42 = vld [vmem:[#allocation4 + $0x31] sm:$0xff] }
 0x133   : > { %v13692_v43 = vld [vmem:[#allocation4 + $0x49] sm:$0xff]  ;;  %v13699_v44 = vld [vmem:[#allocation4 + $0x51] sm:$0xff] }
 0x134   : > { %v13701_v45 = vld [vmem:[#allocation4 + $0x69] sm:$0xff]  ;;  %v13707_v46 = vld [vmem:[#allocation4 + $0x71] sm:$0xff] }
 0x135   : > { %11176 = vmatmul.mubr.msk.f32.gmra.mrb[12].mxu0 %vm1167_vm6, %v13603_v17  ;;  %v13709_v47 = vld [vmem:[#allocation4 + $0x89] sm:$0xff]  ;;  %v13715_v48 = vld [vmem:[#allocation4 + $0x91] sm:$0xff] }
 0x136   : > { %11178 = vmatprep.mubr.msk.f32.mxu0 %vm1167_vm6, %v13605_v18  ;;  %v13717_v49 = vld [vmem:[#allocation4 + $0xa9] sm:$0xff]  ;;  %v13723_v50 = vld [vmem:[#allocation4 + $0xb1] sm:$0xff] }
 0x137   : > { %v13725_v51 = vld [vmem:[#allocation4 + $0xc9] sm:$0xff]  ;;  %v13731_v52 = vld [vmem:[#allocation4 + $0xd1] sm:$0xff] }
 0x138   : > { %v13733_v53 = vld [vmem:[#allocation4 + $0xe9] sm:$0xff]  ;;  %v13739_v54 = vld [vmem:[#allocation4 + $0xf1] sm:$0xff] }
 0x139   : > { %11179 = vmatmul.mubr.msk.f32.gmra.mrb[14].mxu0 %vm1167_vm6, %v13611_v19  ;;  %v13741_v55 = vld [vmem:[#allocation4 + $0x109] sm:$0xff]  ;;  %v13747_v56 = vld [vmem:[#allocation4 + $0x111] sm:$0xff] }
 0x13a   : > { %11181 = vmatprep.mubr.msk.f32.mxu0 %vm1167_vm6, %v13613_v20  ;;  %v13749_v57 = vld [vmem:[#allocation4 + $0x129] sm:$0xff]  ;;  %v13755_v58 = vld [vmem:[#allocation4 + $0x131] sm:$0xff] }
 0x13b   : > { %v13757_v59 = vld [vmem:[#allocation4 + $0x149] sm:$0xff]  ;;  %v13763_v60 = vld [vmem:[#allocation4 + $0x151] sm:$0xff] }
 0x13c   : > { %v13765_v61 = vld [vmem:[#allocation4 + $0x169] sm:$0xff]  ;;  %v13771_v0 = vld [vmem:[#allocation4 + $0x171] sm:$0xff] }
 0x13d   : > { %11182 = vmatmul.mubr.msk.f32.gmra.mrb[16].mxu0 %vm1167_vm6, %v13619_v21  ;;  %v13773_v6 = vld [vmem:[#allocation4 + $0x189] sm:$0xff]  ;;  %v13779_v7 = vld [vmem:[#allocation4 + $0x191] sm:$0xff] }
 0x13e   : > { %11184 = vmatprep.mubr.msk.f32.mxu0 %vm1167_vm6, %v13621_v22  ;;  %v13781_v8 = vld [vmem:[#allocation4 + $0x1a9] sm:$0xff]  ;;  %v13787_v9 = vld [vmem:[#allocation4 + $0x1b1] sm:$0xff] }
 0x13f   : > { %15839 = vst [vmem:[#allocation25_spill] sm:$0xff] %v13787_v9  ;;  %v13789_v10 = vld [vmem:[#allocation4 + $0x1c9] sm:$0xff]  ;;  %v13795_v11 = vld [vmem:[#allocation4 + $0x1d1] sm:$0xff] }
 0x140   : > { %15840 = vst [vmem:[#allocation26_spill] sm:$0xff] %v13789_v10  ;;  %v13803_v33 = vld [vmem:[#allocation4 + $0x1f1] sm:$0xff]  ;;  %v9778_v35 = vld [vmem:[%s13025_s28 + $0x28] sm:$0xff] }
 0x141   : > { %11185 = vmatmul.mubr.msk.f32.gmra.mrb[18].mxu0 %vm1167_vm6, %v13627_v23 }
 0x142   : > { %11187 = vmatprep.mubr.msk.f32.mxu0 %vm1167_vm6, %v13629_v24 }
 0x145   : > { %11188 = vmatmul.mubr.msk.f32.gmra.mrb[20].mxu0 %vm1167_vm6, %v13635_v25 }
 0x146   : > { %11190 = vmatprep.mubr.msk.f32.mxu0 %vm1167_vm6, %v13637_v26 }
 0x149   : > { %11191 = vmatmul.mubr.msk.f32.gmra.mrb[22].mxu0 %vm1167_vm6, %v13643_v27 }
 0x14a   : > { %11193 = vmatprep.mubr.msk.f32.mxu0 %vm1167_vm6, %v13645_v28 }
 0x14d   : > { %11194 = vmatmul.mubr.msk.f32.gmra.mrb[24].mxu0 %vm1167_vm6, %v13651_v29 }
 0x14e   : > { %11196 = vmatprep.mubr.msk.f32.mxu0 %vm1167_vm6, %v13653_v30 }
 0x151   : > { %11197 = vmatmul.mubr.msk.f32.gmra.mrb[26].mxu0 %vm1167_vm6, %v13659_v31 }
 0x152   : > { %11199 = vmatprep.mubr.msk.f32.mxu0 %vm1167_vm6, %v13661_v32 }
 0x155   : > { %11200 = vmatmul.mubr.msk.f32.gmra.mrb[28].mxu0 %vm1167_vm6, %v13669_v34 }
 0x156   : > { %11202 = vmatprep.mubr.msk.f32.mxu0 %vm1167_vm6, %v13671_v36 }
 0x159   : > { %11203 = vmatmul.mubr.msk.f32.gmra.mrb[30].mxu0 %vm1167_vm6, %v13677_v37 }
 0x15a   : > { %11207 = vmatprep.mubr.msk.f32.mxu0 %vm1167_vm6, %v1909_v38  ;;  %v13875_v38 = vld [vmem:[#allocation4 + $0x28] sm:$0xff] }
 0x15d   : > { %11208 = vmatmul.mubr.msk.f32.vlgmr.msra.gmra.mrb[0].mxu0 %vm1167_vm6, %v1910_v39  ;;  %v13881_v39 = vld [vmem:[#allocation4 + $0x30] sm:$0xff] }
 0x15e   : > { %11256 = vmatpush3.msra.mxu0 %v9712_v12  ;;  %11210 = vmatprep.mubr.msk.f32.mxu0 %vm1167_vm6, %v13682_v40  ;;  %v13797_v12 = vld [vmem:[#allocation4 + $0x1e9] sm:$0xff] }
 0x15f   : > { %11305 = vmatprep.subr.mxu0 %v13685_v41  ;;  %15841 = vst [vmem:[#allocation27_spill] sm:$0xff] %v13797_v12 }
 0x161   : > { %11211 = vmatmul.mubr.msk.f32.gmra.mrb[2].mxu0 %vm1167_vm6, %v13690_v42 }
 0x162   : > { %11213 = vmatprep.mubr.msk.f32.mxu0 %vm1167_vm6, %v13692_v43 }
 0x165   : > { %11214 = vmatmul.mubr.msk.f32.gmra.mrb[4].mxu0 %vm1167_vm6, %v13699_v44 }
 0x166   : > { %11216 = vmatprep.mubr.msk.f32.mxu0 %vm1167_vm6, %v13701_v45 }
 0x169   : > { %11217 = vmatmul.mubr.msk.f32.gmra.mrb[6].mxu0 %vm1167_vm6, %v13707_v46 }
 0x16a   : > { %11219 = vmatprep.mubr.msk.f32.mxu0 %vm1167_vm6, %v13709_v47 }
 0x16d   : > { %11220 = vmatmul.mubr.msk.f32.gmra.mrb[8].mxu0 %vm1167_vm6, %v13715_v48 }
 0x16e   : > { %11222 = vmatprep.mubr.msk.f32.mxu0 %vm1167_vm6, %v13717_v49 }
 0x171   : > { %11223 = vmatmul.mubr.msk.f32.gmra.mrb[10].mxu0 %vm1167_vm6, %v13723_v50 }
 0x172   : > { %11225 = vmatprep.mubr.msk.f32.mxu0 %vm1167_vm6, %v13725_v51 }
 0x175   : > { %11226 = vmatmul.mubr.msk.f32.gmra.mrb[12].mxu0 %vm1167_vm6, %v13731_v52 }
 0x176   : > { %11228 = vmatprep.mubr.msk.f32.mxu0 %vm1167_vm6, %v13733_v53 }
 0x179   : > { %11229 = vmatmul.mubr.msk.f32.gmra.mrb[14].mxu0 %vm1167_vm6, %v13739_v54 }
 0x17a   : > { %11231 = vmatprep.mubr.msk.f32.mxu0 %vm1167_vm6, %v13741_v55 }
 0x17d   : > { %11232 = vmatmul.mubr.msk.f32.gmra.mrb[16].mxu0 %vm1167_vm6, %v13747_v56 }
 0x17e   : > { %11234 = vmatprep.mubr.msk.f32.mxu0 %vm1167_vm6, %v13749_v57 }
 0x181   : > { %11235 = vmatmul.mubr.msk.f32.gmra.mrb[18].mxu0 %vm1167_vm6, %v13755_v58 }
 0x182   : > { %11237 = vmatprep.mubr.msk.f32.mxu0 %vm1167_vm6, %v13757_v59 }
 0x185   : > { %11238 = vmatmul.mubr.msk.f32.gmra.mrb[20].mxu0 %vm1167_vm6, %v13763_v60 }
 0x186   : > { %11240 = vmatprep.mubr.msk.f32.mxu0 %vm1167_vm6, %v13765_v61 }
 0x189   : > { %11241 = vmatmul.mubr.msk.f32.gmra.mrb[22].mxu0 %vm1167_vm6, %v13771_v0 }
 0x18a   : > { %11243 = vmatprep.mubr.msk.f32.mxu0 %vm1167_vm6, %v13773_v6 }
 0x18d   : > { %11244 = vmatmul.mubr.msk.f32.gmra.mrb[24].mxu0 %vm1167_vm6, %v13779_v7 }
 0x18e   : > { %11246 = vmatprep.mubr.msk.f32.mxu0 %vm1167_vm6, %v13781_v8 }
 0x191   : > { %11247 = vmatmul.mubr.msk.f32.gmra.mrb[26].mxu0 %vm1167_vm6, %v13787_v9 }
 0x192   : > { %11249 = vmatprep.mubr.msk.f32.mxu0 %vm1167_vm6, %v13789_v10 }
 0x195   : > { %11250 = vmatmul.mubr.msk.f32.gmra.mrb[28].mxu0 %vm1167_vm6, %v13795_v11 }
 0x196   : > { %11252 = vmatprep.mubr.msk.f32.mxu0 %vm1167_vm6, %v13797_v12 }
 0x199   : > { %11253 = vmatmul.mubr.msk.f32.gmra.mrb[30].mxu0 %vm1167_vm6, %v13803_v33 }
 0x19a   : > { %11257 = vmatprep.mubr.msk.f32.mxu0 %vm1167_vm6, %v13548_v62  ;;  %v13867_v62 = vld [vmem:[#allocation4 + $0x207] sm:$0xff] }
 0x19b   : > { %15842 = vst [vmem:[#allocation28_spill] sm:$0xff] %v13867_v62 }
 0x19d   : > { %11258 = vmatmul.mubr.msk.f32.vlgmr.msra.gmra.mrb[0].mxu0 %vm1167_vm6, %v13550_v63  ;;  %v13873_v63 = vld [vmem:[#allocation4 + $0x20f] sm:$0xff] }
 0x19e   : > { %11306 = vmatpush3.msra.mxu0 %v13685_v41  ;;  %11260 = vmatprep.mubr.msk.f32.mxu0 %vm1167_vm6, %v13557_v1  ;;  %15843 = vst [vmem:[#allocation29_spill] sm:$0xff] %v13873_v63  ;;  %v13883_v41 = vld [vmem:[#allocation4 + $0x48] sm:$0xff] }
 0x19f   : > { %11355 = vmatprep.subr.mxu0 %v9778_v35 }
 0x1a1   : > { %11261 = vmatmul.mubr.msk.f32.gmra.mrb[2].mxu0 %vm1167_vm6, %v13564_v2 }
 0x1a2   : > { %11263 = vmatprep.mubr.msk.f32.mxu0 %vm1167_vm6, %v13566_v3 }
 0x1a5   : > { %11264 = vmatmul.mubr.msk.f32.gmra.mrb[4].mxu0 %vm1167_vm6, %v13572_v4 }
 0x1a6   : > { %11266 = vmatprep.mubr.msk.f32.mxu0 %vm1167_vm6, %v13574_v5 }
 0x1a9   : > { %11267 = vmatmul.mubr.msk.f32.gmra.mrb[6].mxu0 %vm1167_vm6, %v13586_v13 }
 0x1aa   : > { %11269 = vmatprep.mubr.msk.f32.mxu0 %vm1167_vm6, %v13589_v14 }
 0x1ad   : > { %11270 = vmatmul.mubr.msk.f32.gmra.mrb[8].mxu0 %vm1167_vm6, %v13595_v15 }
 0x1ae   : > { %11272 = vmatprep.mubr.msk.f32.mxu0 %vm1167_vm6, %v13597_v16 }
 0x1b1   : > { %11273 = vmatmul.mubr.msk.f32.gmra.mrb[10].mxu0 %vm1167_vm6, %v13603_v17 }
 0x1b2   : > { %11275 = vmatprep.mubr.msk.f32.mxu0 %vm1167_vm6, %v13605_v18 }
 0x1b5   : > { %11276 = vmatmul.mubr.msk.f32.gmra.mrb[12].mxu0 %vm1167_vm6, %v13611_v19 }
 0x1b6   : > { %11278 = vmatprep.mubr.msk.f32.mxu0 %vm1167_vm6, %v13613_v20 }
 0x1b9   : > { %11279 = vmatmul.mubr.msk.f32.gmra.mrb[14].mxu0 %vm1167_vm6, %v13619_v21 }
 0x1ba   : > { %11281 = vmatprep.mubr.msk.f32.mxu0 %vm1167_vm6, %v13621_v22  ;;  %v13951_v22 = vld [vmem:[#allocation4 + $0x148] sm:$0xff] }
 0x1bb   : > { %15849 = vst [vmem:[#allocation35_spill] sm:$0xff] %v13951_v22 }
 0x1bd   : > { %11282 = vmatmul.mubr.msk.f32.gmra.mrb[16].mxu0 %vm1167_vm6, %v13627_v23  ;;  %v13949_v23 = vld [vmem:[#allocation4 + $0x130] sm:$0xff] }
 0x1be   : > { %11284 = vmatprep.mubr.msk.f32.mxu0 %vm1167_vm6, %v13629_v24  ;;  %v13943_v24 = vld [vmem:[#allocation4 + $0x128] sm:$0xff]  ;;  %15848 = vst [vmem:[#allocation34_spill] sm:$0xff] %v13949_v23 }
 0x1bf   : > { %15847 = vst [vmem:[#allocation33_spill] sm:$0xff] %v13943_v24 }
 0x1c1   : > { %11285 = vmatmul.mubr.msk.f32.gmra.mrb[18].mxu0 %vm1167_vm6, %v13635_v25  ;;  %v13941_v25 = vld [vmem:[#allocation4 + $0x110] sm:$0xff] }
 0x1c2   : > { %11287 = vmatprep.mubr.msk.f32.mxu0 %vm1167_vm6, %v13637_v26  ;;  %v13935_v26 = vld [vmem:[#allocation4 + $0x108] sm:$0xff]  ;;  %15846 = vst [vmem:[#allocation32_spill] sm:$0xff] %v13941_v25 }
 0x1c3   : > { %15845 = vst [vmem:[#allocation31_spill] sm:$0xff] %v13935_v26 }
 0x1c5   : > { %11288 = vmatmul.mubr.msk.f32.gmra.mrb[20].mxu0 %vm1167_vm6, %v13643_v27  ;;  %v13933_v27 = vld [vmem:[#allocation4 + $0xf0] sm:$0xff] }
 0x1c6   : > { %11290 = vmatprep.mubr.msk.f32.mxu0 %vm1167_vm6, %v13645_v28  ;;  %v13927_v28 = vld [vmem:[#allocation4 + $0xe8] sm:$0xff]  ;;  %15844 = vst [vmem:[#allocation30_spill] sm:$0xff] %v13933_v27 }
 0x1c9   : > { %11291 = vmatmul.mubr.msk.f32.gmra.mrb[22].mxu0 %vm1167_vm6, %v13651_v29  ;;  %v13925_v29 = vld [vmem:[#allocation4 + $0xd0] sm:$0xff] }
 0x1ca   : > { %11293 = vmatprep.mubr.msk.f32.mxu0 %vm1167_vm6, %v13653_v30  ;;  %v13919_v30 = vld [vmem:[#allocation4 + $0xc8] sm:$0xff] }
 0x1cd   : > { %11294 = vmatmul.mubr.msk.f32.gmra.mrb[24].mxu0 %vm1167_vm6, %v13659_v31  ;;  %v13917_v31 = vld [vmem:[#allocation4 + $0xb0] sm:$0xff] }
 0x1ce   : > { %11296 = vmatprep.mubr.msk.f32.mxu0 %vm1167_vm6, %v13661_v32  ;;  %v13911_v32 = vld [vmem:[#allocation4 + $0xa8] sm:$0xff] }
 0x1d1   : > { %11297 = vmatmul.mubr.msk.f32.gmra.mrb[26].mxu0 %vm1167_vm6, %v13669_v34  ;;  %v13903_v34 = vld [vmem:[#allocation4 + $0x88] sm:$0xff] }
 0x1d2   : > { %11299 = vmatprep.mubr.msk.f32.mxu0 %vm1167_vm6, %v13671_v36  ;;  %v13886_v36 = vld [vmem:[%s13025_s28 + $0x30] sm:$0xff] }
 0x1d5   : > { %11300 = vmatmul.mubr.msk.f32.gmra.mrb[28].mxu0 %vm1167_vm6, %v13677_v37  ;;  %v13894_v37 = vld [vmem:[#allocation4 + $0x68] sm:$0xff] }
 0x1d6   : > { %11302 = vmatprep.mubr.msk.f32.mxu0 %vm1167_vm6, %v13867_v62  ;;  %v13892_v62 = vld [vmem:[#allocation4 + $0x50] sm:$0xff] }
 0x1d9   : > { %11303 = vmatmul.mubr.msk.f32.gmra.mrb[30].mxu0 %vm1167_vm6, %v13873_v63  ;;  %v13901_v63 = vld [vmem:[#allocation4 + $0x70] sm:$0xff] }
 0x1da   : > { %11307 = vmatprep.mubr.msk.f32.mxu0 %vm1167_vm6, %v13875_v38 }
 0x1dd   : > { %11308 = vmatmul.mubr.msk.f32.vlgmr.msra.gmra.mrb[0].mxu0 %vm1167_vm6, %v13881_v39 }
 0x1de   : > { %11356 = vmatpush3.msra.mxu0 %v9778_v35  ;;  %11310 = vmatprep.mubr.msk.f32.mxu0 %vm1167_vm6, %v13883_v41  ;;  %v13909_v35 = vld [vmem:[#allocation4 + $0x90] sm:$0xff] }
 0x1df   : > { %11405 = vmatprep.subr.mxu0 %v13886_v36 }
 0x1e1   : > { %11311 = vmatmul.mubr.msk.f32.gmra.mrb[2].mxu0 %vm1167_vm6, %v13892_v62 }
 0x1e2   : > { %11313 = vmatprep.mubr.msk.f32.mxu0 %vm1167_vm6, %v13894_v37 }
 0x1e5   : > { %11314 = vmatmul.mubr.msk.f32.gmra.mrb[4].mxu0 %vm1167_vm6, %v13901_v63 }
 0x1e6   : > { %11316 = vmatprep.mubr.msk.f32.mxu0 %vm1167_vm6, %v13903_v34 }
 0x1e9   : > { %11317 = vmatmul.mubr.msk.f32.gmra.mrb[6].mxu0 %vm1167_vm6, %v13909_v35 }
 0x1ea   : > { %11319 = vmatprep.mubr.msk.f32.mxu0 %vm1167_vm6, %v13911_v32 }
 0x1ed   : > { %11320 = vmatmul.mubr.msk.f32.gmra.mrb[8].mxu0 %vm1167_vm6, %v13917_v31 }
 0x1ee   : > { %11322 = vmatprep.mubr.msk.f32.mxu0 %vm1167_vm6, %v13919_v30 }
 0x1f1   : > { %11323 = vmatmul.mubr.msk.f32.gmra.mrb[10].mxu0 %vm1167_vm6, %v13925_v29 }
 0x1f2   : > { %11325 = vmatprep.mubr.msk.f32.mxu0 %vm1167_vm6, %v13927_v28 }
 0x1f5   : > { %11326 = vmatmul.mubr.msk.f32.gmra.mrb[12].mxu0 %vm1167_vm6, %v13933_v27  ;;  %v13959_v27 = vld [vmem:[#allocation4 + $0x168] sm:$0xff] }
 0x1f6   : > { %11328 = vmatprep.mubr.msk.f32.mxu0 %vm1167_vm6, %v13935_v26  ;;  %v13957_v26 = vld [vmem:[#allocation4 + $0x150] sm:$0xff]  ;;  %15851 = vst [vmem:[#allocation37_spill] sm:$0xff] %v13959_v27 }
 0x1f7   : > { %15850 = vst [vmem:[#allocation36_spill] sm:$0xff] %v13957_v26 }
 0x1f9   : > { %11329 = vmatmul.mubr.msk.f32.gmra.mrb[14].mxu0 %vm1167_vm6, %v13941_v25  ;;  %v13967_v25 = vld [vmem:[#allocation4 + $0x188] sm:$0xff] }
 0x1fa   : > { %11331 = vmatprep.mubr.msk.f32.mxu0 %vm1167_vm6, %v13943_v24  ;;  %v13965_v24 = vld [vmem:[#allocation4 + $0x170] sm:$0xff]  ;;  %15853 = vst [vmem:[#allocation39_spill] sm:$0xff] %v13967_v25 }
 0x1fb   : > { %15852 = vst [vmem:[#allocation38_spill] sm:$0xff] %v13965_v24 }
 0x1fd   : > { %11332 = vmatmul.mubr.msk.f32.gmra.mrb[16].mxu0 %vm1167_vm6, %v13949_v23  ;;  %v13975_v23 = vld [vmem:[#allocation4 + $0x1a8] sm:$0xff] }
 0x1fe   : > { %11334 = vmatprep.mubr.msk.f32.mxu0 %vm1167_vm6, %v13951_v22  ;;  %v13973_v22 = vld [vmem:[#allocation4 + $0x190] sm:$0xff]  ;;  %15855 = vst [vmem:[#allocation41_spill] sm:$0xff] %v13975_v23 }
 0x1ff   : > { %15854 = vst [vmem:[#allocation40_spill] sm:$0xff] %v13973_v22 }
 0x201   : > { %11335 = vmatmul.mubr.msk.f32.gmra.mrb[18].mxu0 %vm1167_vm6, %v13957_v26  ;;  %v13983_v26 = vld [vmem:[#allocation4 + $0x1c8] sm:$0xff] }
 0x202   : > { %11337 = vmatprep.mubr.msk.f32.mxu0 %vm1167_vm6, %v13959_v27  ;;  %v13981_v27 = vld [vmem:[#allocation4 + $0x1b0] sm:$0xff]  ;;  %15856 = vst [vmem:[#allocation42_spill] sm:$0xff] %v13983_v26 }
 0x205   : > { %11338 = vmatmul.mubr.msk.f32.gmra.mrb[20].mxu0 %vm1167_vm6, %v13965_v24  ;;  %v13991_v24 = vld [vmem:[#allocation4 + $0x1e8] sm:$0xff] }
 0x206   : > { %11340 = vmatprep.mubr.msk.f32.mxu0 %vm1167_vm6, %v13967_v25  ;;  %v13989_v25 = vld [vmem:[#allocation4 + $0x1d0] sm:$0xff] }
 0x207   : > { %15857 = vst [vmem:[#allocation43_spill] sm:$0xff] %v13989_v25 }
 0x209   : > { %11341 = vmatmul.mubr.msk.f32.gmra.mrb[22].mxu0 %vm1167_vm6, %v13973_v22  ;;  %v13999_v22 = vld [vmem:[#allocation4 + $0x208] sm:$0xff] }
 0x20a   : > { %11343 = vmatprep.mubr.msk.f32.mxu0 %vm1167_vm6, %v13975_v23  ;;  %v13997_v23 = vld [vmem:[#allocation4 + $0x1f0] sm:$0xff] }
 0x20d   : > { %11344 = vmatmul.mubr.msk.f32.gmra.mrb[24].mxu0 %vm1167_vm6, %v13981_v27 }
 0x20e   : > { %11346 = vmatprep.mubr.msk.f32.mxu0 %vm1167_vm6, %v13983_v26  ;;  %v14005_v26 = vld [vmem:[#allocation4 + $0x210] sm:$0xff] }
 0x211   : > { %11347 = vmatmul.mubr.msk.f32.gmra.mrb[26].mxu0 %vm1167_vm6, %v13989_v25  ;;  %v9844_v25 = vld [vmem:[%s13025_s28 + $0x38] sm:$0xff] }
 0x212   : > { %11349 = vmatprep.mubr.msk.f32.mxu0 %vm1167_vm6, %v13991_v24 }
 0x215   : > { %11350 = vmatmul.mubr.msk.f32.gmra.mrb[28].mxu0 %vm1167_vm6, %v13997_v23 }
 0x216   : > { %11352 = vmatprep.mubr.msk.f32.mxu0 %vm1167_vm6, %v13999_v22 }
 0x219   : > { %11353 = vmatmul.mubr.msk.f32.gmra.mrb[30].mxu0 %vm1167_vm6, %v14005_v26 }
 0x21a   : > { %11357 = vmatprep.mubr.msk.f32.mxu0 %vm1167_vm6, %v13682_v40  ;;  %v14075_v40 = vld [vmem:[#allocation4 + $0x211] sm:$0xff] }
 0x21d   : > { %11358 = vmatmul.mubr.msk.f32.vlgmr.msra.gmra.mrb[0].mxu0 %vm1167_vm6, %v13690_v42  ;;  %v9614_v42 = vld [vmem:[%s13025_s28 + $0x8] sm:$0xff] }
 0x21e   : > { %11406 = vmatpush3.msra.mxu0 %v13886_v36  ;;  %11360 = vmatprep.mubr.msk.f32.mxu0 %vm1167_vm6, %v13692_v43  ;;  %v14069_v36 = vld [vmem:[#allocation4 + $0x209] sm:$0xff] }
 0x21f   : > { %11455 = vmatprep.subr.mxu0 %v9844_v25  ;;  %11105 = vmatprep.subr.mxu1 %v9614_v42 }
 0x220   : > { %11106 = vmatpush3.msra.mxu1 %v9614_v42  ;;  %v15877_v42 = vld [vmem:[#allocation39_spill] sm:$0xff] }
 0x221   : > { %11361 = vmatmul.mubr.msk.f32.gmra.mrb[2].mxu0 %vm1167_vm6, %v13699_v44 }
 0x222   : > { %11363 = vmatprep.mubr.msk.f32.mxu0 %vm1167_vm6, %v13701_v45 }
 0x225   : > { %11364 = vmatmul.mubr.msk.f32.gmra.mrb[4].mxu0 %vm1167_vm6, %v13707_v46 }
 0x226   : > { %11366 = vmatprep.mubr.msk.f32.mxu0 %vm1167_vm6, %v13709_v47 }
 0x229   : > { %11367 = vmatmul.mubr.msk.f32.gmra.mrb[6].mxu0 %vm1167_vm6, %v13715_v48 }
 0x22a   : > { %11369 = vmatprep.mubr.msk.f32.mxu0 %vm1167_vm6, %v13717_v49 }
 0x22d   : > { %11370 = vmatmul.mubr.msk.f32.gmra.mrb[8].mxu0 %vm1167_vm6, %v13723_v50 }
 0x22e   : > { %11372 = vmatprep.mubr.msk.f32.mxu0 %vm1167_vm6, %v13725_v51 }
 0x231   : > { %11373 = vmatmul.mubr.msk.f32.gmra.mrb[10].mxu0 %vm1167_vm6, %v13731_v52 }
 0x232   : > { %11375 = vmatprep.mubr.msk.f32.mxu0 %vm1167_vm6, %v13733_v53 }
 0x235   : > { %11376 = vmatmul.mubr.msk.f32.gmra.mrb[12].mxu0 %vm1167_vm6, %v13739_v54 }
 0x236   : > { %11378 = vmatprep.mubr.msk.f32.mxu0 %vm1167_vm6, %v13741_v55 }
 0x239   : > { %11379 = vmatmul.mubr.msk.f32.gmra.mrb[14].mxu0 %vm1167_vm6, %v13747_v56 }
 0x23a   : > { %11381 = vmatprep.mubr.msk.f32.mxu0 %vm1167_vm6, %v13749_v57 }
 0x23d   : > { %11382 = vmatmul.mubr.msk.f32.gmra.mrb[16].mxu0 %vm1167_vm6, %v13755_v58 }
 0x23e   : > { %11384 = vmatprep.mubr.msk.f32.mxu0 %vm1167_vm6, %v13757_v59 }
 0x241   : > { %11385 = vmatmul.mubr.msk.f32.gmra.mrb[18].mxu0 %vm1167_vm6, %v13763_v60 }
 0x242   : > { %11387 = vmatprep.mubr.msk.f32.mxu0 %vm1167_vm6, %v13765_v61 }
 0x245   : > { %11388 = vmatmul.mubr.msk.f32.gmra.mrb[20].mxu0 %vm1167_vm6, %v13771_v0 }
 0x246   : > { %11390 = vmatprep.mubr.msk.f32.mxu0 %vm1167_vm6, %v13773_v6 }
 0x249   : > { %11391 = vmatmul.mubr.msk.f32.gmra.mrb[22].mxu0 %vm1167_vm6, %v13779_v7 }
 0x24a   : > { %11393 = vmatprep.mubr.msk.f32.mxu0 %vm1167_vm6, %v13781_v8 }
 0x24d   : > { %11394 = vmatmul.mubr.msk.f32.gmra.mrb[24].mxu0 %vm1167_vm6, %v13787_v9  ;;  %v1234_v9 = vld [vmem:[#allocation4 + $0x10] sm:$0xff] }
 0x24e   : > { %11396 = vmatprep.mubr.msk.f32.mxu0 %vm1167_vm6, %v13789_v10  ;;  %v1233_v10 = vld [vmem:[#allocation4 + $0x8] sm:$0xff] }
 0x24f   : > { %11107 = vmatprep.mubr.msk.f32.mxu1 %vm1167_vm6, %v1233_v10  ;;  %v15874_v10 = vld [vmem:[#allocation19_spill] sm:$0xff] }
 0x250   : > { %11108 = vmatmul.mubr.msk.f32.vlgmr.msra.gmra.mrb[0].mxu1 %vm1167_vm6, %v1234_v9  ;;  %v15873_v9 = vld [vmem:[#allocation37_spill] sm:$0xff] }
 0x251   : > { %11397 = vmatmul.mubr.msk.f32.gmra.mrb[26].mxu0 %vm1167_vm6, %v13795_v11  ;;  %11110 = vmatprep.mubr.msk.f32.mxu1 %vm1167_vm6, %v13875_v38  ;;  %v15875_v38 = vld [vmem:[#allocation38_spill] sm:$0xff] }
 0x252   : > { %11399 = vmatprep.mubr.msk.f32.mxu0 %vm1167_vm6, %v13797_v12  ;;  %v14084_v12 = vld [vmem:[%s13025_s28 + $0x40] sm:$0xff] }
 0x254   : > { %11111 = vmatmul.mubr.msk.f32.gmra.mrb[2].mxu1 %vm1167_vm6, %v13881_v39  ;;  %v15876_v39 = vld [vmem:[#allocation20_spill] sm:$0xff] }
 0x255   : > { %11400 = vmatmul.mubr.msk.f32.gmra.mrb[28].mxu0 %vm1167_vm6, %v13803_v33  ;;  %11113 = vmatprep.mubr.msk.f32.mxu1 %vm1167_vm6, %v13883_v41 }
 0x256   : > { %11402 = vmatprep.mubr.msk.f32.mxu0 %vm1167_vm6, %v14069_v36 }
 0x258   : > { %11114 = vmatmul.mubr.msk.f32.gmra.mrb[4].mxu1 %vm1167_vm6, %v13892_v62 }
 0x259   : > { %11403 = vmatmul.mubr.msk.f32.gmra.mrb[30].mxu0 %vm1167_vm6, %v14075_v40  ;;  %11116 = vmatprep.mubr.msk.f32.mxu1 %vm1167_vm6, %v13894_v37 }
 0x25a   : > { %11407 = vmatprep.mubr.msk.f32.mxu0 %vm1167_vm6, %v13557_v1  ;;  %v15858_v1 = vld [vmem:[#allocation11_spill] sm:$0xff] }
 0x25c   : > { %11117 = vmatmul.mubr.msk.f32.gmra.mrb[6].mxu1 %vm1167_vm6, %v13901_v63 }
 0x25d   : > { %11408 = vmatmul.mubr.msk.f32.vlgmr.msra.gmra.mrb[0].mxu0 %vm1167_vm6, %v13564_v2  ;;  %11119 = vmatprep.mubr.msk.f32.mxu1 %vm1167_vm6, %v13903_v34  ;;  %v15859_v2 = vld [vmem:[#allocation30_spill] sm:$0xff] }
 0x25e   : > { %11456 = vmatpush3.msra.mxu0 %v9844_v25  ;;  %11410 = vmatprep.mubr.msk.f32.mxu0 %vm1167_vm6, %v13566_v3  ;;  %v15860_v3 = vld [vmem:[#allocation12_spill] sm:$0xff]  ;;  %v15872_v25 = vld [vmem:[#allocation18_spill] sm:$0xff] }
 0x25f   : > { %11505 = vmatprep.subr.mxu0 %v14084_v12 }
 0x260   : > { %11120 = vmatmul.mubr.msk.f32.gmra.mrb[8].mxu1 %vm1167_vm6, %v13909_v35 }
 0x261   : > { %11411 = vmatmul.mubr.msk.f32.gmra.mrb[2].mxu0 %vm1167_vm6, %v13572_v4  ;;  %11122 = vmatprep.mubr.msk.f32.mxu1 %vm1167_vm6, %v13911_v32  ;;  %v15861_v4 = vld [vmem:[#allocation31_spill] sm:$0xff] }
 0x262   : > { %11413 = vmatprep.mubr.msk.f32.mxu0 %vm1167_vm6, %v13574_v5  ;;  %v15862_v5 = vld [vmem:[#allocation13_spill] sm:$0xff] }
 0x264   : > { %11123 = vmatmul.mubr.msk.f32.gmra.mrb[10].mxu1 %vm1167_vm6, %v13917_v31 }
 0x265   : > { %11414 = vmatmul.mubr.msk.f32.gmra.mrb[4].mxu0 %vm1167_vm6, %v13586_v13  ;;  %11125 = vmatprep.mubr.msk.f32.mxu1 %vm1167_vm6, %v13919_v30  ;;  %v15863_v13 = vld [vmem:[#allocation32_spill] sm:$0xff] }
 0x266   : > { %11416 = vmatprep.mubr.msk.f32.mxu0 %vm1167_vm6, %v13589_v14  ;;  %v15864_v14 = vld [vmem:[#allocation14_spill] sm:$0xff] }
 0x268   : > { %11126 = vmatmul.mubr.msk.f32.gmra.mrb[12].mxu1 %vm1167_vm6, %v13925_v29 }
 0x269   : > { %11417 = vmatmul.mubr.msk.f32.gmra.mrb[6].mxu0 %vm1167_vm6, %v13595_v15  ;;  %11128 = vmatprep.mubr.msk.f32.mxu1 %vm1167_vm6, %v13927_v28  ;;  %v15865_v15 = vld [vmem:[#allocation33_spill] sm:$0xff] }
 0x26a   : > { %11419 = vmatprep.mubr.msk.f32.mxu0 %vm1167_vm6, %v13597_v16  ;;  %v15866_v16 = vld [vmem:[#allocation15_spill] sm:$0xff] }
 0x26c   : > { %11129 = vmatmul.mubr.msk.f32.gmra.mrb[14].mxu1 %vm1167_vm6, %v15859_v2 }
 0x26d   : > { %11420 = vmatmul.mubr.msk.f32.gmra.mrb[8].mxu0 %vm1167_vm6, %v13603_v17  ;;  %11131 = vmatprep.mubr.msk.f32.mxu1 %vm1167_vm6, %v15861_v4  ;;  %v15867_v17 = vld [vmem:[#allocation34_spill] sm:$0xff] }
 0x26e   : > { %11422 = vmatprep.mubr.msk.f32.mxu0 %vm1167_vm6, %v13605_v18  ;;  %v15868_v18 = vld [vmem:[#allocation16_spill] sm:$0xff] }
 0x270   : > { %11132 = vmatmul.mubr.msk.f32.gmra.mrb[16].mxu1 %vm1167_vm6, %v15863_v13 }
 0x271   : > { %11423 = vmatmul.mubr.msk.f32.gmra.mrb[10].mxu0 %vm1167_vm6, %v13611_v19  ;;  %11134 = vmatprep.mubr.msk.f32.mxu1 %vm1167_vm6, %v15865_v15  ;;  %v15869_v19 = vld [vmem:[#allocation35_spill] sm:$0xff] }
 0x272   : > { %11425 = vmatprep.mubr.msk.f32.mxu0 %vm1167_vm6, %v13613_v20  ;;  %v15870_v20 = vld [vmem:[#allocation17_spill] sm:$0xff] }
 0x274   : > { %11135 = vmatmul.mubr.msk.f32.gmra.mrb[18].mxu1 %vm1167_vm6, %v15867_v17 }
 0x275   : > { %11426 = vmatmul.mubr.msk.f32.gmra.mrb[12].mxu0 %vm1167_vm6, %v13619_v21  ;;  %11137 = vmatprep.mubr.msk.f32.mxu1 %vm1167_vm6, %v15869_v19  ;;  %v15871_v21 = vld [vmem:[#allocation36_spill] sm:$0xff] }
 0x276   : > { %11428 = vmatprep.mubr.msk.f32.mxu0 %vm1167_vm6, %v15858_v1  ;;  %v15878_v1 = vld [vmem:[#allocation21_spill] sm:$0xff] }
 0x278   : > { %11138 = vmatmul.mubr.msk.f32.gmra.mrb[20].mxu1 %vm1167_vm6, %v15871_v21 }
 0x279   : > { %11429 = vmatmul.mubr.msk.f32.gmra.mrb[14].mxu0 %vm1167_vm6, %v15860_v3  ;;  %11140 = vmatprep.mubr.msk.f32.mxu1 %vm1167_vm6, %v15873_v9  ;;  %v15879_v3 = vld [vmem:[#allocation40_spill] sm:$0xff] }
 0x27a   : > { %11431 = vmatprep.mubr.msk.f32.mxu0 %vm1167_vm6, %v15862_v5  ;;  %v15880_v5 = vld [vmem:[#allocation22_spill] sm:$0xff] }
 0x27c   : > { %11141 = vmatmul.mubr.msk.f32.gmra.mrb[22].mxu1 %vm1167_vm6, %v15875_v38 }
 0x27d   : > { %11432 = vmatmul.mubr.msk.f32.gmra.mrb[16].mxu0 %vm1167_vm6, %v15864_v14  ;;  %11143 = vmatprep.mubr.msk.f32.mxu1 %vm1167_vm6, %v15877_v42  ;;  %v15881_v14 = vld [vmem:[#allocation41_spill] sm:$0xff] }
 0x27e   : > { %11434 = vmatprep.mubr.msk.f32.mxu0 %vm1167_vm6, %v15866_v16  ;;  %v15882_v16 = vld [vmem:[#allocation23_spill] sm:$0xff] }
 0x280   : > { %11144 = vmatmul.mubr.msk.f32.gmra.mrb[24].mxu1 %vm1167_vm6, %v15879_v3 }
 0x281   : > { %11435 = vmatmul.mubr.msk.f32.gmra.mrb[18].mxu0 %vm1167_vm6, %v15868_v18  ;;  %11146 = vmatprep.mubr.msk.f32.mxu1 %vm1167_vm6, %v15881_v14  ;;  %v15883_v18 = vld [vmem:[#allocation24_spill] sm:$0xff] }
 0x282   : > { %11437 = vmatprep.mubr.msk.f32.mxu0 %vm1167_vm6, %v15870_v20  ;;  %v15884_v20 = vld [vmem:[#allocation42_spill] sm:$0xff] }
 0x284   : > { %11147 = vmatmul.mubr.msk.f32.gmra.mrb[26].mxu1 %vm1167_vm6, %v13981_v27 }
 0x285   : > { %11438 = vmatmul.mubr.msk.f32.gmra.mrb[20].mxu0 %vm1167_vm6, %v15872_v25  ;;  %11149 = vmatprep.mubr.msk.f32.mxu1 %vm1167_vm6, %v15884_v20  ;;  %v15885_v25 = vld [vmem:[#allocation28_spill] sm:$0xff] }
 0x286   : > { %11440 = vmatprep.mubr.msk.f32.mxu0 %vm1167_vm6, %v15874_v10  ;;  %v3488_v10 = vld [vmem:[#allocation4 + $0x227] sm:$0xff] }
 0x289   : > { %11441 = vmatmul.mubr.msk.f32.gmra.mrb[22].mxu0 %vm1167_vm6, %v15876_v39  ;;  %v15886_v39 = vld [vmem:[#allocation43_spill] sm:$0xff] }
 0x28a   : > { %11443 = vmatprep.mubr.msk.f32.mxu0 %vm1167_vm6, %v15878_v1  ;;  %11150 = vmatmul.mubr.msk.f32.gmra.mrb[28].mxu1 %vm1167_vm6, %v15886_v39  ;;  %v15887_v1 = vld [vmem:[#allocation29_spill] sm:$0xff] }
 0x28b   : > { %11152 = vmatprep.mubr.msk.f32.mxu1 %vm1167_vm6, %v13991_v24 }
 0x28d   : > { %11444 = vmatmul.mubr.msk.f32.gmra.mrb[24].mxu0 %vm1167_vm6, %v15880_v5  ;;  %v3489_v5 = vld [vmem:[#allocation4 + $0x22f] sm:$0xff] }
 0x28e   : > { %11446 = vmatprep.mubr.msk.f32.mxu0 %vm1167_vm6, %v15882_v16  ;;  %11153 = vmatmul.mubr.msk.f32.gmra.mrb[30].mxu1 %vm1167_vm6, %v13997_v23  ;;  %v9911_v16 = vld [vmem:[%s13034_s17 + $0x10] sm:$0xff] }
 0x291   : > { %11447 = vmatmul.mubr.msk.f32.gmra.mrb[26].mxu0 %vm1167_vm6, %v15883_v18  ;;  %v9912_v18 = vld [vmem:[%s13034_s17 + $0x18] sm:$0xff] }
 0x292   : > { %11449 = vmatprep.mubr.msk.f32.mxu0 %vm1167_vm6, %v15885_v25  ;;  %v12173_v25 = vpack.c.bf16 %v9912_v18, %v9911_v16 }
 0x294   : > { %12174 = vmatprep.subr.bf16.mxu1 %v12173_v25 }
 0x295   : > { %11450 = vmatmul.mubr.msk.f32.gmra.mrb[28].mxu0 %vm1167_vm6, %v15887_v1  ;;  %12176 = vmatpush3.bf16.msra.mxu1 %v12173_v25 }
 0x296   : > { %11452 = vmatprep.mubr.msk.f32.mxu0 %vm1167_vm6, %v3488_v10 }
 0x299   : > { %11453 = vmatmul.mubr.msk.f32.gmra.mrb[30].mxu0 %vm1167_vm6, %v3489_v5 }
 0x29a   : > { %11457 = vmatprep.mubr.msk.f32.mxu0 %vm1167_vm6, %v13883_v41 }
 0x29d   : > { %11458 = vmatmul.mubr.msk.f32.vlgmr.msra.gmra.mrb[0].mxu0 %vm1167_vm6, %v13892_v62 }
 0x29e   : > { %11506 = vmatpush3.msra.mxu0 %v14084_v12  ;;  %11460 = vmatprep.mubr.msk.f32.mxu0 %vm1167_vm6, %v13894_v37 }
 0x2a1   : > { %11461 = vmatmul.mubr.msk.f32.gmra.mrb[2].mxu0 %vm1167_vm6, %v13901_v63 }
 0x2a2   : > { %11463 = vmatprep.mubr.msk.f32.mxu0 %vm1167_vm6, %v13903_v34 }
 0x2a5   : > { %11464 = vmatmul.mubr.msk.f32.gmra.mrb[4].mxu0 %vm1167_vm6, %v13909_v35 }
 0x2a6   : > { %11466 = vmatprep.mubr.msk.f32.mxu0 %vm1167_vm6, %v13911_v32 }
 0x2a9   : > { %11467 = vmatmul.mubr.msk.f32.gmra.mrb[6].mxu0 %vm1167_vm6, %v13917_v31 }
 0x2aa   : > { %11469 = vmatprep.mubr.msk.f32.mxu0 %vm1167_vm6, %v13919_v30 }
 0x2ad   : > { %11470 = vmatmul.mubr.msk.f32.gmra.mrb[8].mxu0 %vm1167_vm6, %v13925_v29  ;;  %v4263_v29 = vld [vmem:[#allocation4 + $0x231] sm:$0xff] }
 0x2ae   : > { %11472 = vmatprep.mubr.msk.f32.mxu0 %vm1167_vm6, %v13927_v28  ;;  %v3875_v28 = vld [vmem:[#allocation4 + $0x228] sm:$0xff] }
 0x2b1   : > { %11473 = vmatmul.mubr.msk.f32.gmra.mrb[10].mxu0 %vm1167_vm6, %v15859_v2  ;;  %v9977_v2 = vld [vmem:[%s13034_s17 + $0x20] sm:$0xff] }
 0x2b2   : > { %11475 = vmatprep.mubr.msk.f32.mxu0 %vm1167_vm6, %v15861_v4  ;;  %v9978_v4 = vld [vmem:[%s13034_s17 + $0x28] sm:$0xff] }
 0x2b5   : > { %11476 = vmatmul.mubr.msk.f32.gmra.mrb[12].mxu0 %vm1167_vm6, %v15863_v13  ;;  %v14395_v13 = vpack.c.bf16 %v9978_v4, %v9977_v2 }
 0x2b6   : > { %11478 = vmatprep.mubr.msk.f32.mxu0 %vm1167_vm6, %v15865_v15 }
 0x2b9   : > { %11479 = vmatmul.mubr.msk.f32.gmra.mrb[14].mxu0 %vm1167_vm6, %v15867_v17  ;;  %v14403_v17 = vld [vmem:[%s15891_s16] ss:$0 sm:$0xff] }
 0x2ba   : > { %11481 = vmatprep.mubr.msk.f32.mxu0 %vm1167_vm6, %v15869_v19 }
 0x2bd   : > { %11482 = vmatmul.mubr.msk.f32.gmra.mrb[16].mxu0 %vm1167_vm6, %v15871_v21 }
 0x2be   : > { %11484 = vmatprep.mubr.msk.f32.mxu0 %vm1167_vm6, %v15873_v9 }
 0x2c1   : > { %11485 = vmatmul.mubr.msk.f32.gmra.mrb[18].mxu0 %vm1167_vm6, %v15875_v38 }
 0x2c2   : > { %11487 = vmatprep.mubr.msk.f32.mxu0 %vm1167_vm6, %v15877_v42 }
 0x2c5   : > { %11488 = vmatmul.mubr.msk.f32.gmra.mrb[20].mxu0 %vm1167_vm6, %v15879_v3 }
 0x2c6   : > { %11490 = vmatprep.mubr.msk.f32.mxu0 %vm1167_vm6, %v15881_v14 }
 0x2c9   : > { %11491 = vmatmul.mubr.msk.f32.gmra.mrb[22].mxu0 %vm1167_vm6, %v13981_v27  ;;  %v3876_v27 = vld [vmem:[#allocation4 + $0x230] sm:$0xff] }
 0x2ca   : > { %11493 = vmatprep.mubr.msk.f32.mxu0 %vm1167_vm6, %v15884_v20 }
 0x2cd   : > { %11494 = vmatmul.mubr.msk.f32.gmra.mrb[24].mxu0 %vm1167_vm6, %v15886_v39 }
 0x2ce   : > { %11496 = vmatprep.mubr.msk.f32.mxu0 %vm1167_vm6, %v13991_v24  ;;  %v15890_v24 = vld [vmem:[#allocation27_spill] sm:$0xff] }
 0x2d1   : > { %11497 = vmatmul.mubr.msk.f32.gmra.mrb[26].mxu0 %vm1167_vm6, %v13997_v23  ;;  %v15889_v23 = vld [vmem:[#allocation26_spill] sm:$0xff] }
 0x2d2   : > { %11499 = vmatprep.mubr.msk.f32.mxu0 %vm1167_vm6, %v13999_v22  ;;  %v15888_v22 = vld [vmem:[#allocation25_spill] sm:$0xff] }
 0x2d5   : > { %11500 = vmatmul.mubr.msk.f32.gmra.mrb[28].mxu0 %vm1167_vm6, %v14005_v26  ;;  %v4262_v26 = vld [vmem:[#allocation4 + $0x229] sm:$0xff] }
 0x2d6   : > { %11502 = vmatprep.mubr.msk.f32.mxu0 %vm1167_vm6, %v3875_v28 }
 0x2d9   : > { %11503 = vmatmul.mubr.msk.f32.gmra.mrb[30].mxu0 %vm1167_vm6, %v3876_v27 }
 0x2da   : > { %11507 = vmatprep.mubr.msk.f32.mxu0 %vm1167_vm6, %v13692_v43 }
 0x2dd   : > { %11508 = vmatmul.mubr.msk.f32.vlgmr.msra.gmra.mrb[0].mxu0 %vm1167_vm6, %v13699_v44 }
 0x2de   : > { %11510 = vmatprep.mubr.msk.f32.mxu0 %vm1167_vm6, %v13701_v45  ;;  %v4758_v45 = vld [vmem:[#allocation5 + $0x8] sm:$0xff] }
 0x2df   : > { %11559 = vmatprep.mubr.msk.f32.mxu1 %vm4691_vm7, %v4758_v45 }
 0x2e1   : > { %11511 = vmatmul.mubr.msk.f32.gmra.mrb[2].mxu0 %vm1167_vm6, %v13707_v46 }
 0x2e2   : > { %11513 = vmatprep.mubr.msk.f32.mxu0 %vm1167_vm6, %v13709_v47  ;;  %v4759_v47 = vld [vmem:[#allocation5 + $0x10] sm:$0xff] }
 0x2e3   : > { %11560 = vmatmul.mubr.msk.f32.vlgmr.msra.gmra.mrb[32].mxu1 %vm4691_vm7, %v4759_v47 }
 0x2e5   : > { %11514 = vmatmul.mubr.msk.f32.gmra.mrb[4].mxu0 %vm1167_vm6, %v13715_v48 }
 0x2e6   : > { %11516 = vmatprep.mubr.msk.f32.mxu0 %vm1167_vm6, %v13717_v49 }
 0x2e9   : > { %11517 = vmatmul.mubr.msk.f32.gmra.mrb[6].mxu0 %vm1167_vm6, %v13723_v50  ;;  %v4756_v50 = vld [vmem:[%s13034_s17] sm:$0xff] }
 0x2ea   : > { %11519 = vmatprep.mubr.msk.f32.mxu0 %vm1167_vm6, %v13725_v51  ;;  %v4757_v51 = vld [vmem:[%s13034_s17 + $0x8] sm:$0xff] }
 0x2ed   : > { %11520 = vmatmul.mubr.msk.f32.gmra.mrb[8].mxu0 %vm1167_vm6, %v13731_v52 }
 0x2ee   : > { %11522 = vmatprep.mubr.msk.f32.mxu0 %vm1167_vm6, %v13733_v53  ;;  %v12177_v53 = vpack.c.bf16 %v4757_v51, %v4756_v50 }
 0x2f0   : > { %12178 = vmatprep.subr.bf16.mxu1 %v12177_v53 }
 0x2f1   : > { %11523 = vmatmul.mubr.msk.f32.gmra.mrb[10].mxu0 %vm1167_vm6, %v13739_v54  ;;  %12180 = vmatpush3.bf16.msra.mxu1 %v12177_v53 }
 0x2f2   : > { %11525 = vmatprep.mubr.msk.f32.mxu0 %vm1167_vm6, %v13741_v55  ;;  %12182 = vmatprep.subr.bf16.mxu1 %v14395_v13 }
 0x2f5   : > { %11526 = vmatmul.mubr.msk.f32.gmra.mrb[12].mxu0 %vm1167_vm6, %v13747_v56 }
 0x2f6   : > { %11528 = vmatprep.mubr.msk.f32.mxu0 %vm1167_vm6, %v13749_v57 }
 0x2f9   : > { %11529 = vmatmul.mubr.msk.f32.gmra.mrb[14].mxu0 %vm1167_vm6, %v13755_v58 }
 0x2fa   : > { %11531 = vmatprep.mubr.msk.f32.mxu0 %vm1167_vm6, %v13757_v59 }
 0x2fd   : > { %11532 = vmatmul.mubr.msk.f32.gmra.mrb[16].mxu0 %vm1167_vm6, %v13763_v60 }
 0x2fe   : > { %11534 = vmatprep.mubr.msk.f32.mxu0 %vm1167_vm6, %v13765_v61 }
 0x301   : > { %11535 = vmatmul.mubr.msk.f32.gmra.mrb[18].mxu0 %vm1167_vm6, %v13771_v0 }
 0x302   : > { %11537 = vmatprep.mubr.msk.f32.mxu0 %vm1167_vm6, %v13773_v6 }
 0x305   : > { %11538 = vmatmul.mubr.msk.f32.gmra.mrb[20].mxu0 %vm1167_vm6, %v13779_v7 }
 0x306   : > { %11540 = vmatprep.mubr.msk.f32.mxu0 %vm1167_vm6, %v13781_v8 }
 0x309   : > { %11541 = vmatmul.mubr.msk.f32.gmra.mrb[22].mxu0 %vm1167_vm6, %v15888_v22 }
 0x30a   : > { %11543 = vmatprep.mubr.msk.f32.mxu0 %vm1167_vm6, %v15889_v23 }
 0x30d   : > { %11544 = vmatmul.mubr.msk.f32.gmra.mrb[24].mxu0 %vm1167_vm6, %v13795_v11 }
 0x30e   : > { %11546 = vmatprep.mubr.msk.f32.mxu0 %vm1167_vm6, %v15890_v24 }
 0x311   : > { %11547 = vmatmul.mubr.msk.f32.gmra.mrb[26].mxu0 %vm1167_vm6, %v13803_v33 }
 0x312   : > { %11549 = vmatprep.mubr.msk.f32.mxu0 %vm1167_vm6, %v14069_v36 }
 0x315   : > { %11550 = vmatmul.mubr.msk.f32.gmra.mrb[28].mxu0 %vm1167_vm6, %v14075_v40 }
 0x316   : > { %11552 = vmatprep.mubr.msk.f32.mxu0 %vm1167_vm6, %v4262_v26 }
 0x319   : > { %11553 = vmatmul.mubr.msk.f32.gmra.mrb[30].mxu0 %vm1167_vm6, %v4263_v29 }
 0x323   : > { %v11109_v30 = vpop.f32.mrb[0].mxu1 }
 0x324   : > { %v1429_v31 = vpop.f32.mrb[1].mxu1 }
 0x327   : > { %v11112_v32 = vpop.f32.mrb[2].mxu1 }
 0x328   : > { %v1439_v34 = vpop.f32.mrb[3].mxu1 }
 0x32b   : > { %v11115_v37 = vpop.f32.mrb[4].mxu1 }
 0x32c   : > { %v14335_v43 = vpop.f32.mrb[5].mxu1 }
 0x32f   : > { %v14337_v44 = vpop.f32.mrb[6].mxu1 }
 0x330   : > { %v14339_v46 = vpop.f32.mrb[7].mxu1 }
 0x333   : > { %v14343_v48 = vpop.f32.mrb[8].mxu1 }
 0x334   : > { %v14345_v49 = vpop.f32.mrb[9].mxu1 }
 0x337   : > { %v14349_v52 = vpop.f32.mrb[10].mxu1 }
 0x338   : > { %v14351_v54 = vpop.f32.mrb[11].mxu1 }
 0x33b   : > { %v14353_v55 = vpop.f32.mrb[12].mxu1 }
 0x33c   : > { %v14355_v56 = vpop.f32.mrb[13].mxu1 }
 0x33f   : > { %v14357_v57 = vpop.f32.mrb[14].mxu1 }
 0x340   : > { %v14359_v58 = vpop.f32.mrb[15].mxu1 }
 0x343   : > { %v14361_v59 = vpop.f32.mrb[16].mxu1 }
 0x344   : > { %v14363_v60 = vpop.f32.mrb[17].mxu1 }
 0x347   : > { %v14365_v61 = vpop.f32.mrb[18].mxu1 }
 0x348   : > { %v14367_v0 = vpop.f32.mrb[19].mxu1 }
 0x34b   : > { %v14369_v6 = vpop.f32.mrb[20].mxu1 }
 0x34c   : > { %v14371_v7 = vpop.f32.mrb[21].mxu1 }
 0x34f   : > { %v14373_v8 = vpop.f32.mrb[22].mxu1 }
 0x350   : > { %v14375_v11 = vpop.f32.mrb[23].mxu1 }
 0x353   : > { %v14377_v12 = vpop.f32.mrb[24].mxu1 }
 0x354   : > { %v14379_v33 = vpop.f32.mrb[25].mxu1 }
 0x357   : > { %v14381_v62 = vpop.f32.mrb[26].mxu1 }
 0x358   : > { %v14383_v63 = vpop.f32.mrb[27].mxu1 }
 0x35d   : > { %v14385_v41 = vpop.f32.mrb[28].mxu1 }
 0x35e   : > { %v14387_v35 = vpop.f32.mrb[29].mxu1 }
 0x361   : > { %v14389_v36 = vpop.f32.mrb[30].mxu1 }
 0x362   : > { %v14391_v40 = vpop.f32.mrb[31].mxu1 }
 0x3b0   : > { %v11509_v15 = vpop.f32.mrb[0].mxu0 }
 0x3b1   : > { %v12211_v19 = vadd.f32 %v11509_v15, %v11109_v30  ;;  %v4428_v21 = vpop.f32.mrb[1].mxu0 }
 0x3b2   : > { %v12212_v9 = vadd.f32 %v4428_v21, %v1429_v31 }
 0x3b3   : > { %v4627_v38 = vadd.f32 %v12211_v19, %v14403_v17 }
 0x3b4   : > { %v4626_v42 = vadd.f32 %v12212_v9, %v14403_v17  ;;  %v11512_v3 = vpop.f32.mrb[2].mxu0 }
 0x3b5   : > { %v4659_v14 = vmax.f32 %v4627_v38, 0.0  ;;  %v12213_v20 = vadd.f32 %v11512_v3, %v11112_v32  ;;  %v4438_v10 = vpop.f32.mrb[3].mxu0 }
 0x3b6   : > { %v4658_v39 = vmax.f32 %v4626_v42, 0.0  ;;  %v12214_v1 = vadd.f32 %v4438_v10, %v1439_v34 }
 0x3b7   : > { %4693 = vst.msk [vmem:[#allocation5 + $0x30] sm:$0xff] %vm4691_vm7, %v4659_v14  ;;  %v4629_v5 = vadd.f32 %v12213_v20, %v14403_v17 }
 0x3b8   : > { %4692 = vst.msk [vmem:[#allocation5 + $0x28] sm:$0xff] %vm4691_vm7, %v4658_v39  ;;  %v4628_v16 = vadd.f32 %v12214_v1, %v14403_v17  ;;  %v11515_v18 = vpop.f32.mrb[4].mxu0 }
 0x3b9   : > { %v4661_v25 = vmax.f32 %v4629_v5, 0.0  ;;  %v12215_v28 = vadd.f32 %v11515_v18, %v11115_v37  ;;  %v4448_v27 = vpop.f32.mrb[5].mxu0 }
 0x3ba   : > { %v4660_v22 = vmax.f32 %v4628_v16, 0.0  ;;  %v12216_v23 = vadd.f32 %v4448_v27, %v14335_v43 }
 0x3bb   : > { %4695 = vst.msk [vmem:[#allocation5 + $0x50] sm:$0xff] %vm4691_vm7, %v4661_v25  ;;  %v4631_v24 = vadd.f32 %v12215_v28, %v14403_v17 }
 0x3bc   : > { %4694 = vst.msk [vmem:[#allocation5 + $0x48] sm:$0xff] %vm4691_vm7, %v4660_v22  ;;  %v4630_v26 = vadd.f32 %v12216_v23, %v14403_v17  ;;  %v11518_v29 = vpop.f32.mrb[6].mxu0 }
 0x3bd   : > { %v4663_v30 = vmax.f32 %v4631_v24, 0.0  ;;  %v12217_v31 = vadd.f32 %v11518_v29, %v14337_v44  ;;  %v4458_v32 = vpop.f32.mrb[7].mxu0 }
 0x3be   : > { %v4662_v34 = vmax.f32 %v4630_v26, 0.0  ;;  %v12218_v37 = vadd.f32 %v4458_v32, %v14339_v46  ;;  %v14426_v51 = vld [vmem:[#allocation5 + $0x30] sm:$0xff] }
 0x3bf   : > { %4697 = vst.msk [vmem:[#allocation5 + $0x70] sm:$0xff] %vm4691_vm7, %v4663_v30  ;;  %v4633_v43 = vadd.f32 %v12217_v31, %v14403_v17  ;;  %v14420_v45 = vld [vmem:[#allocation5 + $0x28] sm:$0xff] }
 0x3c0   : > { %4696 = vst.msk [vmem:[#allocation5 + $0x68] sm:$0xff] %vm4691_vm7, %v4662_v34  ;;  %v4632_v47 = vadd.f32 %v12218_v37, %v14403_v17  ;;  %v11521_v50 = vpop.f32.mrb[8].mxu0  ;;  %11562 = vmatprep.mubr.msk.f32.mxu1 %vm4691_vm7, %v14420_v45 }
 0x3c1   : > { %v4665_v44 = vmax.f32 %v4633_v43, 0.0  ;;  %v12219_v53 = vadd.f32 %v11521_v50, %v14343_v48  ;;  %v4468_v46 = vpop.f32.mrb[9].mxu0  ;;  %11563 = vmatmul.mubr.msk.f32.gmra.mrb[34].mxu1 %vm4691_vm7, %v14426_v51 }
 0x3c2   : > { %v4664_v2 = vmax.f32 %v4632_v47, 0.0  ;;  %v12220_v4 = vadd.f32 %v4468_v46, %v14345_v49  ;;  %v14440_v48 = vld [vmem:[#allocation5 + $0x50] sm:$0xff] }
 0x3c3   : > { %4699 = vst.msk [vmem:[#allocation5 + $0x90] sm:$0xff] %vm4691_vm7, %v4665_v44  ;;  %v4635_v15 = vadd.f32 %v12219_v53, %v14403_v17  ;;  %v14434_v19 = vld [vmem:[#allocation5 + $0x48] sm:$0xff] }
 0x3c4   : > { %4698 = vst.msk [vmem:[#allocation5 + $0x88] sm:$0xff] %vm4691_vm7, %v4664_v2  ;;  %v4634_v21 = vadd.f32 %v12220_v4, %v14403_v17  ;;  %v11524_v9 = vpop.f32.mrb[10].mxu0  ;;  %11565 = vmatprep.mubr.msk.f32.mxu1 %vm4691_vm7, %v14434_v19 }
 0x3c5   : > { %v4667_v38 = vmax.f32 %v4635_v15, 0.0  ;;  %v12221_v42 = vadd.f32 %v11524_v9, %v14349_v52  ;;  %v4478_v49 = vpop.f32.mrb[11].mxu0  ;;  %11566 = vmatmul.mubr.msk.f32.gmra.mrb[36].mxu1 %vm4691_vm7, %v14440_v48 }
 0x3c6   : > { %v4666_v3 = vmax.f32 %v4634_v21, 0.0  ;;  %v12222_v14 = vadd.f32 %v4478_v49, %v14351_v54  ;;  %v14454_v52 = vld [vmem:[#allocation5 + $0x70] sm:$0xff] }
 0x3c7   : > { %4701 = vst.msk [vmem:[#allocation5 + $0xb0] sm:$0xff] %vm4691_vm7, %v4667_v38  ;;  %v4637_v20 = vadd.f32 %v12221_v42, %v14403_v17  ;;  %v14448_v10 = vld [vmem:[#allocation5 + $0x68] sm:$0xff] }
 0x3c8   : > { %4700 = vst.msk [vmem:[#allocation5 + $0xa8] sm:$0xff] %vm4691_vm7, %v4666_v3  ;;  %v4636_v39 = vadd.f32 %v12222_v14, %v14403_v17  ;;  %v11527_v1 = vpop.f32.mrb[12].mxu0  ;;  %11568 = vmatprep.mubr.msk.f32.mxu1 %vm4691_vm7, %v14448_v10 }
 0x3c9   : > { %v4669_v5 = vmax.f32 %v4637_v20, 0.0  ;;  %v12223_v16 = vadd.f32 %v11527_v1, %v14353_v55  ;;  %v4488_v54 = vpop.f32.mrb[13].mxu0  ;;  %11569 = vmatmul.mubr.msk.f32.gmra.mrb[38].mxu1 %vm4691_vm7, %v14454_v52 }
 0x3ca   : > { %v4668_v18 = vmax.f32 %v4636_v39, 0.0  ;;  %v12224_v25 = vadd.f32 %v4488_v54, %v14355_v56  ;;  %v14468_v55 = vld [vmem:[#allocation5 + $0x90] sm:$0xff] }
 0x3cb   : > { %4703 = vst.msk [vmem:[#allocation5 + $0xd0] sm:$0xff] %vm4691_vm7, %v4669_v5  ;;  %v4639_v28 = vadd.f32 %v12223_v16, %v14403_v17  ;;  %v14462_v27 = vld [vmem:[#allocation5 + $0x88] sm:$0xff] }
 0x3cc   : > { %4702 = vst.msk [vmem:[#allocation5 + $0xc8] sm:$0xff] %vm4691_vm7, %v4668_v18  ;;  %v4638_v22 = vadd.f32 %v12224_v25, %v14403_v17  ;;  %v11530_v23 = vpop.f32.mrb[14].mxu0  ;;  %11571 = vmatprep.mubr.msk.f32.mxu1 %vm4691_vm7, %v14462_v27 }
 0x3cd   : > { %v4671_v24 = vmax.f32 %v4639_v28, 0.0  ;;  %v12225_v26 = vadd.f32 %v11530_v23, %v14357_v57  ;;  %v4498_v56 = vpop.f32.mrb[15].mxu0  ;;  %11572 = vmatmul.mubr.msk.f32.gmra.mrb[40].mxu1 %vm4691_vm7, %v14468_v55 }
 0x3ce   : > { %v4670_v29 = vmax.f32 %v4638_v22, 0.0  ;;  %v12226_v30 = vadd.f32 %v4498_v56, %v14359_v58  ;;  %v14482_v57 = vld [vmem:[#allocation5 + $0xb0] sm:$0xff] }
 0x3cf   : > { %4705 = vst.msk [vmem:[#allocation5 + $0xf0] sm:$0xff] %vm4691_vm7, %v4671_v24  ;;  %v4641_v31 = vadd.f32 %v12225_v26, %v14403_v17  ;;  %v14476_v32 = vld [vmem:[#allocation5 + $0xa8] sm:$0xff] }
 0x3d0   : > { %4704 = vst.msk [vmem:[#allocation5 + $0xe8] sm:$0xff] %vm4691_vm7, %v4670_v29  ;;  %v4640_v34 = vadd.f32 %v12226_v30, %v14403_v17  ;;  %v11533_v37 = vpop.f32.mrb[16].mxu0  ;;  %11574 = vmatprep.mubr.msk.f32.mxu1 %vm4691_vm7, %v14476_v32 }
 0x3d1   : > { %v4673_v43 = vmax.f32 %v4641_v31, 0.0  ;;  %v12227_v47 = vadd.f32 %v11533_v37, %v14361_v59  ;;  %v4508_v58 = vpop.f32.mrb[17].mxu0  ;;  %11575 = vmatmul.mubr.msk.f32.gmra.mrb[42].mxu1 %vm4691_vm7, %v14482_v57 }
 0x3d2   : > { %v4672_v50 = vmax.f32 %v4640_v34, 0.0  ;;  %v12228_v44 = vadd.f32 %v4508_v58, %v14363_v60  ;;  %v14496_v59 = vld [vmem:[#allocation5 + $0xd0] sm:$0xff] }
 0x3d3   : > { %4707 = vst.msk [vmem:[#allocation5 + $0x110] sm:$0xff] %vm4691_vm7, %v4673_v43  ;;  %v4643_v53 = vadd.f32 %v12227_v47, %v14403_v17  ;;  %v14490_v46 = vld [vmem:[#allocation5 + $0xc8] sm:$0xff] }
 0x3d4   : > { %4706 = vst.msk [vmem:[#allocation5 + $0x108] sm:$0xff] %vm4691_vm7, %v4672_v50  ;;  %v4642_v2 = vadd.f32 %v12228_v44, %v14403_v17  ;;  %v11536_v4 = vpop.f32.mrb[18].mxu0  ;;  %11577 = vmatprep.mubr.msk.f32.mxu1 %vm4691_vm7, %v14490_v46 }
 0x3d5   : > { %v4675_v15 = vmax.f32 %v4643_v53, 0.0  ;;  %v12229_v21 = vadd.f32 %v11536_v4, %v14365_v61  ;;  %v4518_v60 = vpop.f32.mrb[19].mxu0  ;;  %11578 = vmatmul.mubr.msk.f32.gmra.mrb[44].mxu1 %vm4691_vm7, %v14496_v59 }
 0x3d6   : > { %v4674_v9 = vmax.f32 %v4642_v2, 0.0  ;;  %v12230_v38 = vadd.f32 %v4518_v60, %v14367_v0  ;;  %v14510_v61 = vld [vmem:[#allocation5 + $0xf0] sm:$0xff] }
 0x3d7   : > { %4709 = vst.msk [vmem:[#allocation5 + $0x130] sm:$0xff] %vm4691_vm7, %v4675_v15  ;;  %v4645_v42 = vadd.f32 %v12229_v21, %v14403_v17  ;;  %v14504_v49 = vld [vmem:[#allocation5 + $0xe8] sm:$0xff] }
 0x3d8   : > { %4708 = vst.msk [vmem:[#allocation5 + $0x128] sm:$0xff] %vm4691_vm7, %v4674_v9  ;;  %v4644_v3 = vadd.f32 %v12230_v38, %v14403_v17  ;;  %v11539_v14 = vpop.f32.mrb[20].mxu0  ;;  %11580 = vmatprep.mubr.msk.f32.mxu1 %vm4691_vm7, %v14504_v49 }
 0x3d9   : > { %v4677_v20 = vmax.f32 %v4645_v42, 0.0  ;;  %v12231_v39 = vadd.f32 %v11539_v14, %v14369_v6  ;;  %v4528_v0 = vpop.f32.mrb[21].mxu0  ;;  %11581 = vmatmul.mubr.msk.f32.gmra.mrb[46].mxu1 %vm4691_vm7, %v14510_v61 }
 0x3da   : > { %v4676_v1 = vmax.f32 %v4644_v3, 0.0  ;;  %v12232_v5 = vadd.f32 %v4528_v0, %v14371_v7  ;;  %v14524_v6 = vld [vmem:[#allocation5 + $0x110] sm:$0xff] }
 0x3db   : > { %4711 = vst.msk [vmem:[#allocation5 + $0x150] sm:$0xff] %vm4691_vm7, %v4677_v20  ;;  %v4647_v16 = vadd.f32 %v12231_v39, %v14403_v17  ;;  %v14518_v54 = vld [vmem:[#allocation5 + $0x108] sm:$0xff] }
 0x3dc   : > { %4710 = vst.msk [vmem:[#allocation5 + $0x148] sm:$0xff] %vm4691_vm7, %v4676_v1  ;;  %v4646_v18 = vadd.f32 %v12232_v5, %v14403_v17  ;;  %v11542_v25 = vpop.f32.mrb[22].mxu0  ;;  %11583 = vmatprep.mubr.msk.f32.mxu1 %vm4691_vm7, %v14518_v54 }
 0x3dd   : > { %v4679_v28 = vmax.f32 %v4647_v16, 0.0  ;;  %v12233_v22 = vadd.f32 %v11542_v25, %v14373_v8  ;;  %v4538_v7 = vpop.f32.mrb[23].mxu0  ;;  %11584 = vmatmul.mubr.msk.f32.gmra.mrb[48].mxu1 %vm4691_vm7, %v14524_v6 }
 0x3de   : > { %v4678_v23 = vmax.f32 %v4646_v18, 0.0  ;;  %v12234_v24 = vadd.f32 %v4538_v7, %v14375_v11  ;;  %v14538_v8 = vld [vmem:[#allocation5 + $0x130] sm:$0xff] }
 0x3df   : > { %4713 = vst.msk [vmem:[#allocation5 + $0x170] sm:$0xff] %vm4691_vm7, %v4679_v28  ;;  %v4649_v26 = vadd.f32 %v12233_v22, %v14403_v17  ;;  %v14532_v56 = vld [vmem:[#allocation5 + $0x128] sm:$0xff] }
 0x3e0   : > { %4712 = vst.msk [vmem:[#allocation5 + $0x168] sm:$0xff] %vm4691_vm7, %v4678_v23  ;;  %v4648_v29 = vadd.f32 %v12234_v24, %v14403_v17  ;;  %v11545_v30 = vpop.f32.mrb[24].mxu0  ;;  %11586 = vmatprep.mubr.msk.f32.mxu1 %vm4691_vm7, %v14532_v56 }
 0x3e1   : > { %v4681_v31 = vmax.f32 %v4649_v26, 0.0  ;;  %v12235_v34 = vadd.f32 %v11545_v30, %v14377_v12  ;;  %v4548_v11 = vpop.f32.mrb[25].mxu0  ;;  %11587 = vmatmul.mubr.msk.f32.gmra.mrb[50].mxu1 %vm4691_vm7, %v14538_v8  ;;  %v4724_v30 = vld [vmem:[#allocation5 + $0x7] sm:$0xff] }
 0x3e2   : > { %v4680_v37 = vmax.f32 %v4648_v29, 0.0  ;;  %v12236_v43 = vadd.f32 %v4548_v11, %v14379_v33  ;;  %v14552_v12 = vld [vmem:[#allocation5 + $0x150] sm:$0xff]  ;;  %v10012_v11 = vld [vmem:[%s13034_s17 + $0x38] sm:$0xff] }
 0x3e3   : > { %4715 = vst.msk [vmem:[#allocation5 + $0x190] sm:$0xff] %vm4691_vm7, %v4681_v31  ;;  %v4651_v47 = vadd.f32 %v12235_v34, %v14403_v17  ;;  %v14546_v58 = vld [vmem:[#allocation5 + $0x148] sm:$0xff]  ;;  %v10011_v34 = vld [vmem:[%s13034_s17 + $0x30] sm:$0xff] }
 0x3e4   : > { %4714 = vst.msk [vmem:[#allocation5 + $0x188] sm:$0xff] %vm4691_vm7, %v4680_v37  ;;  %v4650_v50 = vadd.f32 %v12236_v43, %v14403_v17  ;;  %v11548_v44 = vpop.f32.mrb[26].mxu0  ;;  %11589 = vmatprep.mubr.msk.f32.mxu1 %vm4691_vm7, %v14546_v58  ;;  %v4725_v37 = vld [vmem:[#allocation5 + $0xf] sm:$0xff]  ;;  %v14619_v43 = vpack.c.bf16 %v10012_v11, %v10011_v34  ;;  %v10045_v11 = vld [vmem:[%s13034_s17 + $0x40] sm:$0xff] }
 0x3e5   : > { %v4683_v53 = vmax.f32 %v4651_v47, 0.0  ;;  %v12237_v2 = vadd.f32 %v11548_v44, %v14381_v62  ;;  %v4558_v33 = vpop.f32.mrb[27].mxu0  ;;  %11590 = vmatmul.mubr.msk.f32.gmra.mrb[52].mxu1 %vm4691_vm7, %v14552_v12  ;;  %v14622_v47 = vld [vmem:[#allocation5 + $0x27] sm:$0xff] }
 0x3e6   : > { %v4682_v4 = vmax.f32 %v4650_v50, 0.0  ;;  %v12238_v15 = vadd.f32 %v4558_v33, %v14383_v63  ;;  %v14566_v62 = vld [vmem:[#allocation5 + $0x170] sm:$0xff]  ;;  %v14632_v44 = vld [vmem:[#allocation5 + $0x47] sm:$0xff] }
 0x3e7   : > { %4717 = vst.msk [vmem:[#allocation5 + $0x1b0] sm:$0xff] %vm4691_vm7, %v4683_v53  ;;  %v4653_v21 = vadd.f32 %v12237_v2, %v14403_v17  ;;  %v14560_v60 = vld [vmem:[#allocation5 + $0x168] sm:$0xff] }
 0x3e8   : > { %4716 = vst.msk [vmem:[#allocation5 + $0x1a8] sm:$0xff] %vm4691_vm7, %v4682_v4  ;;  %v4652_v9 = vadd.f32 %v12238_v15, %v14403_v17  ;;  %v11551_v38 = vpop.f32.mrb[28].mxu0  ;;  %11592 = vmatprep.mubr.msk.f32.mxu1 %vm4691_vm7, %v14560_v60  ;;  %v14628_v50 = vld [vmem:[#allocation5 + $0x2f] sm:$0xff]  ;;  %v14648_v33 = vld [vmem:[#allocation5 + $0x87] sm:$0xff] }
 0x3e9   : > { %v4685_v42 = vmax.f32 %v4653_v21, 0.0  ;;  %v12239_v3 = vadd.f32 %v11551_v38, %v14385_v41  ;;  %v4568_v63 = vpop.f32.mrb[29].mxu0  ;;  %11593 = vmatmul.mubr.msk.f32.gmra.mrb[54].mxu1 %vm4691_vm7, %v14566_v62  ;;  %v14636_v53 = vld [vmem:[#allocation5 + $0x4f] sm:$0xff]  ;;  %v14656_v15 = vld [vmem:[#allocation5 + $0xa7] sm:$0xff] }
 0x3ea   : > { %v4684_v14 = vmax.f32 %v4652_v9, 0.0  ;;  %v12240_v20 = vadd.f32 %v4568_v63, %v14387_v35  ;;  %v14580_v41 = vld [vmem:[#allocation5 + $0x190] sm:$0xff]  ;;  %v14664_v9 = vld [vmem:[#allocation5 + $0xc7] sm:$0xff] }
 0x3eb   : > { %4719 = vst.msk [vmem:[#allocation5 + $0x1d0] sm:$0xff] %vm4691_vm7, %v4685_v42  ;;  %v4655_v39 = vadd.f32 %v12239_v3, %v14403_v17  ;;  %v14574_v0 = vld [vmem:[#allocation5 + $0x188] sm:$0xff] }
 0x3ec   : > { %4718 = vst.msk [vmem:[#allocation5 + $0x1c8] sm:$0xff] %vm4691_vm7, %v4684_v14  ;;  %v4654_v1 = vadd.f32 %v12240_v20, %v14403_v17  ;;  %v11554_v5 = vpop.f32.mrb[30].mxu0  ;;  %11595 = vmatprep.mubr.msk.f32.mxu1 %vm4691_vm7, %v14574_v0  ;;  %v14644_v2 = vld [vmem:[#allocation5 + $0x6f] sm:$0xff]  ;;  %v14672_v42 = vld [vmem:[#allocation5 + $0xe7] sm:$0xff] }
 0x3ed   : > { %v4687_v16 = vmax.f32 %v4655_v39, 0.0  ;;  %v12241_v18 = vadd.f32 %v11554_v5, %v14389_v36  ;;  %v4578_v35 = vpop.f32.mrb[31].mxu0  ;;  %11596 = vmatmul.mubr.msk.f32.gmra.mrb[56].mxu1 %vm4691_vm7, %v14580_v41  ;;  %v14652_v4 = vld [vmem:[#allocation5 + $0x8f] sm:$0xff]  ;;  %v14680_v63 = vld [vmem:[#allocation5 + $0x107] sm:$0xff] }
 0x3ee   : > { %v4686_v25 = vmax.f32 %v4654_v1, 0.0  ;;  %v12242_v28 = vadd.f32 %v4578_v35, %v14391_v40  ;;  %v14594_v36 = vld [vmem:[#allocation5 + $0x1b0] sm:$0xff]  ;;  %v14688_v20 = vld [vmem:[#allocation5 + $0x127] sm:$0xff] }
 0x3ef   : > { %4721 = vst.msk [vmem:[#allocation5 + $0x1f0] sm:$0xff] %vm4691_vm7, %v4687_v16  ;;  %v4657_v22 = vadd.f32 %v12241_v18, %v14403_v17  ;;  %v14588_v7 = vld [vmem:[#allocation5 + $0x1a8] sm:$0xff] }
 0x3f0   : > { %4720 = vst.msk [vmem:[#allocation5 + $0x1e8] sm:$0xff] %vm4691_vm7, %v4686_v25  ;;  %v4656_v23 = vadd.f32 %v12242_v28, %v14403_v17  ;;  %11598 = vmatprep.mubr.msk.f32.mxu1 %vm4691_vm7, %v14588_v7  ;;  %v14660_v21 = vld [vmem:[#allocation5 + $0xaf] sm:$0xff]  ;;  %v14696_v1 = vld [vmem:[#allocation5 + $0x147] sm:$0xff] }
 0x3f1   : > { %v4689_v24 = vmax.f32 %v4657_v22, 0.0  ;;  %11599 = vmatmul.mubr.msk.f32.gmra.mrb[58].mxu1 %vm4691_vm7, %v14594_v36  ;;  %v14668_v38 = vld [vmem:[#allocation5 + $0xcf] sm:$0xff]  ;;  %v14704_v16 = vld [vmem:[#allocation5 + $0x167] sm:$0xff] }
 0x3f2   : > { %v4688_v40 = vmax.f32 %v4656_v23, 0.0  ;;  %v14604_v17 = vld [vmem:[#allocation5 + $0x1d0] sm:$0xff]  ;;  %v14712_v35 = vld [vmem:[#allocation5 + $0x187] sm:$0xff] }
 0x3f3   : > { %4723 = vst.msk [vmem:[#allocation5 + $0x210] sm:$0xff] %vm4691_vm7, %v4689_v24  ;;  %v14599_v26 = vld [vmem:[#allocation5 + $0x1c8] sm:$0xff]  ;;  %15893 = vst [vmem:[#allocation30_spill] sm:$0xff] %v14604_v17 }
 0x3f4   : > { %15892 = vst [vmem:[#allocation11_spill] sm:$0xff] %v14599_v26  ;;  %4722 = vst.msk [vmem:[#allocation5 + $0x208] sm:$0xff] %vm4691_vm7, %v4688_v40  ;;  %11601 = vmatprep.mubr.msk.f32.mxu1 %vm4691_vm7, %v14599_v26  ;;  %v14676_v3 = vld [vmem:[#allocation5 + $0xef] sm:$0xff]  ;;  %v14720_v28 = vld [vmem:[#allocation5 + $0x1a7] sm:$0xff] }
 0x3f5   : > { %11602 = vmatmul.mubr.msk.f32.gmra.mrb[60].mxu1 %vm4691_vm7, %v14604_v17  ;;  %v14684_v14 = vld [vmem:[#allocation5 + $0x10f] sm:$0xff]  ;;  %v14728_v23 = vld [vmem:[#allocation5 + $0x1c7] sm:$0xff] }
 0x3f6   : > { %v14612_v31 = vld [vmem:[#allocation5 + $0x1f0] sm:$0xff] }
 0x3f7   : > { %v14608_v29 = vld [vmem:[#allocation5 + $0x1e8] sm:$0xff]  ;;  %15895 = vst [vmem:[#allocation31_spill] sm:$0xff] %v14612_v31  ;;  %v14756_v26 = vld [vmem:[#allocation5 + $0x31] sm:$0xff] }
 0x3f8   : > { %15894 = vst [vmem:[#allocation12_spill] sm:$0xff] %v14608_v29  ;;  %11604 = vmatprep.mubr.msk.f32.mxu1 %vm4691_vm7, %v14608_v29  ;;  %v14692_v39 = vld [vmem:[#allocation5 + $0x12f] sm:$0xff]  ;;  %v14736_v40 = vld [vmem:[#allocation5 + $0x1e7] sm:$0xff]  ;;  %15897 = vst [vmem:[#allocation32_spill] sm:$0xff] %v14756_v26 }
 0x3f9   : > { %11605 = vmatmul.mubr.msk.f32.gmra.mrb[62].mxu1 %vm4691_vm7, %v14612_v31  ;;  %v14700_v5 = vld [vmem:[#allocation5 + $0x14f] sm:$0xff] }
 0x3fa   : > { %11611 = vmatprep.mubr.msk.f32.mxu1 %vm4691_vm7, %v4724_v30  ;;  %v14708_v18 = vld [vmem:[#allocation5 + $0x16f] sm:$0xff] }
 0x3fb   : > { %v14716_v25 = vld [vmem:[#allocation5 + $0x18f] sm:$0xff] }
 0x3fc   : > { %v14724_v22 = vld [vmem:[#allocation5 + $0x1af] sm:$0xff] }
 0x3fd   : > { %11612 = vmatmul.mubr.msk.f32.vlgmr.msra.gmra.mrb[32].mxu1 %vm4691_vm7, %v4725_v37  ;;  %v14732_v24 = vld [vmem:[#allocation5 + $0x1cf] sm:$0xff] }
 0x3fe   : > { %12184 = vmatpush3.bf16.msra.mxu1 %v14395_v13  ;;  %11614 = vmatprep.mubr.msk.f32.mxu1 %vm4691_vm7, %v14622_v47  ;;  %v14640_v13 = vld [vmem:[#allocation5 + $0x67] sm:$0xff]  ;;  %v14740_v34 = vld [vmem:[#allocation5 + $0x1ef] sm:$0xff] }
 0x3ff   : > { %12186 = vmatprep.subr.bf16.mxu1 %v14619_v43  ;;  %v5435_v30 = vld [vmem:[#allocation5 + $0x9] sm:$0xff]  ;;  %v5436_v31 = vld [vmem:[#allocation5 + $0x11] sm:$0xff] }
 0x400   : > { %v10046_v37 = vld [vmem:[%s13034_s17 + $0x48] sm:$0xff] }
 0x401   : > { %11615 = vmatmul.mubr.msk.f32.gmra.mrb[34].mxu1 %vm4691_vm7, %v14628_v50  ;;  %v14747_v29 = vpack.c.bf16 %v10046_v37, %v10045_v11  ;;  %v14750_v17 = vld [vmem:[#allocation5 + $0x29] sm:$0xff]  ;;  %v14772_v11 = vld [vmem:[#allocation5 + $0x71] sm:$0xff] }
 0x402   : > { %11617 = vmatprep.mubr.msk.f32.mxu1 %vm4691_vm7, %v14632_v44  ;;  %15896 = vst [vmem:[#allocation13_spill] sm:$0xff] %v14750_v17  ;;  %15901 = vst [vmem:[#allocation34_spill] sm:$0xff] %v14772_v11  ;;  %v14776_v37 = vld [vmem:[#allocation5 + $0x89] sm:$0xff] }
 0x403   : > { %15902 = vst [vmem:[#allocation16_spill] sm:$0xff] %v14776_v37 }
 0x405   : > { %11618 = vmatmul.mubr.msk.f32.gmra.mrb[36].mxu1 %vm4691_vm7, %v14636_v53 }
 0x406   : > { %11620 = vmatprep.mubr.msk.f32.mxu1 %vm4691_vm7, %v14640_v13 }
 0x409   : > { %11621 = vmatmul.mubr.msk.f32.gmra.mrb[38].mxu1 %vm4691_vm7, %v14644_v2 }
 0x40a   : > { %11623 = vmatprep.mubr.msk.f32.mxu1 %vm4691_vm7, %v14648_v33 }
 0x40d   : > { %11624 = vmatmul.mubr.msk.f32.gmra.mrb[40].mxu1 %vm4691_vm7, %v14652_v4 }
 0x40e   : > { %11626 = vmatprep.mubr.msk.f32.mxu1 %vm4691_vm7, %v14656_v15 }
 0x411   : > { %11627 = vmatmul.mubr.msk.f32.gmra.mrb[42].mxu1 %vm4691_vm7, %v14660_v21 }
 0x412   : > { %11629 = vmatprep.mubr.msk.f32.mxu1 %vm4691_vm7, %v14664_v9 }
 0x415   : > { %11630 = vmatmul.mubr.msk.f32.gmra.mrb[44].mxu1 %vm4691_vm7, %v14668_v38 }
 0x416   : > { %11632 = vmatprep.mubr.msk.f32.mxu1 %vm4691_vm7, %v14672_v42 }
 0x419   : > { %11633 = vmatmul.mubr.msk.f32.gmra.mrb[46].mxu1 %vm4691_vm7, %v14676_v3 }
 0x41a   : > { %11635 = vmatprep.mubr.msk.f32.mxu1 %vm4691_vm7, %v14680_v63 }
 0x41d   : > { %11636 = vmatmul.mubr.msk.f32.gmra.mrb[48].mxu1 %vm4691_vm7, %v14684_v14 }
 0x41e   : > { %11638 = vmatprep.mubr.msk.f32.mxu1 %vm4691_vm7, %v14688_v20 }
 0x421   : > { %11639 = vmatmul.mubr.msk.f32.gmra.mrb[50].mxu1 %vm4691_vm7, %v14692_v39 }
 0x422   : > { %11641 = vmatprep.mubr.msk.f32.mxu1 %vm4691_vm7, %v14696_v1 }
 0x425   : > { %11642 = vmatmul.mubr.msk.f32.gmra.mrb[52].mxu1 %vm4691_vm7, %v14700_v5 }
 0x426   : > { %11644 = vmatprep.mubr.msk.f32.mxu1 %vm4691_vm7, %v14704_v16 }
 0x429   : > { %11645 = vmatmul.mubr.msk.f32.gmra.mrb[54].mxu1 %vm4691_vm7, %v14708_v18 }
 0x42a   : > { %11647 = vmatprep.mubr.msk.f32.mxu1 %vm4691_vm7, %v14712_v35 }
 0x42d   : > { %11648 = vmatmul.mubr.msk.f32.gmra.mrb[56].mxu1 %vm4691_vm7, %v14716_v25 }
 0x42e   : > { %11650 = vmatprep.mubr.msk.f32.mxu1 %vm4691_vm7, %v14720_v28 }
 0x431   : > { %11651 = vmatmul.mubr.msk.f32.gmra.mrb[58].mxu1 %vm4691_vm7, %v14724_v22 }
 0x432   : > { %11653 = vmatprep.mubr.msk.f32.mxu1 %vm4691_vm7, %v14728_v23 }
 0x435   : > { %11654 = vmatmul.mubr.msk.f32.gmra.mrb[60].mxu1 %vm4691_vm7, %v14732_v24 }
 0x436   : > { %11656 = vmatprep.mubr.msk.f32.mxu1 %vm4691_vm7, %v14736_v40 }
 0x439   : > { %11657 = vmatmul.mubr.msk.f32.gmra.mrb[62].mxu1 %vm4691_vm7, %v14740_v34 }
 0x43a   : > { %11663 = vmatprep.mubr.msk.f32.mxu1 %vm4691_vm7, %v5435_v30  ;;  %v14760_v30 = vld [vmem:[#allocation5 + $0x49] sm:$0xff] }
 0x43b   : > { %15898 = vst [vmem:[#allocation14_spill] sm:$0xff] %v14760_v30 }
 0x43d   : > { %11664 = vmatmul.mubr.msk.f32.vlgmr.msra.gmra.mrb[32].mxu1 %vm4691_vm7, %v5436_v31  ;;  %v14764_v31 = vld [vmem:[#allocation5 + $0x51] sm:$0xff] }
 0x43e   : > { %12188 = vmatpush3.bf16.msra.mxu1 %v14619_v43  ;;  %11666 = vmatprep.mubr.msk.f32.mxu1 %vm4691_vm7, %v14750_v17  ;;  %15899 = vst [vmem:[#allocation33_spill] sm:$0xff] %v14764_v31  ;;  %v14768_v43 = vld [vmem:[#allocation5 + $0x69] sm:$0xff]  ;;  %v10080_v17 = vld [vmem:[%s13034_s17 + $0x58] sm:$0xff] }
 0x43f   : > { %12190 = vmatprep.subr.bf16.mxu1 %v14747_v29  ;;  %15900 = vst [vmem:[#allocation15_spill] sm:$0xff] %v14768_v43 }
 0x441   : > { %11667 = vmatmul.mubr.msk.f32.gmra.mrb[34].mxu1 %vm4691_vm7, %v14756_v26  ;;  %v10079_v26 = vld [vmem:[%s13034_s17 + $0x50] sm:$0xff] }
 0x442   : > { %11669 = vmatprep.mubr.msk.f32.mxu1 %vm4691_vm7, %v14760_v30  ;;  %v14780_v30 = vld [vmem:[#allocation5 + $0x91] sm:$0xff] }
 0x443   : > { %15903 = vst [vmem:[#allocation35_spill] sm:$0xff] %v14780_v30 }
 0x445   : > { %11670 = vmatmul.mubr.msk.f32.gmra.mrb[36].mxu1 %vm4691_vm7, %v14764_v31  ;;  %v14784_v31 = vld [vmem:[#allocation5 + $0xa9] sm:$0xff] }
 0x446   : > { %11672 = vmatprep.mubr.msk.f32.mxu1 %vm4691_vm7, %v14768_v43  ;;  %15904 = vst [vmem:[#allocation17_spill] sm:$0xff] %v14784_v31  ;;  %v14788_v43 = vld [vmem:[#allocation5 + $0xb1] sm:$0xff] }
 0x447   : > { %15905 = vst [vmem:[#allocation36_spill] sm:$0xff] %v14788_v43 }
 0x449   : > { %11673 = vmatmul.mubr.msk.f32.gmra.mrb[38].mxu1 %vm4691_vm7, %v14772_v11  ;;  %v14792_v11 = vld [vmem:[#allocation5 + $0xc9] sm:$0xff] }
 0x44a   : > { %11675 = vmatprep.mubr.msk.f32.mxu1 %vm4691_vm7, %v14776_v37  ;;  %15906 = vst [vmem:[#allocation18_spill] sm:$0xff] %v14792_v11  ;;  %v14796_v37 = vld [vmem:[#allocation5 + $0xd1] sm:$0xff] }
 0x44b   : > { %15907 = vst [vmem:[#allocation37_spill] sm:$0xff] %v14796_v37 }
 0x44d   : > { %11676 = vmatmul.mubr.msk.f32.gmra.mrb[40].mxu1 %vm4691_vm7, %v14780_v30  ;;  %v14800_v30 = vld [vmem:[#allocation5 + $0xe9] sm:$0xff] }
 0x44e   : > { %11678 = vmatprep.mubr.msk.f32.mxu1 %vm4691_vm7, %v14784_v31  ;;  %15908 = vst [vmem:[#allocation19_spill] sm:$0xff] %v14800_v30  ;;  %v14804_v31 = vld [vmem:[#allocation5 + $0xf1] sm:$0xff] }
 0x44f   : > { %15909 = vst [vmem:[#allocation38_spill] sm:$0xff] %v14804_v31 }
 0x451   : > { %11679 = vmatmul.mubr.msk.f32.gmra.mrb[42].mxu1 %vm4691_vm7, %v14788_v43  ;;  %v14808_v43 = vld [vmem:[#allocation5 + $0x109] sm:$0xff] }
 0x452   : > { %11681 = vmatprep.mubr.msk.f32.mxu1 %vm4691_vm7, %v14792_v11  ;;  %15910 = vst [vmem:[#allocation20_spill] sm:$0xff] %v14808_v43  ;;  %v14812_v11 = vld [vmem:[#allocation5 + $0x111] sm:$0xff] }
 0x453   : > { %15911 = vst [vmem:[#allocation39_spill] sm:$0xff] %v14812_v11 }
 0x455   : > { %11682 = vmatmul.mubr.msk.f32.gmra.mrb[44].mxu1 %vm4691_vm7, %v14796_v37  ;;  %v14816_v37 = vld [vmem:[#allocation5 + $0x129] sm:$0xff] }
 0x456   : > { %11684 = vmatprep.mubr.msk.f32.mxu1 %vm4691_vm7, %v14800_v30  ;;  %15912 = vst [vmem:[#allocation21_spill] sm:$0xff] %v14816_v37  ;;  %v14820_v30 = vld [vmem:[#allocation5 + $0x131] sm:$0xff] }
 0x457   : > { %15913 = vst [vmem:[#allocation40_spill] sm:$0xff] %v14820_v30 }
 0x459   : > { %11685 = vmatmul.mubr.msk.f32.gmra.mrb[46].mxu1 %vm4691_vm7, %v14804_v31  ;;  %v14824_v31 = vld [vmem:[#allocation5 + $0x149] sm:$0xff] }
 0x45a   : > { %11687 = vmatprep.mubr.msk.f32.mxu1 %vm4691_vm7, %v14808_v43  ;;  %15914 = vst [vmem:[#allocation22_spill] sm:$0xff] %v14824_v31  ;;  %v14828_v43 = vld [vmem:[#allocation5 + $0x151] sm:$0xff] }
 0x45b   : > { %15915 = vst [vmem:[#allocation41_spill] sm:$0xff] %v14828_v43 }
 0x45d   : > { %11688 = vmatmul.mubr.msk.f32.gmra.mrb[48].mxu1 %vm4691_vm7, %v14812_v11  ;;  %v14832_v11 = vld [vmem:[#allocation5 + $0x169] sm:$0xff] }
 0x45e   : > { %11690 = vmatprep.mubr.msk.f32.mxu1 %vm4691_vm7, %v14816_v37  ;;  %15916 = vst [vmem:[#allocation23_spill] sm:$0xff] %v14832_v11  ;;  %v14836_v37 = vld [vmem:[#allocation5 + $0x171] sm:$0xff] }
 0x45f   : > { %15917 = vst [vmem:[#allocation24_spill] sm:$0xff] %v14836_v37 }
 0x461   : > { %11691 = vmatmul.mubr.msk.f32.gmra.mrb[50].mxu1 %vm4691_vm7, %v14820_v30  ;;  %v14840_v30 = vld [vmem:[#allocation5 + $0x189] sm:$0xff] }
 0x462   : > { %11693 = vmatprep.mubr.msk.f32.mxu1 %vm4691_vm7, %v14824_v31  ;;  %15918 = vst [vmem:[#allocation42_spill] sm:$0xff] %v14840_v30  ;;  %v14844_v31 = vld [vmem:[#allocation5 + $0x191] sm:$0xff] }
 0x463   : > { %15919 = vst [vmem:[#allocation28_spill] sm:$0xff] %v14844_v31 }
 0x465   : > { %11694 = vmatmul.mubr.msk.f32.gmra.mrb[52].mxu1 %vm4691_vm7, %v14828_v43  ;;  %v14848_v43 = vld [vmem:[#allocation5 + $0x1a9] sm:$0xff] }
 0x466   : > { %11696 = vmatprep.mubr.msk.f32.mxu1 %vm4691_vm7, %v14832_v11  ;;  %15920 = vst [vmem:[#allocation43_spill] sm:$0xff] %v14848_v43  ;;  %v14852_v11 = vld [vmem:[#allocation5 + $0x1b1] sm:$0xff] }
 0x467   : > { %15921 = vst [vmem:[#allocation29_spill] sm:$0xff] %v14852_v11 }
 0x469   : > { %11697 = vmatmul.mubr.msk.f32.gmra.mrb[54].mxu1 %vm4691_vm7, %v14836_v37  ;;  %v14856_v37 = vld [vmem:[#allocation5 + $0x1c9] sm:$0xff] }
 0x46a   : > { %11699 = vmatprep.mubr.msk.f32.mxu1 %vm4691_vm7, %v14840_v30  ;;  %15922 = vst [vmem:[#allocation25_spill] sm:$0xff] %v14856_v37  ;;  %v14860_v30 = vld [vmem:[#allocation5 + $0x1d1] sm:$0xff] }
 0x46b   : > { %15923 = vst [vmem:[#allocation26_spill] sm:$0xff] %v14860_v30 }
 0x46d   : > { %11700 = vmatmul.mubr.msk.f32.gmra.mrb[56].mxu1 %vm4691_vm7, %v14844_v31  ;;  %v14864_v31 = vld [vmem:[#allocation5 + $0x1e9] sm:$0xff] }
 0x46e   : > { %11702 = vmatprep.mubr.msk.f32.mxu1 %vm4691_vm7, %v14848_v43  ;;  %v14868_v43 = vld [vmem:[#allocation5 + $0x1f1] sm:$0xff] }
 0x471   : > { %11703 = vmatmul.mubr.msk.f32.gmra.mrb[58].mxu1 %vm4691_vm7, %v14852_v11 }
 0x472   : > { %11705 = vmatprep.mubr.msk.f32.mxu1 %vm4691_vm7, %v14856_v37  ;;  %v12193_v37 = vpack.c.bf16 %v10080_v17, %v10079_v26  ;;  %v14935_v26 = vld [vmem:[#allocation5 + $0x207] sm:$0xff]  ;;  %v14939_v17 = vld [vmem:[#allocation5 + $0x20f] sm:$0xff] }
 0x475   : > { %11706 = vmatmul.mubr.msk.f32.gmra.mrb[60].mxu1 %vm4691_vm7, %v14860_v30 }
 0x476   : > { %11708 = vmatprep.mubr.msk.f32.mxu1 %vm4691_vm7, %v14864_v31 }
 0x479   : > { %11709 = vmatmul.mubr.msk.f32.gmra.mrb[62].mxu1 %vm4691_vm7, %v14868_v43 }
 0x47a   : > { %11715 = vmatprep.mubr.msk.f32.mxu1 %vm4691_vm7, %v14622_v47  ;;  %v10114_v47 = vld [vmem:[%s13034_s17 + $0x68] sm:$0xff] }
 0x47d   : > { %11716 = vmatmul.mubr.msk.f32.vlgmr.msra.gmra.mrb[32].mxu1 %vm4691_vm7, %v14628_v50 }
 0x47e   : > { %12192 = vmatpush3.bf16.msra.mxu1 %v14747_v29  ;;  %11718 = vmatprep.mubr.msk.f32.mxu1 %vm4691_vm7, %v14632_v44  ;;  %v10113_v29 = vld [vmem:[%s13034_s17 + $0x60] sm:$0xff] }
 0x47f   : > { %12194 = vmatprep.subr.bf16.mxu1 %v12193_v37  ;;  %v12197_v50 = vpack.c.bf16 %v10114_v47, %v10113_v29  ;;  %v15937_v29 = vld [vmem:[#allocation36_spill] sm:$0xff]  ;;  %v15938_v47 = vld [vmem:[#allocation18_spill] sm:$0xff] }
 0x481   : > { %11719 = vmatmul.mubr.msk.f32.gmra.mrb[34].mxu1 %vm4691_vm7, %v14636_v53 }
 0x482   : > { %11721 = vmatprep.mubr.msk.f32.mxu1 %vm4691_vm7, %v14640_v13 }
 0x485   : > { %11722 = vmatmul.mubr.msk.f32.gmra.mrb[36].mxu1 %vm4691_vm7, %v14644_v2 }
 0x486   : > { %11724 = vmatprep.mubr.msk.f32.mxu1 %vm4691_vm7, %v14648_v33 }
 0x489   : > { %11725 = vmatmul.mubr.msk.f32.gmra.mrb[38].mxu1 %vm4691_vm7, %v14652_v4 }
 0x48a   : > { %11727 = vmatprep.mubr.msk.f32.mxu1 %vm4691_vm7, %v14656_v15 }
 0x48d   : > { %11728 = vmatmul.mubr.msk.f32.gmra.mrb[40].mxu1 %vm4691_vm7, %v14660_v21 }
 0x48e   : > { %11730 = vmatprep.mubr.msk.f32.mxu1 %vm4691_vm7, %v14664_v9 }
 0x491   : > { %11731 = vmatmul.mubr.msk.f32.gmra.mrb[42].mxu1 %vm4691_vm7, %v14668_v38 }
 0x492   : > { %11733 = vmatprep.mubr.msk.f32.mxu1 %vm4691_vm7, %v14672_v42 }
 0x495   : > { %11734 = vmatmul.mubr.msk.f32.gmra.mrb[44].mxu1 %vm4691_vm7, %v14676_v3 }
 0x496   : > { %11736 = vmatprep.mubr.msk.f32.mxu1 %vm4691_vm7, %v14680_v63 }
 0x499   : > { %11737 = vmatmul.mubr.msk.f32.gmra.mrb[46].mxu1 %vm4691_vm7, %v14684_v14 }
 0x49a   : > { %11739 = vmatprep.mubr.msk.f32.mxu1 %vm4691_vm7, %v14688_v20 }
 0x49d   : > { %11740 = vmatmul.mubr.msk.f32.gmra.mrb[48].mxu1 %vm4691_vm7, %v14692_v39 }
 0x49e   : > { %11742 = vmatprep.mubr.msk.f32.mxu1 %vm4691_vm7, %v14696_v1 }
 0x4a1   : > { %11743 = vmatmul.mubr.msk.f32.gmra.mrb[50].mxu1 %vm4691_vm7, %v14700_v5 }
 0x4a2   : > { %11745 = vmatprep.mubr.msk.f32.mxu1 %vm4691_vm7, %v14704_v16 }
 0x4a5   : > { %11746 = vmatmul.mubr.msk.f32.gmra.mrb[52].mxu1 %vm4691_vm7, %v14708_v18 }
 0x4a6   : > { %11748 = vmatprep.mubr.msk.f32.mxu1 %vm4691_vm7, %v14712_v35 }
 0x4a9   : > { %11749 = vmatmul.mubr.msk.f32.gmra.mrb[54].mxu1 %vm4691_vm7, %v14716_v25 }
 0x4aa   : > { %11751 = vmatprep.mubr.msk.f32.mxu1 %vm4691_vm7, %v14720_v28 }
 0x4ad   : > { %11752 = vmatmul.mubr.msk.f32.gmra.mrb[56].mxu1 %vm4691_vm7, %v14724_v22 }
 0x4ae   : > { %11754 = vmatprep.mubr.msk.f32.mxu1 %vm4691_vm7, %v14728_v23 }
 0x4b1   : > { %11755 = vmatmul.mubr.msk.f32.gmra.mrb[58].mxu1 %vm4691_vm7, %v14732_v24 }
 0x4b2   : > { %11757 = vmatprep.mubr.msk.f32.mxu1 %vm4691_vm7, %v14736_v40 }
 0x4b5   : > { %11758 = vmatmul.mubr.msk.f32.gmra.mrb[60].mxu1 %vm4691_vm7, %v14740_v34 }
 0x4b6   : > { %11760 = vmatprep.mubr.msk.f32.mxu1 %vm4691_vm7, %v14935_v26 }
 0x4b9   : > { %11761 = vmatmul.mubr.msk.f32.gmra.mrb[62].mxu1 %vm4691_vm7, %v14939_v17 }
 0x4ba   : > { %11767 = vmatprep.mubr.msk.f32.mxu1 %vm4691_vm7, %v14420_v45  ;;  %v15924_v45 = vld [vmem:[#allocation11_spill] sm:$0xff] }
 0x4bd   : > { %11768 = vmatmul.mubr.msk.f32.vlgmr.msra.gmra.mrb[32].mxu1 %vm4691_vm7, %v14426_v51  ;;  %v15925_v51 = vld [vmem:[#allocation30_spill] sm:$0xff] }
 0x4be   : > { %12196 = vmatpush3.bf16.msra.mxu1 %v12193_v37  ;;  %11770 = vmatprep.mubr.msk.f32.mxu1 %vm4691_vm7, %v14434_v19  ;;  %v15926_v19 = vld [vmem:[#allocation12_spill] sm:$0xff]  ;;  %v15936_v37 = vld [vmem:[#allocation17_spill] sm:$0xff] }
 0x4bf   : > { %12198 = vmatprep.subr.bf16.mxu1 %v12197_v50 }
 0x4c1   : > { %11771 = vmatmul.mubr.msk.f32.gmra.mrb[34].mxu1 %vm4691_vm7, %v14440_v48  ;;  %v15927_v48 = vld [vmem:[#allocation31_spill] sm:$0xff] }
 0x4c2   : > { %11773 = vmatprep.mubr.msk.f32.mxu1 %vm4691_vm7, %v14448_v10  ;;  %v15005_v10 = vld [vmem:[#allocation5 + $0x208] sm:$0xff] }
 0x4c5   : > { %11774 = vmatmul.mubr.msk.f32.gmra.mrb[36].mxu1 %vm4691_vm7, %v14454_v52  ;;  %v15009_v52 = vld [vmem:[#allocation5 + $0x210] sm:$0xff] }
 0x4c6   : > { %11776 = vmatprep.mubr.msk.f32.mxu1 %vm4691_vm7, %v14462_v27  ;;  %v10147_v27 = vld [vmem:[%s13034_s17 + $0x70] sm:$0xff] }
 0x4c9   : > { %11777 = vmatmul.mubr.msk.f32.gmra.mrb[38].mxu1 %vm4691_vm7, %v14468_v55  ;;  %v10148_v55 = vld [vmem:[%s13034_s17 + $0x78] sm:$0xff] }
 0x4ca   : > { %11779 = vmatprep.mubr.msk.f32.mxu1 %vm4691_vm7, %v14476_v32  ;;  %v15928_v32 = vld [vmem:[#allocation13_spill] sm:$0xff] }
 0x4cd   : > { %11780 = vmatmul.mubr.msk.f32.gmra.mrb[40].mxu1 %vm4691_vm7, %v14482_v57  ;;  %v12201_v57 = vpack.c.bf16 %v10148_v55, %v10147_v27  ;;  %v15940_v27 = vld [vmem:[#allocation19_spill] sm:$0xff]  ;;  %v15941_v55 = vld [vmem:[#allocation38_spill] sm:$0xff] }
 0x4ce   : > { %11782 = vmatprep.mubr.msk.f32.mxu1 %vm4691_vm7, %v14490_v46  ;;  %v15929_v46 = vld [vmem:[#allocation32_spill] sm:$0xff] }
 0x4d1   : > { %11783 = vmatmul.mubr.msk.f32.gmra.mrb[42].mxu1 %vm4691_vm7, %v14496_v59  ;;  %v15930_v59 = vld [vmem:[#allocation14_spill] sm:$0xff] }
 0x4d2   : > { %11785 = vmatprep.mubr.msk.f32.mxu1 %vm4691_vm7, %v14504_v49  ;;  %v15931_v49 = vld [vmem:[#allocation33_spill] sm:$0xff] }
 0x4d5   : > { %11786 = vmatmul.mubr.msk.f32.gmra.mrb[44].mxu1 %vm4691_vm7, %v14510_v61  ;;  %v15932_v61 = vld [vmem:[#allocation15_spill] sm:$0xff] }
 0x4d6   : > { %11788 = vmatprep.mubr.msk.f32.mxu1 %vm4691_vm7, %v14518_v54  ;;  %v15933_v54 = vld [vmem:[#allocation34_spill] sm:$0xff] }
 0x4d9   : > { %11789 = vmatmul.mubr.msk.f32.gmra.mrb[46].mxu1 %vm4691_vm7, %v14524_v6  ;;  %v15934_v6 = vld [vmem:[#allocation16_spill] sm:$0xff] }
 0x4da   : > { %11791 = vmatprep.mubr.msk.f32.mxu1 %vm4691_vm7, %v14532_v56  ;;  %v15935_v56 = vld [vmem:[#allocation35_spill] sm:$0xff] }
 0x4dd   : > { %11792 = vmatmul.mubr.msk.f32.gmra.mrb[48].mxu1 %vm4691_vm7, %v14538_v8 }
 0x4de   : > { %11794 = vmatprep.mubr.msk.f32.mxu1 %vm4691_vm7, %v14546_v58 }
 0x4e1   : > { %11795 = vmatmul.mubr.msk.f32.gmra.mrb[50].mxu1 %vm4691_vm7, %v14552_v12 }
 0x4e2   : > { %11797 = vmatprep.mubr.msk.f32.mxu1 %vm4691_vm7, %v14560_v60 }
 0x4e5   : > { %11798 = vmatmul.mubr.msk.f32.gmra.mrb[52].mxu1 %vm4691_vm7, %v14566_v62 }
 0x4e6   : > { %11800 = vmatprep.mubr.msk.f32.mxu1 %vm4691_vm7, %v14574_v0 }
 0x4e9   : > { %11801 = vmatmul.mubr.msk.f32.gmra.mrb[54].mxu1 %vm4691_vm7, %v14580_v41 }
 0x4ea   : > { %11803 = vmatprep.mubr.msk.f32.mxu1 %vm4691_vm7, %v14588_v7 }
 0x4ed   : > { %11804 = vmatmul.mubr.msk.f32.gmra.mrb[56].mxu1 %vm4691_vm7, %v14594_v36 }
 0x4ee   : > { %11806 = vmatprep.mubr.msk.f32.mxu1 %vm4691_vm7, %v15924_v45 }
 0x4f1   : > { %11807 = vmatmul.mubr.msk.f32.gmra.mrb[58].mxu1 %vm4691_vm7, %v15925_v51 }
 0x4f2   : > { %11809 = vmatprep.mubr.msk.f32.mxu1 %vm4691_vm7, %v15926_v19 }
 0x4f5   : > { %11810 = vmatmul.mubr.msk.f32.gmra.mrb[60].mxu1 %vm4691_vm7, %v15927_v48 }
 0x4f6   : > { %11812 = vmatprep.mubr.msk.f32.mxu1 %vm4691_vm7, %v15005_v10 }
 0x4f9   : > { %11813 = vmatmul.mubr.msk.f32.gmra.mrb[62].mxu1 %vm4691_vm7, %v15009_v52 }
 0x4fa   : > { %11819 = vmatprep.mubr.msk.f32.mxu1 %vm4691_vm7, %v15928_v32  ;;  %v15942_v32 = vld [vmem:[#allocation20_spill] sm:$0xff] }
 0x4fd   : > { %11820 = vmatmul.mubr.msk.f32.vlgmr.msra.gmra.mrb[32].mxu1 %vm4691_vm7, %v15929_v46  ;;  %v15943_v46 = vld [vmem:[#allocation39_spill] sm:$0xff] }
 0x4fe   : > { %12200 = vmatpush3.bf16.msra.mxu1 %v12197_v50  ;;  %11822 = vmatprep.mubr.msk.f32.mxu1 %vm4691_vm7, %v15930_v59  ;;  %v15939_v50 = vld [vmem:[#allocation37_spill] sm:$0xff] }
 0x4ff   : > { %12202 = vmatprep.subr.bf16.mxu1 %v12201_v57 }
 0x501   : > { %11823 = vmatmul.mubr.msk.f32.gmra.mrb[34].mxu1 %vm4691_vm7, %v15931_v49 }
 0x502   : > { %11825 = vmatprep.mubr.msk.f32.mxu1 %vm4691_vm7, %v15932_v61 }
 0x505   : > { %11826 = vmatmul.mubr.msk.f32.gmra.mrb[36].mxu1 %vm4691_vm7, %v15933_v54 }
 0x506   : > { %11828 = vmatprep.mubr.msk.f32.mxu1 %vm4691_vm7, %v15934_v6 }
 0x509   : > { %11829 = vmatmul.mubr.msk.f32.gmra.mrb[38].mxu1 %vm4691_vm7, %v15935_v56 }
 0x50a   : > { %11831 = vmatprep.mubr.msk.f32.mxu1 %vm4691_vm7, %v15936_v37  ;;  %v15944_v37 = vld [vmem:[#allocation21_spill] sm:$0xff] }
 0x50d   : > { %11832 = vmatmul.mubr.msk.f32.gmra.mrb[40].mxu1 %vm4691_vm7, %v15937_v29  ;;  %v15945_v29 = vld [vmem:[#allocation40_spill] sm:$0xff] }
 0x50e   : > { %11834 = vmatprep.mubr.msk.f32.mxu1 %vm4691_vm7, %v15938_v47  ;;  %v15946_v47 = vld [vmem:[#allocation22_spill] sm:$0xff] }
 0x511   : > { %11835 = vmatmul.mubr.msk.f32.gmra.mrb[42].mxu1 %vm4691_vm7, %v15939_v50 }
 0x512   : > { %11837 = vmatprep.mubr.msk.f32.mxu1 %vm4691_vm7, %v15940_v27  ;;  %v15947_v27 = vld [vmem:[#allocation41_spill] sm:$0xff] }
 0x515   : > { %11838 = vmatmul.mubr.msk.f32.gmra.mrb[44].mxu1 %vm4691_vm7, %v15941_v55  ;;  %v15948_v55 = vld [vmem:[#allocation23_spill] sm:$0xff] }
 0x516   : > { %11840 = vmatprep.mubr.msk.f32.mxu1 %vm4691_vm7, %v15942_v32  ;;  %v15949_v32 = vld [vmem:[#allocation24_spill] sm:$0xff] }
 0x519   : > { %11841 = vmatmul.mubr.msk.f32.gmra.mrb[46].mxu1 %vm4691_vm7, %v15943_v46  ;;  %v15950_v46 = vld [vmem:[#allocation42_spill] sm:$0xff] }
 0x51a   : > { %11843 = vmatprep.mubr.msk.f32.mxu1 %vm4691_vm7, %v15944_v37  ;;  %v15951_v37 = vld [vmem:[#allocation28_spill] sm:$0xff] }
 0x51d   : > { %11844 = vmatmul.mubr.msk.f32.gmra.mrb[48].mxu1 %vm4691_vm7, %v15945_v29  ;;  %v15952_v29 = vld [vmem:[#allocation43_spill] sm:$0xff] }
 0x51e   : > { %11846 = vmatprep.mubr.msk.f32.mxu1 %vm4691_vm7, %v15946_v47  ;;  %v15953_v47 = vld [vmem:[#allocation25_spill] sm:$0xff] }
 0x521   : > { %11847 = vmatmul.mubr.msk.f32.gmra.mrb[50].mxu1 %vm4691_vm7, %v15947_v27 }
 0x522   : > { %11849 = vmatprep.mubr.msk.f32.mxu1 %vm4691_vm7, %v15948_v55 }
 0x525   : > { %11850 = vmatmul.mubr.msk.f32.gmra.mrb[52].mxu1 %vm4691_vm7, %v15949_v32 }
 0x526   : > { %11852 = vmatprep.mubr.msk.f32.mxu1 %vm4691_vm7, %v15950_v46  ;;  %v15075_v46 = vld [vmem:[#allocation5 + $0x209] sm:$0xff] }
 0x529   : > { %11853 = vmatmul.mubr.msk.f32.gmra.mrb[54].mxu1 %vm4691_vm7, %v15951_v37  ;;  %v10182_v37 = vld [vmem:[%s13034_s17 + $0x88] sm:$0xff] }
 0x52a   : > { %11855 = vmatprep.mubr.msk.f32.mxu1 %vm4691_vm7, %v15952_v29  ;;  %v15079_v29 = vld [vmem:[#allocation5 + $0x211] sm:$0xff] }
 0x52d   : > { %11856 = vmatmul.mubr.msk.f32.gmra.mrb[56].mxu1 %vm4691_vm7, %v14852_v11  ;;  %v10181_v11 = vld [vmem:[%s13034_s17 + $0x80] sm:$0xff] }
 0x52e   : > { %11858 = vmatprep.mubr.msk.f32.mxu1 %vm4691_vm7, %v15953_v47 }
 0x531   : > { %11859 = vmatmul.mubr.msk.f32.gmra.mrb[58].mxu1 %vm4691_vm7, %v14860_v30  ;;  %v12205_v30 = vpack.c.bf16 %v10182_v37, %v10181_v11 }
 0x532   : > { %11861 = vmatprep.mubr.msk.f32.mxu1 %vm4691_vm7, %v14864_v31 }
 0x535   : > { %11862 = vmatmul.mubr.msk.f32.gmra.mrb[60].mxu1 %vm4691_vm7, %v14868_v43 }
 0x536   : > { %11864 = vmatprep.mubr.msk.f32.mxu1 %vm4691_vm7, %v15075_v46 }
 0x539   : > { %11865 = vmatmul.mubr.msk.f32.gmra.mrb[62].mxu1 %vm4691_vm7, %v15079_v29 }
 0x53a   : > { %11871 = vmatprep.mubr.msk.f32.mxu1 %vm4691_vm7, %v14632_v44  ;;  %v7018_v44 = vld [vmem:[#allocation5 + $0x227] sm:$0xff] }
 0x53d   : > { %11872 = vmatmul.mubr.msk.f32.vlgmr.msra.gmra.mrb[32].mxu1 %vm4691_vm7, %v14636_v53  ;;  %v7019_v53 = vld [vmem:[#allocation5 + $0x22f] sm:$0xff] }
 0x53e   : > { %12204 = vmatpush3.bf16.msra.mxu1 %v12201_v57  ;;  %11874 = vmatprep.mubr.msk.f32.mxu1 %vm4691_vm7, %v14640_v13  ;;  %v7376_v13 = vld [vmem:[#allocation5 + $0x48] sm:$0xff] }
 0x53f   : > { %12206 = vmatprep.subr.bf16.mxu1 %v12205_v30 }
 0x541   : > { %11875 = vmatmul.mubr.msk.f32.gmra.mrb[34].mxu1 %vm4691_vm7, %v14644_v2  ;;  %v8255_v2 = vld [vmem:[%s13040_s21] sm:$0xff] }
 0x542   : > { %11877 = vmatprep.mubr.msk.f32.mxu1 %vm4691_vm7, %v14648_v33  ;;  %12023 = vmatprep.subr.mxu0 %v8255_v2  ;;  %v7377_v33 = vld [vmem:[#allocation5 + $0x50] sm:$0xff] }
 0x543   : > { %12024 = vmatpush3.msra.mxu0 %v8255_v2  ;;  %v15298_v2 = vld [vmem:[#allocation2 + $0x38] sm:$0xff] }
 0x545   : > { %11878 = vmatmul.mubr.msk.f32.gmra.mrb[36].mxu1 %vm4691_vm7, %v14652_v4  ;;  %v7378_v4 = vld [vmem:[#allocation5 + $0x68] sm:$0xff] }
 0x546   : > { %11880 = vmatprep.mubr.msk.f32.mxu1 %vm4691_vm7, %v14656_v15  ;;  %v7379_v15 = vld [vmem:[#allocation5 + $0x70] sm:$0xff] }
 0x549   : > { %11881 = vmatmul.mubr.msk.f32.gmra.mrb[38].mxu1 %vm4691_vm7, %v14660_v21  ;;  %v7380_v21 = vld [vmem:[#allocation5 + $0x88] sm:$0xff] }
 0x54a   : > { %11883 = vmatprep.mubr.msk.f32.mxu1 %vm4691_vm7, %v14664_v9  ;;  %v7381_v9 = vld [vmem:[#allocation5 + $0x90] sm:$0xff] }
 0x54d   : > { %11884 = vmatmul.mubr.msk.f32.gmra.mrb[40].mxu1 %vm4691_vm7, %v14668_v38  ;;  %v7382_v38 = vld [vmem:[#allocation5 + $0xa8] sm:$0xff] }
 0x54e   : > { %11886 = vmatprep.mubr.msk.f32.mxu1 %vm4691_vm7, %v14672_v42  ;;  %v7383_v42 = vld [vmem:[#allocation5 + $0xb0] sm:$0xff] }
 0x551   : > { %11887 = vmatmul.mubr.msk.f32.gmra.mrb[42].mxu1 %vm4691_vm7, %v14676_v3  ;;  %v7384_v3 = vld [vmem:[#allocation5 + $0xc8] sm:$0xff] }
 0x552   : > { %11889 = vmatprep.mubr.msk.f32.mxu1 %vm4691_vm7, %v14680_v63  ;;  %v7385_v63 = vld [vmem:[#allocation5 + $0xd0] sm:$0xff] }
 0x555   : > { %11890 = vmatmul.mubr.msk.f32.gmra.mrb[44].mxu1 %vm4691_vm7, %v14684_v14  ;;  %v7386_v14 = vld [vmem:[#allocation5 + $0xe8] sm:$0xff] }
 0x556   : > { %11892 = vmatprep.mubr.msk.f32.mxu1 %vm4691_vm7, %v14688_v20  ;;  %v7387_v20 = vld [vmem:[#allocation5 + $0xf0] sm:$0xff] }
 0x559   : > { %11893 = vmatmul.mubr.msk.f32.gmra.mrb[46].mxu1 %vm4691_vm7, %v14692_v39  ;;  %v7388_v39 = vld [vmem:[#allocation5 + $0x108] sm:$0xff] }
 0x55a   : > { %11895 = vmatprep.mubr.msk.f32.mxu1 %vm4691_vm7, %v14696_v1  ;;  %v7389_v1 = vld [vmem:[#allocation5 + $0x110] sm:$0xff] }
 0x55d   : > { %11896 = vmatmul.mubr.msk.f32.gmra.mrb[48].mxu1 %vm4691_vm7, %v14700_v5  ;;  %v7390_v5 = vld [vmem:[#allocation5 + $0x128] sm:$0xff] }
 0x55e   : > { %11898 = vmatprep.mubr.msk.f32.mxu1 %vm4691_vm7, %v14704_v16  ;;  %v15961_v16 = vld [vmem:[#allocation21_spill] sm:$0xff] }
 0x561   : > { %11899 = vmatmul.mubr.msk.f32.gmra.mrb[50].mxu1 %vm4691_vm7, %v14708_v18  ;;  %v15962_v18 = vld [vmem:[#allocation40_spill] sm:$0xff] }
 0x562   : > { %11901 = vmatprep.mubr.msk.f32.mxu1 %vm4691_vm7, %v14712_v35  ;;  %v15963_v35 = vld [vmem:[#allocation22_spill] sm:$0xff] }
 0x565   : > { %11902 = vmatmul.mubr.msk.f32.gmra.mrb[52].mxu1 %vm4691_vm7, %v14716_v25  ;;  %v15964_v25 = vld [vmem:[#allocation42_spill] sm:$0xff] }
 0x566   : > { %11904 = vmatprep.mubr.msk.f32.mxu1 %vm4691_vm7, %v14720_v28  ;;  %v15965_v28 = vld [vmem:[#allocation28_spill] sm:$0xff] }
 0x569   : > { %11905 = vmatmul.mubr.msk.f32.gmra.mrb[54].mxu1 %vm4691_vm7, %v14724_v22  ;;  %v15966_v22 = vld [vmem:[#allocation43_spill] sm:$0xff] }
 0x56a   : > { %11907 = vmatprep.mubr.msk.f32.mxu1 %vm4691_vm7, %v14728_v23  ;;  %v15967_v23 = vld [vmem:[#allocation29_spill] sm:$0xff] }
 0x56d   : > { %11908 = vmatmul.mubr.msk.f32.gmra.mrb[56].mxu1 %vm4691_vm7, %v14732_v24  ;;  %v15968_v24 = vld [vmem:[#allocation26_spill] sm:$0xff] }
 0x56e   : > { %11910 = vmatprep.mubr.msk.f32.mxu1 %vm4691_vm7, %v14736_v40  ;;  %v7794_v40 = vld [vmem:[#allocation5 + $0x229] sm:$0xff] }
 0x571   : > { %11911 = vmatmul.mubr.msk.f32.gmra.mrb[58].mxu1 %vm4691_vm7, %v14740_v34  ;;  %v7795_v34 = vld [vmem:[#allocation5 + $0x231] sm:$0xff] }
 0x572   : > { %11913 = vmatprep.mubr.msk.f32.mxu1 %vm4691_vm7, %v14935_v26 }
 0x575   : > { %11914 = vmatmul.mubr.msk.f32.gmra.mrb[60].mxu1 %vm4691_vm7, %v14939_v17  ;;  %v15268_v17 = vld [vmem:[#allocation2] sm:$0xff] }
 0x576   : > { %11916 = vmatprep.mubr.msk.f32.mxu1 %vm4691_vm7, %v7018_v44 }
 0x579   : > { %11917 = vmatmul.mubr.msk.f32.gmra.mrb[62].mxu1 %vm4691_vm7, %v7019_v53 }
 0x57a   : > { %11923 = vmatprep.mubr.msk.f32.mxu1 %vm4691_vm7, %v7376_v13  ;;  %v15296_v13 = vld [vmem:[#allocation2 + $0x30] sm:$0xff] }
 0x57d   : > { %11924 = vmatmul.mubr.msk.f32.vlgmr.msra.gmra.mrb[32].mxu1 %vm4691_vm7, %v7377_v33 }
 0x57e   : > { %12208 = vmatpush3.bf16.msra.mxu1 %v12205_v30  ;;  %11926 = vmatprep.mubr.msk.f32.mxu1 %vm4691_vm7, %v7378_v4  ;;  %v8584_v30 = vld [vmem:[%s15700_s9] sm:$0xff] }
 0x57f   : > { %12073 = vmatprep.subr.mxu0 %v8584_v30 }
 0x581   : > { %11927 = vmatmul.mubr.msk.f32.gmra.mrb[34].mxu1 %vm4691_vm7, %v7379_v15 }
 0x582   : > { %11929 = vmatprep.mubr.msk.f32.mxu1 %vm4691_vm7, %v7380_v21 }
 0x585   : > { %11930 = vmatmul.mubr.msk.f32.gmra.mrb[36].mxu1 %vm4691_vm7, %v7381_v9 }
 0x586   : > { %11932 = vmatprep.mubr.msk.f32.mxu1 %vm4691_vm7, %v7382_v38 }
 0x589   : > { %11933 = vmatmul.mubr.msk.f32.gmra.mrb[38].mxu1 %vm4691_vm7, %v7383_v42  ;;  %v15306_v42 = vld [vmem:[#allocation2 + $0x40] sm:$0xff] }
 0x58a   : > { %11935 = vmatprep.mubr.msk.f32.mxu1 %vm4691_vm7, %v7384_v3  ;;  %v15308_v3 = vld [vmem:[#allocation2 + $0x48] sm:$0xff] }
 0x58d   : > { %11936 = vmatmul.mubr.msk.f32.gmra.mrb[40].mxu1 %vm4691_vm7, %v7385_v63 }
 0x58e   : > { %11938 = vmatprep.mubr.msk.f32.mxu1 %vm4691_vm7, %v7386_v14 }
 0x591   : > { %11939 = vmatmul.mubr.msk.f32.gmra.mrb[42].mxu1 %vm4691_vm7, %v7387_v20 }
 0x592   : > { %11941 = vmatprep.mubr.msk.f32.mxu1 %vm4691_vm7, %v7388_v39 }
 0x595   : > { %11942 = vmatmul.mubr.msk.f32.gmra.mrb[44].mxu1 %vm4691_vm7, %v7389_v1 }
 0x596   : > { %11944 = vmatprep.mubr.msk.f32.mxu1 %vm4691_vm7, %v7390_v5 }
 0x599   : > { %11945 = vmatmul.mubr.msk.f32.gmra.mrb[46].mxu1 %vm4691_vm7, %v14538_v8  ;;  %v7406_v8 = vld [vmem:[#allocation5 + $0x228] sm:$0xff] }
 0x59a   : > { %11947 = vmatprep.mubr.msk.f32.mxu1 %vm4691_vm7, %v14546_v58  ;;  %v7407_v58 = vld [vmem:[#allocation5 + $0x230] sm:$0xff] }
 0x59d   : > { %11948 = vmatmul.mubr.msk.f32.gmra.mrb[48].mxu1 %vm4691_vm7, %v14552_v12  ;;  %v15954_v12 = vld [vmem:[#allocation17_spill] sm:$0xff] }
 0x59e   : > { %11950 = vmatprep.mubr.msk.f32.mxu1 %vm4691_vm7, %v14560_v60  ;;  %v15955_v60 = vld [vmem:[#allocation36_spill] sm:$0xff] }
 0x5a1   : > { %11951 = vmatmul.mubr.msk.f32.gmra.mrb[50].mxu1 %vm4691_vm7, %v14566_v62  ;;  %v15956_v62 = vld [vmem:[#allocation18_spill] sm:$0xff] }
 0x5a2   : > { %11953 = vmatprep.mubr.msk.f32.mxu1 %vm4691_vm7, %v14574_v0  ;;  %v15957_v0 = vld [vmem:[#allocation19_spill] sm:$0xff] }
 0x5a5   : > { %11954 = vmatmul.mubr.msk.f32.gmra.mrb[52].mxu1 %vm4691_vm7, %v14580_v41  ;;  %v15958_v41 = vld [vmem:[#allocation38_spill] sm:$0xff] }
 0x5a6   : > { %11956 = vmatprep.mubr.msk.f32.mxu1 %vm4691_vm7, %v14588_v7  ;;  %v15959_v7 = vld [vmem:[#allocation20_spill] sm:$0xff] }
 0x5a9   : > { %11957 = vmatmul.mubr.msk.f32.gmra.mrb[54].mxu1 %vm4691_vm7, %v14594_v36  ;;  %v15960_v36 = vld [vmem:[#allocation39_spill] sm:$0xff] }
 0x5aa   : > { %11959 = vmatprep.mubr.msk.f32.mxu1 %vm4691_vm7, %v15924_v45  ;;  %v15270_v45 = vld [vmem:[#allocation2 + $0x8] sm:$0xff] }
 0x5ad   : > { %11960 = vmatmul.mubr.msk.f32.gmra.mrb[56].mxu1 %vm4691_vm7, %v15925_v51 }
 0x5ae   : > { %11962 = vmatprep.mubr.msk.f32.mxu1 %vm4691_vm7, %v15926_v19 }
 0x5b1   : > { %11963 = vmatmul.mubr.msk.f32.gmra.mrb[58].mxu1 %vm4691_vm7, %v15927_v48 }
 0x5b2   : > { %11965 = vmatprep.mubr.msk.f32.mxu1 %vm4691_vm7, %v15005_v10 }
 0x5b5   : > { %11966 = vmatmul.mubr.msk.f32.gmra.mrb[60].mxu1 %vm4691_vm7, %v15009_v52 }
 0x5b6   : > { %11968 = vmatprep.mubr.msk.f32.mxu1 %vm4691_vm7, %v7406_v8  ;;  %v15316_v8 = vld [vmem:[#allocation2 + $0x50] sm:$0xff] }
 0x5b9   : > { %11969 = vmatmul.mubr.msk.f32.gmra.mrb[62].mxu1 %vm4691_vm7, %v7407_v58  ;;  %v15318_v58 = vld [vmem:[#allocation2 + $0x58] sm:$0xff] }
 0x5ba   : > { %11975 = vmatprep.mubr.msk.f32.mxu1 %vm4691_vm7, %v15930_v59  ;;  %v15276_v59 = vld [vmem:[#allocation2 + $0x10] sm:$0xff] }
 0x5bd   : > { %11976 = vmatmul.mubr.msk.f32.vlgmr.msra.gmra.mrb[32].mxu1 %vm4691_vm7, %v15931_v49  ;;  %v15278_v49 = vld [vmem:[#allocation2 + $0x18] sm:$0xff] }
 0x5be   : > { %11978 = vmatprep.mubr.msk.f32.mxu1 %vm4691_vm7, %v15932_v61 }
 0x5c1   : > { %11979 = vmatmul.mubr.msk.f32.gmra.mrb[34].mxu1 %vm4691_vm7, %v15933_v54 }
 0x5c2   : > { %11981 = vmatprep.mubr.msk.f32.mxu1 %vm4691_vm7, %v15934_v6 }
 0x5c5   : > { %11982 = vmatmul.mubr.msk.f32.gmra.mrb[36].mxu1 %vm4691_vm7, %v15935_v56 }
 0x5c6   : > { %11984 = vmatprep.mubr.msk.f32.mxu1 %vm4691_vm7, %v15954_v12 }
 0x5c9   : > { %11985 = vmatmul.mubr.msk.f32.gmra.mrb[38].mxu1 %vm4691_vm7, %v15955_v60 }
 0x5ca   : > { %11987 = vmatprep.mubr.msk.f32.mxu1 %vm4691_vm7, %v15956_v62 }
 0x5cd   : > { %11988 = vmatmul.mubr.msk.f32.gmra.mrb[40].mxu1 %vm4691_vm7, %v15939_v50  ;;  %v15288_v50 = vld [vmem:[#allocation2 + $0x28] sm:$0xff] }
 0x5ce   : > { %11990 = vmatprep.mubr.msk.f32.mxu1 %vm4691_vm7, %v15957_v0 }
 0x5d1   : > { %11991 = vmatmul.mubr.msk.f32.gmra.mrb[42].mxu1 %vm4691_vm7, %v15958_v41 }
 0x5d2   : > { %11993 = vmatprep.mubr.msk.f32.mxu1 %vm4691_vm7, %v15959_v7 }
 0x5d5   : > { %11994 = vmatmul.mubr.msk.f32.gmra.mrb[44].mxu1 %vm4691_vm7, %v15960_v36  ;;  %v15326_v36 = vld [vmem:[#allocation2 + $0x60] sm:$0xff] }
 0x5d6   : > { %11996 = vmatprep.mubr.msk.f32.mxu1 %vm4691_vm7, %v15961_v16  ;;  %v15328_v16 = vld [vmem:[#allocation2 + $0x68] sm:$0xff] }
 0x5d9   : > { %11997 = vmatmul.mubr.msk.f32.gmra.mrb[46].mxu1 %vm4691_vm7, %v15962_v18 }
 0x5da   : > { %11999 = vmatprep.mubr.msk.f32.mxu1 %vm4691_vm7, %v15963_v35 }
 0x5dd   : > { %12000 = vmatmul.mubr.msk.f32.gmra.mrb[48].mxu1 %vm4691_vm7, %v15947_v27 }
 0x5de   : > { %12002 = vmatprep.mubr.msk.f32.mxu1 %vm4691_vm7, %v15948_v55 }
 0x5e1   : > { %12003 = vmatmul.mubr.msk.f32.gmra.mrb[50].mxu1 %vm4691_vm7, %v15949_v32 }
 0x5e2   : > { %12005 = vmatprep.mubr.msk.f32.mxu1 %vm4691_vm7, %v15964_v25 }
 0x5e5   : > { %12006 = vmatmul.mubr.msk.f32.gmra.mrb[52].mxu1 %vm4691_vm7, %v15965_v28 }
 0x5e6   : > { %12008 = vmatprep.mubr.msk.f32.mxu1 %vm4691_vm7, %v15966_v22 }
 0x5e9   : > { %12009 = vmatmul.mubr.msk.f32.gmra.mrb[54].mxu1 %vm4691_vm7, %v15967_v23 }
 0x5ea   : > { %12011 = vmatprep.mubr.msk.f32.mxu1 %vm4691_vm7, %v15953_v47  ;;  %v15286_v47 = vld [vmem:[#allocation2 + $0x20] sm:$0xff] }
 0x5ed   : > { %12012 = vmatmul.mubr.msk.f32.gmra.mrb[56].mxu1 %vm4691_vm7, %v15968_v24  ;;  %v15336_v24 = vld [vmem:[#allocation2 + $0x70] sm:$0xff] }
 0x5ee   : > { %12014 = vmatprep.mubr.msk.f32.mxu1 %vm4691_vm7, %v14864_v31  ;;  %v15265_v31 = vld [vmem:[%s539_s26] ss:$0 sm:$0xff] }
 0x5f1   : > { %12015 = vmatmul.mubr.msk.f32.gmra.mrb[58].mxu1 %vm4691_vm7, %v14868_v43 }
 0x5f2   : > { %12017 = vmatprep.mubr.msk.f32.mxu1 %vm4691_vm7, %v15075_v46 }
 0x5f5   : > { %12018 = vmatmul.mubr.msk.f32.gmra.mrb[60].mxu1 %vm4691_vm7, %v15079_v29 }
 0x5f6   : > { %12020 = vmatprep.mubr.msk.f32.mxu1 %vm4691_vm7, %v7794_v40  ;;  %v15338_v40 = vld [vmem:[#allocation2 + $0x78] sm:$0xff] }
 0x5f9   : > { %12021 = vmatmul.mubr.msk.f32.gmra.mrb[62].mxu1 %vm4691_vm7, %v7795_v34 }
 0x690   : > { %v11977_v43 = vpop.f32.mrb[32].mxu1 }
 0x691   : > { %v8160_v11 = vadd.f32 %v11977_v43, %v15265_v31  ;;  %v7961_v26 = vpop.f32.mrb[33].mxu1 }
 0x692   : > { %v8159_v51 = vadd.f32 %v15265_v31, %v7961_v26 }
 0x693   : > { %v8224_v10 = vadd.f32 %v15270_v45, %v8160_v11 }
 0x694   : > { %v8223_v19 = vadd.f32 %v15268_v17, %v8159_v51  ;;  %v11980_v48 = vpop.f32.mrb[34].mxu1 }
 0x695   : > { %v8162_v52 = vadd.f32 %v11980_v48, %v15265_v31  ;;  %v7971_v57 = vpop.f32.mrb[35].mxu1  ;;  %v15348_v48 = vld [vmem:[#allocation2 + $0x88] sm:$0xff] }
 0x696   : > { %v8161_v61 = vadd.f32 %v15265_v31, %v7971_v57  ;;  %12025 = vmatprep.mubr.msk.f32.mxu0 %vm1167_vm6, %v8223_v19  ;;  %v15346_v19 = vld [vmem:[#allocation2 + $0x80] sm:$0xff] }
 0x697   : > { %12026 = vmatmul.mubr.msk.f32.vlgmr.msra.gmra.mrb[32].mxu0 %vm1167_vm6, %v8224_v10  ;;  %v8226_v56 = vadd.f32 %v15278_v49, %v8162_v52 }
 0x698   : > { %v8225_v54 = vadd.f32 %v15276_v59, %v8161_v61  ;;  %12074 = vmatpush3.msra.mxu0 %v8584_v30  ;;  %v11983_v6 = vpop.f32.mrb[36].mxu1 }
 0x699   : > { %v8164_v37 = vadd.f32 %v11983_v6, %v15265_v31  ;;  %v7981_v29 = vpop.f32.mrb[37].mxu1 }
 0x69a   : > { %v8163_v27 = vadd.f32 %v15265_v31, %v7981_v29  ;;  %12028 = vmatprep.mubr.msk.f32.mxu0 %vm1167_vm6, %v8225_v54 }
 0x69b   : > { %12029 = vmatmul.mubr.msk.f32.gmra.mrb[34].mxu0 %vm1167_vm6, %v8226_v56  ;;  %v8228_v46 = vadd.f32 %v15288_v50, %v8164_v37  ;;  %v15356_v56 = vld [vmem:[#allocation2 + $0x90] sm:$0xff]  ;;  %v15358_v37 = vld [vmem:[#allocation2 + $0x98] sm:$0xff] }
 0x69c   : > { %v8227_v55 = vadd.f32 %v15286_v47, %v8163_v27  ;;  %v11986_v32 = vpop.f32.mrb[38].mxu1 }
 0x69d   : > { %v8166_v44 = vadd.f32 %v11986_v32, %v15265_v31  ;;  %v7991_v53 = vpop.f32.mrb[39].mxu1 }
 0x69e   : > { %v8165_v33 = vadd.f32 %v15265_v31, %v7991_v53  ;;  %12031 = vmatprep.mubr.msk.f32.mxu0 %vm1167_vm6, %v8227_v55  ;;  %v15366_v53 = vld [vmem:[#allocation2 + $0xa0] sm:$0xff] }
 0x69f   : > { %12032 = vmatmul.mubr.msk.f32.gmra.mrb[36].mxu0 %vm1167_vm6, %v8228_v46  ;;  %v8230_v21 = vadd.f32 %v15298_v2, %v8166_v44 }
 0x6a0   : > { %v8229_v4 = vadd.f32 %v15296_v13, %v8165_v33  ;;  %v11989_v15 = vpop.f32.mrb[40].mxu1  ;;  %v15368_v33 = vld [vmem:[#allocation2 + $0xa8] sm:$0xff] }
 0x6a1   : > { %v8168_v9 = vadd.f32 %v11989_v15, %v15265_v31  ;;  %v8001_v38 = vpop.f32.mrb[41].mxu1 }
 0x6a2   : > { %v8167_v63 = vadd.f32 %v15265_v31, %v8001_v38  ;;  %12034 = vmatprep.mubr.msk.f32.mxu0 %vm1167_vm6, %v8229_v4 }
 0x6a3   : > { %12035 = vmatmul.mubr.msk.f32.gmra.mrb[38].mxu0 %vm1167_vm6, %v8230_v21  ;;  %v8232_v39 = vadd.f32 %v15308_v3, %v8168_v9 }
 0x6a4   : > { %v8231_v14 = vadd.f32 %v15306_v42, %v8167_v63  ;;  %v11992_v20 = vpop.f32.mrb[42].mxu1 }
 0x6a5   : > { %v8170_v1 = vadd.f32 %v11992_v20, %v15265_v31  ;;  %v8011_v5 = vpop.f32.mrb[43].mxu1  ;;  %v15378_v20 = vld [vmem:[#allocation2 + $0xb8] sm:$0xff] }
 0x6a6   : > { %v8169_v12 = vadd.f32 %v15265_v31, %v8011_v5  ;;  %12037 = vmatprep.mubr.msk.f32.mxu0 %vm1167_vm6, %v8231_v14  ;;  %v15376_v14 = vld [vmem:[#allocation2 + $0xb0] sm:$0xff] }
 0x6a7   : > { %12038 = vmatmul.mubr.msk.f32.gmra.mrb[40].mxu0 %vm1167_vm6, %v8232_v39  ;;  %v8234_v0 = vadd.f32 %v15318_v58, %v8170_v1 }
 0x6a8   : > { %v8233_v60 = vadd.f32 %v15316_v8, %v8169_v12  ;;  %v11995_v62 = vpop.f32.mrb[44].mxu1 }
 0x6a9   : > { %v8172_v41 = vadd.f32 %v11995_v62, %v15265_v31  ;;  %v8021_v7 = vpop.f32.mrb[45].mxu1 }
 0x6aa   : > { %v8171_v18 = vadd.f32 %v15265_v31, %v8021_v7  ;;  %12040 = vmatprep.mubr.msk.f32.mxu0 %vm1167_vm6, %v8233_v60 }
 0x6ab   : > { %12041 = vmatmul.mubr.msk.f32.gmra.mrb[42].mxu0 %vm1167_vm6, %v8234_v0  ;;  %v8236_v28 = vadd.f32 %v15328_v16, %v8172_v41  ;;  %v15386_v0 = vld [vmem:[#allocation2 + $0xc0] sm:$0xff]  ;;  %v15388_v41 = vld [vmem:[#allocation2 + $0xc8] sm:$0xff] }
 0x6ac   : > { %v8235_v35 = vadd.f32 %v15326_v36, %v8171_v18  ;;  %v11998_v25 = vpop.f32.mrb[46].mxu1 }
 0x6ad   : > { %v8174_v22 = vadd.f32 %v11998_v25, %v15265_v31  ;;  %v8031_v23 = vpop.f32.mrb[47].mxu1 }
 0x6ae   : > { %v8173_v34 = vadd.f32 %v15265_v31, %v8031_v23  ;;  %12043 = vmatprep.mubr.msk.f32.mxu0 %vm1167_vm6, %v8235_v35  ;;  %v8217_v23 = vld [vmem:[#allocation2 + $0xd0] sm:$0xff] }
 0x6af   : > { %12044 = vmatmul.mubr.msk.f32.gmra.mrb[44].mxu0 %vm1167_vm6, %v8236_v28  ;;  %v8238_v11 = vadd.f32 %v15338_v40, %v8174_v22 }
 0x6b0   : > { %v8237_v30 = vadd.f32 %v15336_v24, %v8173_v34  ;;  %v12001_v43 = vpop.f32.mrb[48].mxu1  ;;  %v8218_v34 = vld [vmem:[#allocation2 + $0xd8] sm:$0xff] }
 0x6b1   : > { %v8176_v26 = vadd.f32 %v12001_v43, %v15265_v31  ;;  %v8041_v51 = vpop.f32.mrb[49].mxu1 }
 0x6b2   : > { %v8175_v10 = vadd.f32 %v15265_v31, %v8041_v51  ;;  %12046 = vmatprep.mubr.msk.f32.mxu0 %vm1167_vm6, %v8237_v30 }
 0x6b3   : > { %12047 = vmatmul.mubr.msk.f32.gmra.mrb[46].mxu0 %vm1167_vm6, %v8238_v11  ;;  %v8240_v61 = vadd.f32 %v15348_v48, %v8176_v26 }
 0x6b4   : > { %v8239_v52 = vadd.f32 %v15346_v19, %v8175_v10  ;;  %v12004_v57 = vpop.f32.mrb[50].mxu1 }
 0x6b5   : > { %v8178_v54 = vadd.f32 %v12004_v57, %v15265_v31  ;;  %v8051_v6 = vpop.f32.mrb[51].mxu1  ;;  %v8220_v57 = vld [vmem:[#allocation2 + $0xe8] sm:$0xff] }
 0x6b6   : > { %v8177_v29 = vadd.f32 %v15265_v31, %v8051_v6  ;;  %12049 = vmatprep.mubr.msk.f32.mxu0 %vm1167_vm6, %v8239_v52  ;;  %v8219_v52 = vld [vmem:[#allocation2 + $0xe0] sm:$0xff] }
 0x6b7   : > { %12050 = vmatmul.mubr.msk.f32.gmra.mrb[48].mxu0 %vm1167_vm6, %v8240_v61  ;;  %v8242_v32 = vadd.f32 %v15358_v37, %v8178_v54 }
 0x6b8   : > { %v8241_v27 = vadd.f32 %v15356_v56, %v8177_v29  ;;  %v12007_v55 = vpop.f32.mrb[52].mxu1 }
 0x6b9   : > { %v8180_v46 = vadd.f32 %v12007_v55, %v15265_v31  ;;  %v8061_v44 = vpop.f32.mrb[53].mxu1 }
 0x6ba   : > { %v8179_v4 = vadd.f32 %v15265_v31, %v8061_v44  ;;  %12052 = vmatprep.mubr.msk.f32.mxu0 %vm1167_vm6, %v8241_v27 }
 0x6bb   : > { %12053 = vmatmul.mubr.msk.f32.gmra.mrb[50].mxu0 %vm1167_vm6, %v8242_v32  ;;  %v8244_v9 = vadd.f32 %v15368_v33, %v8180_v46  ;;  %v8221_v32 = vld [vmem:[#allocation2 + $0xf0] sm:$0xff]  ;;  %v8222_v46 = vld [vmem:[#allocation2 + $0xf8] sm:$0xff] }
 0x6bc   : > { %v8243_v15 = vadd.f32 %v15366_v53, %v8179_v4  ;;  %v12010_v21 = vpop.f32.mrb[54].mxu1 }
 0x6bd   : > { %v8182_v38 = vadd.f32 %v12010_v21, %v15265_v31  ;;  %v8071_v63 = vpop.f32.mrb[55].mxu1 }
 0x6be   : > { %v8181_v39 = vadd.f32 %v15265_v31, %v8071_v63  ;;  %12055 = vmatprep.mubr.msk.f32.mxu0 %vm1167_vm6, %v8243_v15 }
 0x6bf   : > { %12056 = vmatmul.mubr.msk.f32.gmra.mrb[52].mxu0 %vm1167_vm6, %v8244_v9  ;;  %v8246_v12 = vadd.f32 %v15378_v20, %v8182_v38  ;;  %v8949_v38 = vld [vmem:[#allocation3 + $0x20] sm:$0xff] }
 0x6c0   : > { %v8245_v1 = vadd.f32 %v15376_v14, %v8181_v39  ;;  %v12013_v5 = vpop.f32.mrb[56].mxu1 }
 0x6c1   : > { %v8184_v60 = vadd.f32 %v12013_v5, %v15265_v31  ;;  %v8081_v62 = vpop.f32.mrb[57].mxu1 }
 0x6c2   : > { %v8183_v7 = vadd.f32 %v15265_v31, %v8081_v62  ;;  %12058 = vmatprep.mubr.msk.f32.mxu0 %vm1167_vm6, %v8245_v1  ;;  %v8952_v1 = vld [vmem:[#allocation3 + $0x38] sm:$0xff] }
 0x6c3   : > { %12059 = vmatmul.mubr.msk.f32.gmra.mrb[54].mxu0 %vm1167_vm6, %v8246_v12  ;;  %v8248_v25 = vadd.f32 %v15388_v41, %v8184_v60  ;;  %v8951_v60 = vld [vmem:[#allocation3 + $0x30] sm:$0xff] }
 0x6c4   : > { %v8247_v18 = vadd.f32 %v15386_v0, %v8183_v7  ;;  %v12016_v35 = vpop.f32.mrb[58].mxu1 }
 0x6c5   : > { %v8186_v28 = vadd.f32 %v12016_v35, %v15265_v31  ;;  %v8091_v22 = vpop.f32.mrb[59].mxu1 }
 0x6c6   : > { %v8185_v30 = vadd.f32 %v15265_v31, %v8091_v22  ;;  %12061 = vmatprep.mubr.msk.f32.mxu0 %vm1167_vm6, %v8247_v18  ;;  %v8954_v18 = vld [vmem:[#allocation3 + $0x48] sm:$0xff] }
 0x6c7   : > { %12062 = vmatmul.mubr.msk.f32.gmra.mrb[56].mxu0 %vm1167_vm6, %v8248_v25  ;;  %v8250_v26 = vadd.f32 %v8218_v34, %v8186_v28  ;;  %v8953_v28 = vld [vmem:[#allocation3 + $0x40] sm:$0xff] }
 0x6c8   : > { %v8249_v43 = vadd.f32 %v8217_v23, %v8185_v30  ;;  %v12019_v11 = vpop.f32.mrb[60].mxu1 }
 0x6c9   : > { %v8188_v51 = vadd.f32 %v12019_v11, %v15265_v31  ;;  %v8101_v10 = vpop.f32.mrb[61].mxu1 }
 0x6ca   : > { %v8187_v61 = vadd.f32 %v15265_v31, %v8101_v10  ;;  %12064 = vmatprep.mubr.msk.f32.mxu0 %vm1167_vm6, %v8249_v43  ;;  %v8956_v43 = vld [vmem:[#allocation3 + $0x58] sm:$0xff] }
 0x6cb   : > { %12065 = vmatmul.mubr.msk.f32.gmra.mrb[58].mxu0 %vm1167_vm6, %v8250_v26  ;;  %v8252_v29 = vadd.f32 %v8220_v57, %v8188_v51  ;;  %v8955_v51 = vld [vmem:[#allocation3 + $0x50] sm:$0xff] }
 0x6cc   : > { %v8251_v54 = vadd.f32 %v8219_v52, %v8187_v61  ;;  %v12022_v6 = vpop.f32.mrb[62].mxu1 }
 0x6cd   : > { %v8190_v27 = vadd.f32 %v12022_v6, %v15265_v31  ;;  %v8111_v55 = vpop.f32.mrb[63].mxu1 }
 0x6ce   : > { %v8189_v44 = vadd.f32 %v15265_v31, %v8111_v55  ;;  %12067 = vmatprep.mubr.msk.f32.mxu0 %vm1167_vm6, %v8251_v54  ;;  %v10216_v31 = vld [vmem:[%s546_s30] ss:$0 sm:$0xff]  ;;  %v8958_v54 = vld [vmem:[#allocation3 + $0x68] sm:$0xff] }
 0x6cf   : > { %12068 = vmatmul.mubr.msk.f32.gmra.mrb[60].mxu0 %vm1167_vm6, %v8252_v29  ;;  %v8254_v15 = vadd.f32 %v8222_v46, %v8190_v27  ;;  %v8957_v27 = vld [vmem:[#allocation3 + $0x60] sm:$0xff] }
 0x6d0   : > { %v8253_v4 = vadd.f32 %v8221_v32, %v8189_v44 }
 0x6d2   : > { %12070 = vmatprep.mubr.msk.f32.mxu0 %vm1167_vm6, %v8253_v4  ;;  %v8960_v4 = vld [vmem:[#allocation3 + $0x78] sm:$0xff] }
 0x6d3   : > { %12071 = vmatmul.mubr.msk.f32.gmra.mrb[62].mxu0 %vm1167_vm6, %v8254_v15 }
 0x6d4   : > { %12075 = vmatprep.mubr.msk.f32.mxu0 %vm1167_vm6, %v15268_v17  ;;  %v10249_v17 = vld [vmem:[%s15969_s14] ss:$0 sm:$0xff] }
 0x6d7   : > { %12076 = vmatmul.mubr.msk.f32.vlgmr.msra.gmra.mrb[32].mxu0 %vm1167_vm6, %v15270_v45 }
 0x6d8   : > { %12078 = vmatprep.mubr.msk.f32.mxu0 %vm1167_vm6, %v15276_v59 }
 0x6db   : > { %12079 = vmatmul.mubr.msk.f32.gmra.mrb[34].mxu0 %vm1167_vm6, %v15278_v49  ;;  %v15475_v49 = vadd.f32 %v10249_v17, %v10216_v31 }
 0x6dc   : > { %12081 = vmatprep.mubr.msk.f32.mxu0 %vm1167_vm6, %v15286_v47 }
 0x6df   : > { %12082 = vmatmul.mubr.msk.f32.gmra.mrb[36].mxu0 %vm1167_vm6, %v15288_v50  ;;  %v8946_v50 = vld [vmem:[#allocation3 + $0x8] sm:$0xff] }
 0x6e0   : > { %12084 = vmatprep.mubr.msk.f32.mxu0 %vm1167_vm6, %v15296_v13 }
 0x6e3   : > { %12085 = vmatmul.mubr.msk.f32.gmra.mrb[38].mxu0 %vm1167_vm6, %v15298_v2 }
 0x6e4   : > { %12087 = vmatprep.mubr.msk.f32.mxu0 %vm1167_vm6, %v15306_v42  ;;  %v8945_v42 = vld [vmem:[#allocation3] sm:$0xff] }
 0x6e7   : > { %12088 = vmatmul.mubr.msk.f32.gmra.mrb[40].mxu0 %vm1167_vm6, %v15308_v3 }
 0x6e8   : > { %12090 = vmatprep.mubr.msk.f32.mxu0 %vm1167_vm6, %v15316_v8 }
 0x6eb   : > { %12091 = vmatmul.mubr.msk.f32.gmra.mrb[42].mxu0 %vm1167_vm6, %v15318_v58  ;;  %v8948_v58 = vld [vmem:[#allocation3 + $0x18] sm:$0xff] }
 0x6ec   : > { %12093 = vmatprep.mubr.msk.f32.mxu0 %vm1167_vm6, %v15326_v36 }
 0x6ef   : > { %12094 = vmatmul.mubr.msk.f32.gmra.mrb[44].mxu0 %vm1167_vm6, %v15328_v16 }
 0x6f0   : > { %12096 = vmatprep.mubr.msk.f32.mxu0 %vm1167_vm6, %v15336_v24 }
 0x6f3   : > { %12097 = vmatmul.mubr.msk.f32.gmra.mrb[46].mxu0 %vm1167_vm6, %v15338_v40  ;;  %v8947_v40 = vld [vmem:[#allocation3 + $0x10] sm:$0xff] }
 0x6f4   : > { %12099 = vmatprep.mubr.msk.f32.mxu0 %vm1167_vm6, %v15346_v19 }
 0x6f7   : > { %12100 = vmatmul.mubr.msk.f32.gmra.mrb[48].mxu0 %vm1167_vm6, %v15348_v48 }
 0x6f8   : > { %12102 = vmatprep.mubr.msk.f32.mxu0 %vm1167_vm6, %v15356_v56 }
 0x6fb   : > { %12103 = vmatmul.mubr.msk.f32.gmra.mrb[50].mxu0 %vm1167_vm6, %v15358_v37 }
 0x6fc   : > { %12105 = vmatprep.mubr.msk.f32.mxu0 %vm1167_vm6, %v15366_v53 }
 0x6ff   : > { %12106 = vmatmul.mubr.msk.f32.gmra.mrb[52].mxu0 %vm1167_vm6, %v15368_v33  ;;  %v8950_v33 = vld [vmem:[#allocation3 + $0x28] sm:$0xff] }
 0x700   : > { %12108 = vmatprep.mubr.msk.f32.mxu0 %vm1167_vm6, %v15376_v14 }
 0x703   : > { %12109 = vmatmul.mubr.msk.f32.gmra.mrb[54].mxu0 %vm1167_vm6, %v15378_v20 }
 0x704   : > { %12111 = vmatprep.mubr.msk.f32.mxu0 %vm1167_vm6, %v15386_v0 }
 0x707   : > { %12112 = vmatmul.mubr.msk.f32.gmra.mrb[56].mxu0 %vm1167_vm6, %v15388_v41 }
 0x708   : > { %12114 = vmatprep.mubr.msk.f32.mxu0 %vm1167_vm6, %v8217_v23 }
 0x70b   : > { %12115 = vmatmul.mubr.msk.f32.gmra.mrb[58].mxu0 %vm1167_vm6, %v8218_v34 }
 0x70c   : > { %12117 = vmatprep.mubr.msk.f32.mxu0 %vm1167_vm6, %v8219_v52 }
 0x70f   : > { %12118 = vmatmul.mubr.msk.f32.gmra.mrb[60].mxu0 %vm1167_vm6, %v8220_v57 }
 0x710   : > { %12120 = vmatprep.mubr.msk.f32.mxu0 %vm1167_vm6, %v8221_v32 }
 0x713   : > { %12121 = vmatmul.mubr.msk.f32.gmra.mrb[62].mxu0 %vm1167_vm6, %v8222_v46 }
 0x7aa   : > { %v12077_v45 = vpop.f32.mrb[32].mxu0 }
 0x7ab   : > { %v12243_v59 = vadd.f32 %v12077_v45, %v10216_v31  ;;  %v8754_v47 = vpop.f32.mrb[33].mxu0 }
 0x7ac   : > { %v12245_v13 = vadd.f32 %v10216_v31, %v8754_v47 }
 0x7ad   : > { %v12244_v2 = vadd.f32 %v12243_v59, %v10249_v17 }
 0x7ae   : > { %v12246_v3 = vadd.f32 %v12245_v13, %v10249_v17  ;;  %v12080_v8 = vpop.f32.mrb[34].mxu0  ;;  %v8959_v17 = vld [vmem:[#allocation3 + $0x70] sm:$0xff]  ;;  %v8962_v13 = vld [vmem:[#allocation3 + $0x88] sm:$0xff] }
 0x7af   : > { %v8978_v36 = vadd.f32 %v12244_v2, %v8946_v50  ;;  %v12248_v16 = vadd.f32 %v15475_v49, %v12080_v8  ;;  %v8764_v24 = vpop.f32.mrb[35].mxu0 }
 0x7b0   : > { %v8977_v19 = vadd.f32 %v12246_v3, %v8945_v42  ;;  %v12250_v48 = vadd.f32 %v15475_v49, %v8764_v24  ;;  %v8961_v3 = vld [vmem:[#allocation3 + $0x80] sm:$0xff]  ;;  %v8964_v24 = vld [vmem:[#allocation3 + $0x98] sm:$0xff] }
 0x7b1   : > { %9010 = vst.msk [vmem:[#allocation2 + $0x8] sm:$0xff] %vm1167_vm6, %v8978_v36  ;;  %v8980_v56 = vadd.f32 %v12248_v16, %v8948_v58 }
 0x7b2   : > { %9009 = vst.msk [vmem:[#allocation2] sm:$0xff] %vm1167_vm6, %v8977_v19  ;;  %v8979_v37 = vadd.f32 %v12250_v48, %v8947_v40  ;;  %v12083_v53 = vpop.f32.mrb[36].mxu0  ;;  %v8963_v48 = vld [vmem:[#allocation3 + $0x90] sm:$0xff] }
 0x7b3   : > { %9012 = vst.msk [vmem:[#allocation2 + $0x18] sm:$0xff] %vm1167_vm6, %v8980_v56  ;;  %v12252_v21 = vadd.f32 %v15475_v49, %v12083_v53  ;;  %v8774_v9 = vpop.f32.mrb[37].mxu0 }
 0x7b4   : > { %9011 = vst.msk [vmem:[#allocation2 + $0x10] sm:$0xff] %vm1167_vm6, %v8979_v37  ;;  %v12254_v63 = vadd.f32 %v15475_v49, %v8774_v9 }
 0x7b5   : > { %v8982_v14 = vadd.f32 %v12252_v21, %v8950_v33  ;;  %v8966_v21 = vld [vmem:[#allocation3 + $0xa8] sm:$0xff] }
 0x7b6   : > { %v8981_v20 = vadd.f32 %v12254_v63, %v8949_v38  ;;  %v12086_v39 = vpop.f32.mrb[38].mxu0  ;;  %v8965_v63 = vld [vmem:[#allocation3 + $0xa0] sm:$0xff] }
 0x7b7   : > { %9014 = vst.msk [vmem:[#allocation2 + $0x28] sm:$0xff] %vm1167_vm6, %v8982_v14  ;;  %v12256_v5 = vadd.f32 %v15475_v49, %v12086_v39  ;;  %v8784_v12 = vpop.f32.mrb[39].mxu0 }
 0x7b8   : > { %9013 = vst.msk [vmem:[#allocation2 + $0x20] sm:$0xff] %vm1167_vm6, %v8981_v20  ;;  %v12258_v62 = vadd.f32 %v15475_v49, %v8784_v12 }
 0x7b9   : > { %v8984_v0 = vadd.f32 %v12256_v5, %v8952_v1  ;;  %v8968_v5 = vld [vmem:[#allocation3 + $0xb8] sm:$0xff] }
 0x7ba   : > { %v8983_v41 = vadd.f32 %v12258_v62, %v8951_v60  ;;  %v12089_v7 = vpop.f32.mrb[40].mxu0  ;;  %v8967_v62 = vld [vmem:[#allocation3 + $0xb0] sm:$0xff] }
 0x7bb   : > { %9016 = vst.msk [vmem:[#allocation2 + $0x38] sm:$0xff] %vm1167_vm6, %v8984_v0  ;;  %v12260_v35 = vadd.f32 %v15475_v49, %v12089_v7  ;;  %v8794_v25 = vpop.f32.mrb[41].mxu0 }
 0x7bc   : > { %9015 = vst.msk [vmem:[#allocation2 + $0x30] sm:$0xff] %vm1167_vm6, %v8983_v41  ;;  %v12262_v22 = vadd.f32 %v15475_v49, %v8794_v25 }
 0x7bd   : > { %v8986_v23 = vadd.f32 %v12260_v35, %v8954_v18  ;;  %v8970_v35 = vld [vmem:[#allocation3 + $0xc8] sm:$0xff] }
 0x7be   : > { %v8985_v34 = vadd.f32 %v12262_v22, %v8953_v28  ;;  %v12092_v30 = vpop.f32.mrb[42].mxu0  ;;  %v8969_v22 = vld [vmem:[#allocation3 + $0xc0] sm:$0xff] }
 0x7bf   : > { %9018 = vst.msk [vmem:[#allocation2 + $0x48] sm:$0xff] %vm1167_vm6, %v8986_v23  ;;  %v12264_v11 = vadd.f32 %v15475_v49, %v12092_v30  ;;  %v8804_v26 = vpop.f32.mrb[43].mxu0 }
 0x7c0   : > { %9017 = vst.msk [vmem:[#allocation2 + $0x40] sm:$0xff] %vm1167_vm6, %v8985_v34  ;;  %v12266_v10 = vadd.f32 %v15475_v49, %v8804_v26 }
 0x7c1   : > { %v8988_v52 = vadd.f32 %v12264_v11, %v8956_v43  ;;  %v8972_v11 = vld [vmem:[#allocation3 + $0xd8] sm:$0xff] }
 0x7c2   : > { %v8987_v57 = vadd.f32 %v12266_v10, %v8955_v51  ;;  %v12095_v61 = vpop.f32.mrb[44].mxu0  ;;  %v8971_v10 = vld [vmem:[#allocation3 + $0xd0] sm:$0xff] }
 0x7c3   : > { %9020 = vst.msk [vmem:[#allocation2 + $0x58] sm:$0xff] %vm1167_vm6, %v8988_v52  ;;  %v12268_v6 = vadd.f32 %v15475_v49, %v12095_v61  ;;  %v8814_v29 = vpop.f32.mrb[45].mxu0 }
 0x7c4   : > { %9019 = vst.msk [vmem:[#allocation2 + $0x50] sm:$0xff] %vm1167_vm6, %v8987_v57  ;;  %v12270_v55 = vadd.f32 %v15475_v49, %v8814_v29 }
 0x7c5   : > { %v8990_v32 = vadd.f32 %v12268_v6, %v8958_v54  ;;  %v8974_v6 = vld [vmem:[#allocation3 + $0xe8] sm:$0xff] }
 0x7c6   : > { %v8989_v46 = vadd.f32 %v12270_v55, %v8957_v27  ;;  %v12098_v44 = vpop.f32.mrb[46].mxu0  ;;  %v8973_v55 = vld [vmem:[#allocation3 + $0xe0] sm:$0xff] }
 0x7c7   : > { %9022 = vst.msk [vmem:[#allocation2 + $0x68] sm:$0xff] %vm1167_vm6, %v8990_v32  ;;  %v12272_v15 = vadd.f32 %v15475_v49, %v12098_v44  ;;  %v8824_v31 = vpop.f32.mrb[47].mxu0 }
 0x7c8   : > { %9021 = vst.msk [vmem:[#allocation2 + $0x60] sm:$0xff] %vm1167_vm6, %v8989_v46  ;;  %v12274_v45 = vadd.f32 %v15475_v49, %v8824_v31 }
 0x7c9   : > { %v8992_v59 = vadd.f32 %v12272_v15, %v8960_v4  ;;  %v8976_v15 = vld [vmem:[#allocation3 + $0xf8] sm:$0xff] }
 0x7ca   : > { %v8991_v47 = vadd.f32 %v12274_v45, %v8959_v17  ;;  %v12101_v50 = vpop.f32.mrb[48].mxu0  ;;  %v8975_v45 = vld [vmem:[#allocation3 + $0xf0] sm:$0xff] }
 0x7cb   : > { %9024 = vst.msk [vmem:[#allocation2 + $0x78] sm:$0xff] %vm1167_vm6, %v8992_v59  ;;  %v12276_v2 = vadd.f32 %v15475_v49, %v12101_v50  ;;  %v8834_v42 = vpop.f32.mrb[49].mxu0 }
 0x7cc   : > { %9023 = vst.msk [vmem:[#allocation2 + $0x70] sm:$0xff] %vm1167_vm6, %v8991_v47  ;;  %v12278_v8 = vadd.f32 %v15475_v49, %v8834_v42 }
 0x7cd   : > { %v8994_v58 = vadd.f32 %v12276_v2, %v8962_v13  ;;  %v9077_v13 = vld [vmem:[%s15970_s20] sm:$0xff] (!%p10282_p8) }
 0x7ce   : > { %v8993_v36 = vadd.f32 %v12278_v8, %v8961_v3  ;;  %v12104_v16 = vpop.f32.mrb[50].mxu0  ;;  %v9045_v2 = vld [vmem:[#allocation2] sm:$0xff] (!%p10282_p8)  ;;  %12123 = vmatprep.subr.mxu0 (!%p10282_p8), %v9077_v13  ;;  %12819 = vmatprep.subr.mxu1 (!%p10282_p8), %v9077_v13  ;;  %v9046_v3 = vld [vmem:[#allocation2 + $0x8] sm:$0xff] (!%p10282_p8) }
 0x7cf   : > { %9026 = vst.msk [vmem:[#allocation2 + $0x88] sm:$0xff] %vm1167_vm6, %v8994_v58  ;;  %v12280_v40 = vadd.f32 %v15475_v49, %v12104_v16  ;;  %v8844_v19 = vpop.f32.mrb[51].mxu0  ;;  %12124 = vmatpush3.msra.mxu0 (!%p10282_p8), %v9077_v13  ;;  %12820 = vmatpush3.msra.mxu1 (!%p10282_p8), %v9077_v13 }
 0x7d0   : > { %9025 = vst.msk [vmem:[#allocation2 + $0x80] sm:$0xff] %vm1167_vm6, %v8993_v36  ;;  %v12282_v56 = vadd.f32 %v15475_v49, %v8844_v19  ;;  %12125 = vmatprep.mubr.msk.f32.mxu0 (!%p10282_p8), %vm1167_vm6, %v9045_v2  ;;  %v9048_v36 = vld [vmem:[#allocation2 + $0x18] sm:$0xff] (!%p10282_p8)  ;;  %v9050_v19 = vld [vmem:[#allocation2 + $0x28] sm:$0xff] (!%p10282_p8) }
 0x7d1   : > { %v8996_v37 = vadd.f32 %v12280_v40, %v8964_v24  ;;  %12126 = vmatmul.mubr.msk.f32.vlgmr.msra.gmra.mrb[0].mxu0 (!%p10282_p8), %vm1167_vm6, %v9046_v3  ;;  %v9049_v24 = vld [vmem:[#allocation2 + $0x20] sm:$0xff] (!%p10282_p8) }
 0x7d2   : > { %v8995_v53 = vadd.f32 %v12282_v56, %v8963_v48  ;;  %v12107_v33 = vpop.f32.mrb[52].mxu0  ;;  %v9051_v56 = vld [vmem:[#allocation2 + $0x30] sm:$0xff] (!%p10282_p8) }
 0x7d3   : > { %9028 = vst.msk [vmem:[#allocation2 + $0x98] sm:$0xff] %vm1167_vm6, %v8996_v37  ;;  %v12284_v9 = vadd.f32 %v15475_v49, %v12107_v33  ;;  %v8854_v38 = vpop.f32.mrb[53].mxu0 }
 0x7d4   : > { %9027 = vst.msk [vmem:[#allocation2 + $0x90] sm:$0xff] %vm1167_vm6, %v8995_v53  ;;  %v12286_v14 = vadd.f32 %v15475_v49, %v8854_v38  ;;  %v9052_v53 = vld [vmem:[#allocation2 + $0x38] sm:$0xff] (!%p10282_p8)  ;;  %v9054_v38 = vld [vmem:[#allocation2 + $0x48] sm:$0xff] (!%p10282_p8) }
 0x7d5   : > { %v8998_v20 = vadd.f32 %v12284_v9, %v8966_v21  ;;  %v9053_v21 = vld [vmem:[#allocation2 + $0x40] sm:$0xff] (!%p10282_p8) }
 0x7d6   : > { %v8997_v39 = vadd.f32 %v12286_v14, %v8965_v63  ;;  %v12110_v1 = vpop.f32.mrb[54].mxu0  ;;  %v9062_v8 = vld [vmem:[#allocation2 + $0x88] sm:$0xff] (!%p10282_p8)  ;;  %v9055_v14 = vld [vmem:[#allocation2 + $0x50] sm:$0xff] (!%p10282_p8) }
 0x7d7   : > { %9030 = vst.msk [vmem:[#allocation2 + $0xa8] sm:$0xff] %vm1167_vm6, %v8998_v20  ;;  %v12288_v12 = vadd.f32 %v15475_v49, %v12110_v1  ;;  %v8864_v60 = vpop.f32.mrb[55].mxu0  ;;  %v9061_v42 = vld [vmem:[#allocation2 + $0x80] sm:$0xff] (!%p10282_p8) }
 0x7d8   : > { %9029 = vst.msk [vmem:[#allocation2 + $0xa0] sm:$0xff] %vm1167_vm6, %v8997_v39  ;;  %v12290_v0 = vadd.f32 %v15475_v49, %v8864_v60  ;;  %12149 = vmatprep.mubr.msk.f32.mxu1 (!%p10282_p8), %vm1167_vm6, %v9061_v42  ;;  %v9056_v39 = vld [vmem:[#allocation2 + $0x58] sm:$0xff] (!%p10282_p8)  ;;  %v9058_v60 = vld [vmem:[#allocation2 + $0x68] sm:$0xff] (!%p10282_p8) }
 0x7d9   : > { %v9000_v41 = vadd.f32 %v12288_v12, %v8968_v5  ;;  %12150 = vmatmul.mubr.msk.f32.vlgmr.msra.gmra.mrb[0].mxu1 (!%p10282_p8), %vm1167_vm6, %v9062_v8  ;;  %v9057_v5 = vld [vmem:[#allocation2 + $0x60] sm:$0xff] (!%p10282_p8) }
 0x7da   : > { %v8999_v7 = vadd.f32 %v12290_v0, %v8967_v62  ;;  %v12113_v18 = vpop.f32.mrb[56].mxu0  ;;  %v9064_v16 = vld [vmem:[#allocation2 + $0x98] sm:$0xff] (!%p10282_p8)  ;;  %v9059_v0 = vld [vmem:[#allocation2 + $0x70] sm:$0xff] (!%p10282_p8) }
 0x7db   : > { %9032 = vst.msk [vmem:[#allocation2 + $0xb8] sm:$0xff] %vm1167_vm6, %v9000_v41  ;;  %v12292_v25 = vadd.f32 %v15475_v49, %v12113_v18  ;;  %v8874_v28 = vpop.f32.mrb[57].mxu0  ;;  %v9063_v58 = vld [vmem:[#allocation2 + $0x90] sm:$0xff] (!%p10282_p8) }
 0x7dc   : > { %9031 = vst.msk [vmem:[#allocation2 + $0xb0] sm:$0xff] %vm1167_vm6, %v8999_v7  ;;  %v12294_v23 = vadd.f32 %v15475_v49, %v8874_v28  ;;  %12152 = vmatprep.mubr.msk.f32.mxu1 (!%p10282_p8), %vm1167_vm6, %v9063_v58  ;;  %v9060_v7 = vld [vmem:[#allocation2 + $0x78] sm:$0xff] (!%p10282_p8) }
 0x7dd   : > { %v9002_v34 = vadd.f32 %v12292_v25, %v8970_v35  ;;  %12153 = vmatmul.mubr.msk.f32.gmra.mrb[2].mxu1 (!%p10282_p8), %vm1167_vm6, %v9064_v16  ;;  %v15578_v35 = vld [vmem:[%s15971_s12] ss:$0 sm:$0xff] (!%p10282_p8) }
 0x7de   : > { %v9001_v30 = vadd.f32 %v12294_v23, %v8969_v22  ;;  %v12116_v43 = vpop.f32.mrb[58].mxu0  ;;  %v9066_v48 = vld [vmem:[#allocation2 + $0xa8] sm:$0xff] (!%p10282_p8) }
 0x7df   : > { %9034 = vst.msk [vmem:[#allocation2 + $0xc8] sm:$0xff] %vm1167_vm6, %v9002_v34  ;;  %v12296_v26 = vadd.f32 %v15475_v49, %v12116_v43  ;;  %v8884_v51 = vpop.f32.mrb[59].mxu0  ;;  %v9065_v40 = vld [vmem:[#allocation2 + $0xa0] sm:$0xff] (!%p10282_p8) }
 0x7e0   : > { %9033 = vst.msk [vmem:[#allocation2 + $0xc0] sm:$0xff] %vm1167_vm6, %v9001_v30  ;;  %v12298_v52 = vadd.f32 %v15475_v49, %v8884_v51  ;;  %12155 = vmatprep.mubr.msk.f32.mxu1 (!%p10282_p8), %vm1167_vm6, %v9065_v40 }
 0x7e1   : > { %v9004_v57 = vadd.f32 %v12296_v26, %v8972_v11  ;;  %12156 = vmatmul.mubr.msk.f32.gmra.mrb[4].mxu1 (!%p10282_p8), %vm1167_vm6, %v9066_v48 }
 0x7e2   : > { %v9003_v61 = vadd.f32 %v12298_v52, %v8971_v10  ;;  %v12119_v54 = vpop.f32.mrb[60].mxu0  ;;  %v9068_v33 = vld [vmem:[#allocation2 + $0xb8] sm:$0xff] (!%p10282_p8) }
 0x7e3   : > { %9036 = vst.msk [vmem:[#allocation2 + $0xd8] sm:$0xff] %vm1167_vm6, %v9004_v57  ;;  %v12300_v29 = vadd.f32 %v15475_v49, %v12119_v54  ;;  %v8894_v27 = vpop.f32.mrb[61].mxu0  ;;  %v9067_v37 = vld [vmem:[#allocation2 + $0xb0] sm:$0xff] (!%p10282_p8) }
 0x7e4   : > { %9035 = vst.msk [vmem:[#allocation2 + $0xd0] sm:$0xff] %vm1167_vm6, %v9003_v61  ;;  %v12302_v32 = vadd.f32 %v15475_v49, %v8894_v27  ;;  %12158 = vmatprep.mubr.msk.f32.mxu1 (!%p10282_p8), %vm1167_vm6, %v9067_v37 }
 0x7e5   : > { %v9006_v46 = vadd.f32 %v12300_v29, %v8974_v6  ;;  %12159 = vmatmul.mubr.msk.f32.gmra.mrb[6].mxu1 (!%p10282_p8), %vm1167_vm6, %v9068_v33 }
 0x7e6   : > { %v9005_v44 = vadd.f32 %v12302_v32, %v8973_v55  ;;  %v12122_v4 = vpop.f32.mrb[62].mxu0  ;;  %9044 = sbr.rel (%p10282_p8) target bundleno = 2266 (0x8da), region = 80  ;;  %v9070_v63 = vld [vmem:[#allocation2 + $0xc8] sm:$0xff] (!%p10282_p8) }
 0x7e7   : > { %9038 = vst.msk [vmem:[#allocation2 + $0xe8] sm:$0xff] %vm1167_vm6, %v9006_v46  ;;  %v12304_v31 = vadd.f32 %v15475_v49, %v12122_v4  ;;  %v8904_v17 = vpop.f32.mrb[63].mxu0  ;;  %v9069_v9 = vld [vmem:[#allocation2 + $0xc0] sm:$0xff] (!%p10282_p8) }
 0x7e8   : > { %9037 = vst.msk [vmem:[#allocation2 + $0xe0] sm:$0xff] %vm1167_vm6, %v9005_v44  ;;  %v12306_v59 = vadd.f32 %v15475_v49, %v8904_v17  ;;  %v9047_v49 = vld [vmem:[#allocation2 + $0x10] sm:$0xff] (!%p10282_p8)  ;;  %12161 = vmatprep.mubr.msk.f32.mxu1 (!%p10282_p8), %vm1167_vm6, %v9069_v9 }
 0x7e9   : > { %v9008_v47 = vadd.f32 %v12304_v31, %v8976_v15  ;;  %12128 = vmatprep.mubr.msk.f32.mxu0 (!%p10282_p8), %vm1167_vm6, %v9047_v49  ;;  %12162 = vmatmul.mubr.msk.f32.gmra.mrb[8].mxu1 (!%p10282_p8), %vm1167_vm6, %v9070_v63 }
 0x7ea   : > { %v9007_v50 = vadd.f32 %v12306_v59, %v8975_v45  ;;  %12129 = vmatmul.mubr.msk.f32.gmra.mrb[2].mxu0 (!%p10282_p8), %vm1167_vm6, %v9048_v36  ;;  %v9072_v1 = vld [vmem:[#allocation2 + $0xd8] sm:$0xff] (!%p10282_p8) }
 0x7eb   : > { %9040 = vst.msk [vmem:[#allocation2 + $0xf8] sm:$0xff] %vm1167_vm6, %v9008_v47  ;;  %12131 = vmatprep.mubr.msk.f32.mxu0 (!%p10282_p8), %vm1167_vm6, %v9049_v24  ;;  %v9071_v20 = vld [vmem:[#allocation2 + $0xd0] sm:$0xff] (!%p10282_p8) }
 0x7ec   : > { %9039 = vst.msk [vmem:[#allocation2 + $0xf0] sm:$0xff] %vm1167_vm6, %v9007_v50  ;;  %12164 = vmatprep.mubr.msk.f32.mxu1 (!%p10282_p8), %vm1167_vm6, %v9071_v20 }
 0x7ed   : > { %12165 = vmatmul.mubr.msk.f32.gmra.mrb[10].mxu1 %vm1167_vm6, %v9072_v1 }
 0x7ee   : > { %12132 = vmatmul.mubr.msk.f32.gmra.mrb[4].mxu0 %vm1167_vm6, %v9050_v19  ;;  %v9074_v62 = vld [vmem:[#allocation2 + $0xe8] sm:$0xff] }
 0x7ef   : > { %12134 = vmatprep.mubr.msk.f32.mxu0 %vm1167_vm6, %v9051_v56  ;;  %v9073_v12 = vld [vmem:[#allocation2 + $0xe0] sm:$0xff] }
 0x7f0   : > { %12167 = vmatprep.mubr.msk.f32.mxu1 %vm1167_vm6, %v9073_v12 }
 0x7f1   : > { %12168 = vmatmul.mubr.msk.f32.gmra.mrb[12].mxu1 %vm1167_vm6, %v9074_v62 }
 0x7f2   : > { %12135 = vmatmul.mubr.msk.f32.gmra.mrb[6].mxu0 %vm1167_vm6, %v9052_v53  ;;  %v9076_v18 = vld [vmem:[#allocation2 + $0xf8] sm:$0xff] }
 0x7f3   : > { %12137 = vmatprep.mubr.msk.f32.mxu0 %vm1167_vm6, %v9053_v21  ;;  %v9075_v41 = vld [vmem:[#allocation2 + $0xf0] sm:$0xff] }
 0x7f4   : > { %12170 = vmatprep.mubr.msk.f32.mxu1 %vm1167_vm6, %v9075_v41 }
 0x7f5   : > { %12171 = vmatmul.mubr.msk.f32.gmra.mrb[14].mxu1 %vm1167_vm6, %v9076_v18 }
 0x7f6   : > { %12138 = vmatmul.mubr.msk.f32.gmra.mrb[8].mxu0 %vm1167_vm6, %v9054_v38 }
 0x7f7   : > { %12140 = vmatprep.mubr.msk.f32.mxu0 %vm1167_vm6, %v9055_v14 }
 0x7fa   : > { %12141 = vmatmul.mubr.msk.f32.gmra.mrb[10].mxu0 %vm1167_vm6, %v9056_v39 }
 0x7fb   : > { %12143 = vmatprep.mubr.msk.f32.mxu0 %vm1167_vm6, %v9057_v5 }
 0x7fe   : > { %12144 = vmatmul.mubr.msk.f32.gmra.mrb[12].mxu0 %vm1167_vm6, %v9058_v60 }
 0x7ff   : > { %12146 = vmatprep.mubr.msk.f32.mxu0 %vm1167_vm6, %v9059_v0 }
 0x802   : > { %12147 = vmatmul.mubr.msk.f32.gmra.mrb[14].mxu0 %vm1167_vm6, %v9060_v7 }
 0x8a4   : > { %v12127_v25 = vpop.f32.mrb[0].mxu0 }
 0x8a5   : > { %v9253_v22 = vadd.f32 %v12127_v25, %v15578_v35  ;;  %v9247_v34 = vpop.f32.mrb[1].mxu0 }
 0x8a6   : > { %v9248_v43 = vadd.f32 %v15578_v35, %v9247_v34 }
 0x8a7   : > { %9407 = vst.msk [vmem:[%s13049_s27 + $0x8] sm:$0xff] %vm1167_vm6, %v9253_v22 }
 0x8a8   : > { %9406 = vst.msk [vmem:[%s13049_s27] sm:$0xff] %vm1167_vm6, %v9248_v43 }
 0x8ac   : > { %v12151_v28 = vpop.f32.mrb[0].mxu1 }
 0x8ad   : > { %v9333_v23 = vadd.f32 %v12151_v28, %v15578_v35  ;;  %v9327_v30 = vpop.f32.mrb[1].mxu1 }
 0x8ae   : > { %v9328_v11 = vadd.f32 %v15578_v35, %v9327_v30 }
 0x8af   : > { %9423 = vst.msk [vmem:[%s13049_s27 + $0x88] sm:$0xff] %vm1167_vm6, %v9333_v23 }
 0x8b0   : > { %9422 = vst.msk [vmem:[%s13049_s27 + $0x80] sm:$0xff] %vm1167_vm6, %v9328_v11  ;;  %v12154_v51 = vpop.f32.mrb[2].mxu1 }
 0x8b1   : > { %v9343_v52 = vadd.f32 %v12154_v51, %v15578_v35  ;;  %v9337_v61 = vpop.f32.mrb[3].mxu1 }
 0x8b2   : > { %v9338_v6 = vadd.f32 %v15578_v35, %v9337_v61 }
 0x8b3   : > { %9425 = vst.msk [vmem:[%s13049_s27 + $0x98] sm:$0xff] %vm1167_vm6, %v9343_v52 }
 0x8b4   : > { %9424 = vst.msk [vmem:[%s13049_s27 + $0x90] sm:$0xff] %vm1167_vm6, %v9338_v6  ;;  %v12157_v27 = vpop.f32.mrb[4].mxu1 }
 0x8b5   : > { %v9353_v32 = vadd.f32 %v12157_v27, %v15578_v35  ;;  %v9347_v44 = vpop.f32.mrb[5].mxu1 }
 0x8b6   : > { %v9348_v15 = vadd.f32 %v15578_v35, %v9347_v44 }
 0x8b7   : > { %9427 = vst.msk [vmem:[%s13049_s27 + $0xa8] sm:$0xff] %vm1167_vm6, %v9353_v32 }
 0x8b8   : > { %9426 = vst.msk [vmem:[%s13049_s27 + $0xa0] sm:$0xff] %vm1167_vm6, %v9348_v15  ;;  %v12160_v17 = vpop.f32.mrb[6].mxu1 }
 0x8b9   : > { %v9363_v59 = vadd.f32 %v12160_v17, %v15578_v35  ;;  %v9357_v50 = vpop.f32.mrb[7].mxu1 }
 0x8ba   : > { %v9358_v2 = vadd.f32 %v15578_v35, %v9357_v50 }
 0x8bb   : > { %9429 = vst.msk [vmem:[%s13049_s27 + $0xb8] sm:$0xff] %vm1167_vm6, %v9363_v59 }
 0x8bc   : > { %9428 = vst.msk [vmem:[%s13049_s27 + $0xb0] sm:$0xff] %vm1167_vm6, %v9358_v2  ;;  %v12163_v3 = vpop.f32.mrb[8].mxu1 }
 0x8bd   : > { %v12130_v26 = vpop.f32.mrb[2].mxu0  ;;  %v9373_v49 = vadd.f32 %v12163_v3, %v15578_v35  ;;  %v9367_v36 = vpop.f32.mrb[9].mxu1 }
 0x8be   : > { %v9263_v10 = vadd.f32 %v12130_v26, %v15578_v35  ;;  %v9257_v57 = vpop.f32.mrb[3].mxu0  ;;  %v9368_v24 = vadd.f32 %v15578_v35, %v9367_v36 }
 0x8bf   : > { %v9258_v54 = vadd.f32 %v15578_v35, %v9257_v57  ;;  %9431 = vst.msk [vmem:[%s13049_s27 + $0xc8] sm:$0xff] %vm1167_vm6, %v9373_v49 }
 0x8c0   : > { %9409 = vst.msk [vmem:[%s13049_s27 + $0x18] sm:$0xff] %vm1167_vm6, %v9263_v10  ;;  %9430 = vst.msk [vmem:[%s13049_s27 + $0xc0] sm:$0xff] %vm1167_vm6, %v9368_v24  ;;  %v12166_v19 = vpop.f32.mrb[10].mxu1 }
 0x8c1   : > { %9408 = vst.msk [vmem:[%s13049_s27 + $0x10] sm:$0xff] %vm1167_vm6, %v9258_v54  ;;  %v12133_v29 = vpop.f32.mrb[4].mxu0  ;;  %v9383_v56 = vadd.f32 %v12166_v19, %v15578_v35  ;;  %v9377_v53 = vpop.f32.mrb[11].mxu1 }
 0x8c2   : > { %v9273_v55 = vadd.f32 %v12133_v29, %v15578_v35  ;;  %v9267_v46 = vpop.f32.mrb[5].mxu0  ;;  %v9378_v21 = vadd.f32 %v15578_v35, %v9377_v53 }
 0x8c3   : > { %v9268_v4 = vadd.f32 %v15578_v35, %v9267_v46  ;;  %9433 = vst.msk [vmem:[%s13049_s27 + $0xd8] sm:$0xff] %vm1167_vm6, %v9383_v56 }
 0x8c4   : > { %9411 = vst.msk [vmem:[%s13049_s27 + $0x28] sm:$0xff] %vm1167_vm6, %v9273_v55  ;;  %9432 = vst.msk [vmem:[%s13049_s27 + $0xd0] sm:$0xff] %vm1167_vm6, %v9378_v21  ;;  %v12169_v38 = vpop.f32.mrb[12].mxu1 }
 0x8c5   : > { %9410 = vst.msk [vmem:[%s13049_s27 + $0x20] sm:$0xff] %vm1167_vm6, %v9268_v4  ;;  %v12136_v31 = vpop.f32.mrb[6].mxu0  ;;  %v9393_v14 = vadd.f32 %v12169_v38, %v15578_v35  ;;  %v9387_v39 = vpop.f32.mrb[13].mxu1 }
 0x8c6   : > { %v9283_v45 = vadd.f32 %v12136_v31, %v15578_v35  ;;  %v9277_v47 = vpop.f32.mrb[7].mxu0  ;;  %v9388_v5 = vadd.f32 %v15578_v35, %v9387_v39 }
 0x8c7   : > { %v9278_v13 = vadd.f32 %v15578_v35, %v9277_v47  ;;  %9435 = vst.msk [vmem:[%s13049_s27 + $0xe8] sm:$0xff] %vm1167_vm6, %v9393_v14 }
 0x8c8   : > { %9413 = vst.msk [vmem:[%s13049_s27 + $0x38] sm:$0xff] %vm1167_vm6, %v9283_v45  ;;  %9434 = vst.msk [vmem:[%s13049_s27 + $0xe0] sm:$0xff] %vm1167_vm6, %v9388_v5  ;;  %v12172_v60 = vpop.f32.mrb[14].mxu1 }
 0x8c9   : > { %9412 = vst.msk [vmem:[%s13049_s27 + $0x30] sm:$0xff] %vm1167_vm6, %v9278_v13  ;;  %v12139_v42 = vpop.f32.mrb[8].mxu0  ;;  %v9403_v0 = vadd.f32 %v12172_v60, %v15578_v35  ;;  %v9397_v7 = vpop.f32.mrb[15].mxu1 }
 0x8ca   : > { %v9293_v8 = vadd.f32 %v12139_v42, %v15578_v35  ;;  %v9287_v58 = vpop.f32.mrb[9].mxu0  ;;  %v9398_v25 = vadd.f32 %v15578_v35, %v9397_v7 }
 0x8cb   : > { %v9288_v16 = vadd.f32 %v15578_v35, %v9287_v58  ;;  %9437 = vst.msk [vmem:[%s13049_s27 + $0xf8] sm:$0xff] %vm1167_vm6, %v9403_v0 }
 0x8cc   : > { %9415 = vst.msk [vmem:[%s13049_s27 + $0x48] sm:$0xff] %vm1167_vm6, %v9293_v8  ;;  %9436 = vst.msk [vmem:[%s13049_s27 + $0xf0] sm:$0xff] %vm1167_vm6, %v9398_v25 }
 0x8cd   : > { %9414 = vst.msk [vmem:[%s13049_s27 + $0x40] sm:$0xff] %vm1167_vm6, %v9288_v16  ;;  %v12142_v40 = vpop.f32.mrb[10].mxu0 }
 0x8ce   : > { %v9303_v48 = vadd.f32 %v12142_v40, %v15578_v35  ;;  %v9297_v37 = vpop.f32.mrb[11].mxu0 }
 0x8cf   : > { %v9298_v33 = vadd.f32 %v15578_v35, %v9297_v37 }
 0x8d0   : > { %9417 = vst.msk [vmem:[%s13049_s27 + $0x58] sm:$0xff] %vm1167_vm6, %v9303_v48 }
 0x8d1   : > { %9416 = vst.msk [vmem:[%s13049_s27 + $0x50] sm:$0xff] %vm1167_vm6, %v9298_v33  ;;  %v12145_v9 = vpop.f32.mrb[12].mxu0 }
 0x8d2   : > { %v9313_v63 = vadd.f32 %v12145_v9, %v15578_v35  ;;  %v9307_v20 = vpop.f32.mrb[13].mxu0 }
 0x8d3   : > { %v9308_v1 = vadd.f32 %v15578_v35, %v9307_v20 }
 0x8d4   : > { %9419 = vst.msk [vmem:[%s13049_s27 + $0x68] sm:$0xff] %vm1167_vm6, %v9313_v63 }
 0x8d5   : > { %9418 = vst.msk [vmem:[%s13049_s27 + $0x60] sm:$0xff] %vm1167_vm6, %v9308_v1  ;;  %v12148_v12 = vpop.f32.mrb[14].mxu0 }
 0x8d6   : > { %v9323_v62 = vadd.f32 %v12148_v12, %v15578_v35  ;;  %v9317_v41 = vpop.f32.mrb[15].mxu0 }
 0x8d7   : > { %v9318_v18 = vadd.f32 %v15578_v35, %v9317_v41 }
 0x8d8   : > { %9421 = vst.msk [vmem:[%s13049_s27 + $0x78] sm:$0xff] %vm1167_vm6, %v9323_v62 }
 0x8d9   : > { %9420 = vst.msk [vmem:[%s13049_s27 + $0x70] sm:$0xff] %vm1167_vm6, %v9318_v18 }
 0x8da PF: > { %s15972_s0 = sld [smem:[#allocation8_spill]]  ;;  %s15973_s25 = sld [smem:[#allocation6_spill]] }
 0x8db   : > { %s15974_s26 = sld [smem:[#allocation7_spill]]  ;;  %s15975_s27 = sld [smem:[#allocation9_spill]] }
 0x8dc   : > { %s15976_s28 = sld [smem:[#allocation10_spill]] }
 0x8e0   : > { %s23_s29 = sadd.s32 1, %s15972_s0  }
 0x8e1   : > { %p20_p9 = scmp.ge.s32.totalorder %s23_s29, 8  }
 0x8e3   :  { %22 = sbr.rel (!%p20_p9) target bundleno = 5 (0x5), region = 148 }

</bundles_post_ra>
